<compile_context>
chip_gen: v5e
topology: v5e:2x2
jax: 0.10.0
libtpu: 0.0.40
codegen_flags: <defaults>
</compile_context>

<pallas_src>
import functools

import jax
import jax.numpy as jnp
from jax import lax
from jax.experimental import pallas as pl
from jax.experimental.pallas import tpu as pltpu

LANE = 128          # lane width of a vreg (last dim alignment)
SUBLANE = 8         # sublane count of a vreg (second-to-last dim alignment)
_NEG_INF = -1e9     # bias used for padded vocabulary columns (exp underflows to 0)
_VMEM_LIMIT = 32 * 1024 * 1024   # modest explicit scoped-VMEM budget (safe on v5e/v6e/v7x)


def _round_up(x, m):
    return ((x + m - 1) // m) * m


def _pad2d(a, rows, cols, fill=0.0):
    r, c = a.shape
    return jnp.pad(a, ((0, rows - r), (0, cols - c)), constant_values=fill)


def _pick_block_m(m, cap=256):
    """Largest row-block size <= cap that divides m (m is always a multiple of 8)."""
    for bm in (256, 128, 64, 32, 16, 8):
        if bm <= cap and m % bm == 0:
            return bm
    return m


# --------------------- gates pre-pass: big matmul + bias ----------------------
def _matmul_bias_kernel(x_ref, w_ref, b_ref, o_ref):
    x = x_ref[...].astype(jnp.bfloat16)          # bf16 MXU operands, f32 accumulation
    o_ref[...] = (jnp.dot(x, w_ref[...], preferred_element_type=jnp.float32)
                  + b_ref[...])


def matmul_bias(x, w_bf16, b):
    """x: (M, K) f32, w: (K, N) bf16, b: (1, N) f32 -> (M, N) f32.  M % 8 == 0."""
    M, K = x.shape
    N = w_bf16.shape[1]
    bm = _pick_block_m(M)
    return pl.pallas_call(
        _matmul_bias_kernel,
        out_shape=jax.ShapeDtypeStruct((M, N), jnp.float32),
        grid_spec=pltpu.PrefetchScalarGridSpec(
            num_scalar_prefetch=0,
            grid=(M // bm,),
            in_specs=[
                pl.BlockSpec((bm, K), lambda i: (i, 0)),
                pl.BlockSpec((K, N), lambda i: (0, 0)),   # weight: constant block index
                pl.BlockSpec((1, N), lambda i: (0, 0)),
            ],
            out_specs=pl.BlockSpec((bm, N), lambda i: (i, 0)),
        ),
        compiler_params=pltpu.CompilerParams(
            dimension_semantics=("parallel",),            # megacore-shardable on v7x
            vmem_limit_bytes=_VMEM_LIMIT),
    )(x, w_bf16, b)


# ------------------------ LSTM recurrence (time loop in-kernel) ----------------
def _lstm_recurrence_kernel(gx_ref, u_ref, h0_ref, c0_ref, y_ref, hT_ref, cT_ref):
    """gx = x@W + b precomputed.  Whole sequence processed by one fori_loop; only the
    small h @ U matmul is on the serial path.  Requires T >= 1."""
    T = gx_ref.shape[0]
    Hp = h0_ref.shape[-1]        # padded hidden width (multiple of 128)

    def step(t, carry):
        h, c = carry
        gates = gx_ref[t] + jnp.dot(h.astype(jnp.bfloat16), u_ref[...],
                                    preferred_element_type=jnp.float32)   # (Bp, 4*Hp)
        # Gate slabs are 128-lane aligned (Hp is a multiple of 128) -> no relayouts.
        i_g = jax.nn.sigmoid(gates[:, 0 * Hp:1 * Hp])
        f_g = jax.nn.sigmoid(gates[:, 1 * Hp:2 * Hp])
        g_g = jnp.tanh(gates[:, 2 * Hp:3 * Hp])
        o_g = jax.nn.sigmoid(gates[:, 3 * Hp:4 * Hp])
        c_new = f_g * c + i_g * g_g
        h_new = o_g * jnp.tanh(c_new)
        y_ref[t] = h_new
        return h_new, c_new

    hT, cT = lax.fori_loop(0, T, step, (h0_ref[...], c0_ref[...]))
    hT_ref[...] = hT
    cT_ref[...] = cT


def lstm_layer(gx, u_bf16, h0, c0):
    """gx: (T, Bp, 4*Hp) f32, u: (Hp, 4*Hp) bf16, h0/c0: (Bp, Hp) f32."""
    T, Bp, G4 = gx.shape
    Hp = h0.shape[-1]
    # TODO(synk): for long sequences, chunk T over a grid axis (16-32 steps per grid
    # step, carry h/c in VMEM scratch) so gx/y need not be fully VMEM-resident.
    return pl.pallas_call(
        _lstm_recurrence_kernel,
        out_shape=(jax.ShapeDtypeStruct((T, Bp, Hp), jnp.float32),
                   jax.ShapeDtypeStruct((Bp, Hp), jnp.float32),
                   jax.ShapeDtypeStruct((Bp, Hp), jnp.float32)),
        grid_spec=pltpu.PrefetchScalarGridSpec(
            num_scalar_prefetch=0,
            grid=(1,),
            in_specs=[
                pl.BlockSpec((T, Bp, G4), lambda i: (0, 0, 0)),
                pl.BlockSpec((Hp, G4), lambda i: (0, 0)),
                pl.BlockSpec((Bp, Hp), lambda i: (0, 0)),
                pl.BlockSpec((Bp, Hp), lambda i: (0, 0)),
            ],
            out_specs=(pl.BlockSpec((T, Bp, Hp), lambda i: (0, 0, 0)),
                       pl.BlockSpec((Bp, Hp), lambda i: (0, 0)),
                       pl.BlockSpec((Bp, Hp), lambda i: (0, 0))),
        ),
        compiler_params=pltpu.CompilerParams(
            dimension_semantics=("arbitrary",),
            vmem_limit_bytes=_VMEM_LIMIT),
    )(gx, u_bf16, h0, c0)


# ------------------------- Mixture-of-Softmaxes head --------------------------
def _mos_head_kernel(h_ref, wlat_ref, blat_ref, wdec_ref, bdec_ref, wpri_ref,
                     out_ref, *, n_experts, ninp_p):
    MB = h_ref.shape[0]
    h = h_ref[...].astype(jnp.bfloat16)

    latent = jnp.tanh(
        jnp.dot(h, wlat_ref[...], preferred_element_type=jnp.float32)
        + blat_ref[...])                                           # (MB, E*ninp_p)

    prior = jax.nn.softmax(
        jnp.dot(h, wpri_ref[...], preferred_element_type=jnp.float32), axis=-1)  # (MB, E)

    # Batch all expert decoder matmuls into one MXU op: stack the lane-aligned
    # 128-wide expert slabs along rows -> a single (E*MB, ninp_p) x (ninp_p, ntok_p) dot.
    lat_stacked = jnp.concatenate(
        [latent[:, e * ninp_p:(e + 1) * ninp_p] for e in range(n_experts)],
        axis=0).astype(jnp.bfloat16)                               # (E*MB, ninp_p)

    logits = (jnp.dot(lat_stacked, wdec_ref[...],
                      preferred_element_type=jnp.float32)
              + bdec_ref[...])                                     # (E*MB, ntok_p)
    p = jax.nn.softmax(logits, axis=-1)   # padded vocab cols have bias -1e9 -> prob 0

    ntok_p = logits.shape[-1]
    prob = jnp.zeros((MB, ntok_p), jnp.float32)
    for e in range(n_experts):            # cheap VPU-only combine (matmul already batched)
        prob = prob + p[e * MB:(e + 1) * MB, :] * prior[:, e:e + 1]

    out_ref[...] = jnp.log(prob + 1e-8)


def mos_head(h_flat, wlat, blat, wdec, bdec, wpri, *, n_experts, ninp_p):
    """h_flat: (M, nhidlast_p) f32; weights bf16, biases f32 (padded)."""
    M, Kp = h_flat.shape
    ntok_p = wdec.shape[1]
    bm = _pick_block_m(M)
    # TODO(synk): for real vocab sizes, additionally tile over ntoken with an online
    # softmax and deeper buffering of the wdec stream (smaller tiles on v7x's 64 MiB VMEM).
    kernel = functools.partial(_mos_head_kernel, n_experts=n_experts, ninp_p=ninp_p)
    return pl.pallas_call(
        kernel,
        out_shape=jax.ShapeDtypeStruct((M, ntok_p), jnp.float32),
        grid_spec=pltpu.PrefetchScalarGridSpec(
            num_scalar_prefetch=0,
            grid=(M // bm,),
            in_specs=[
                pl.BlockSpec((bm, Kp), lambda i: (i, 0)),
                pl.BlockSpec((Kp, n_experts * ninp_p), lambda i: (0, 0)),
                pl.BlockSpec((1, n_experts * ninp_p), lambda i: (0, 0)),
                pl.BlockSpec((ninp_p, ntok_p), lambda i: (0, 0)),
                pl.BlockSpec((1, ntok_p), lambda i: (0, 0)),
                pl.BlockSpec((Kp, n_experts), lambda i: (0, 0)),
            ],
            out_specs=pl.BlockSpec((bm, ntok_p), lambda i: (i, 0)),
        ),
        compiler_params=pltpu.CompilerParams(
            dimension_semantics=("parallel",),            # uses both TCs on v7x when >1 block
            vmem_limit_bytes=_VMEM_LIMIT),
    )(h_flat, wlat, blat, wdec, bdec, wpri)


# ------------------------------- parameters ------------------------------------
def init_params(key, *, ntoken, ninp, nhid, nhidlast, nlayers, n_experts):
    """Logical (unpadded) f32 parameters, matching RNNModel.init_weights semantics."""
    keys = jax.random.split(key, 4 + 3 * nlayers + 3)
    ki = iter(keys)
    p = {}
    initrange = 0.1
    p["encoder"] = jax.random.uniform(next(ki), (ntoken, ninp),
                                      minval=-initrange, maxval=initrange)
    p["rnns"] = []
    for l in range(nlayers):
        din = ninp if l == 0 else nhid
        h = nhid if l != nlayers - 1 else nhidlast
        s = 1.0 / jnp.sqrt(h)
        p["rnns"].append({
            "W": jax.random.uniform(next(ki), (din, 4 * h), minval=-s, maxval=s),
            "U": jax.random.uniform(next(ki), (h, 4 * h), minval=-s, maxval=s),
            "b": jax.random.uniform(next(ki), (1, 4 * h), minval=-s, maxval=s),
        })
    s = 1.0 / jnp.sqrt(nhidlast)
    p["latent_W"] = jax.random.uniform(next(ki), (nhidlast, n_experts * ninp),
                                       minval=-s, maxval=s)
    p["latent_b"] = jax.random.uniform(next(ki), (1, n_experts * ninp),
                                       minval=-s, maxval=s)
    p["prior_W"] = jax.random.uniform(next(ki), (nhidlast, n_experts),
                                      minval=-s, maxval=s)
    p["decoder_W"] = jax.random.uniform(next(ki), (ninp, ntoken),
                                        minval=-initrange, maxval=initrange)
    p["decoder_b"] = jnp.zeros((1, ntoken), jnp.float32)
    p["decoder_gain"] = jnp.ones((1, ninp), jnp.float32)
    return jax.tree.map(lambda a: a.astype(jnp.float32), p)


def prepare_params(p, *, ntoken, ninp, nhid, nhidlast, nlayers, n_experts):
    """One-time weight transform: pad to (8,128)-aligned layouts, cast matmul weights to
    bf16, fold decoder_gain into decoder_W, and mask padded vocab columns via the bias."""
    ninp_p = _round_up(ninp, LANE)
    ntok_p = _round_up(ntoken, LANE)
    nhl_p = _round_up(nhidlast, LANE)
    dp = {"encoder": _pad2d(p["encoder"], ntoken, ninp_p)}   # rows stay = ntoken (gather)

    dp["rnns"] = []
    for l, lp in enumerate(p["rnns"]):
        din = ninp if l == 0 else nhid
        h = nhid if l != nlayers - 1 else nhidlast
        din_p = _round_up(din, LANE)
        h_p = _round_up(h, LANE)
        # Pad each of the 4 gate slabs to h_p lanes so in-kernel slices are lane-aligned.
        W = jnp.zeros((din_p, 4, h_p), jnp.float32).at[:din, :, :h].set(
            lp["W"].reshape(din, 4, h))
        U = jnp.zeros((h_p, 4, h_p), jnp.float32).at[:h, :, :h].set(
            lp["U"].reshape(h, 4, h))
        b = jnp.zeros((1, 4, h_p), jnp.float32).at[0, :, :h].set(lp["b"].reshape(4, h))
        dp["rnns"].append({
            "W": W.reshape(din_p, 4 * h_p).astype(jnp.bfloat16),
            "U": U.reshape(h_p, 4 * h_p).astype(jnp.bfloat16),
            "b": b.reshape(1, 4 * h_p),
        })

    wlat = jnp.zeros((nhl_p, n_experts, ninp_p), jnp.float32).at[
        :nhidlast, :, :ninp].set(p["latent_W"].reshape(nhidlast, n_experts, ninp))
    blat = jnp.zeros((1, n_experts, ninp_p), jnp.float32).at[
        0, :, :ninp].set(p["latent_b"].reshape(n_experts, ninp))
    dp["latent_W"] = wlat.reshape(nhl_p, n_experts * ninp_p).astype(jnp.bfloat16)
    dp["latent_b"] = blat.reshape(1, n_experts * ninp_p)
    dp["prior_W"] = _pad2d(p["prior_W"], nhl_p, n_experts).astype(jnp.bfloat16)

    # Fold decoder_gain into decoder_W; mask padded vocab columns with a -1e9 bias.
    wdec = p["decoder_W"] * p["decoder_gain"].reshape(ninp, 1)
    dp["decoder_W"] = _pad2d(wdec, ninp_p, ntok_p).astype(jnp.bfloat16)
    dp["decoder_b"] = jnp.full((1, ntok_p), _NEG_INF, jnp.float32).at[
        0, :ntoken].set(p["decoder_b"][0])
    return dp


def init_hidden(bsz, *, nhid, nhidlast, nlayers):
    hidden = []
    for l in range(nlayers):
        h = nhid if l != nlayers - 1 else nhidlast
        hidden.append((jnp.zeros((1, bsz, h), jnp.float32),
                       jnp.zeros((1, bsz, h), jnp.float32)))
    return hidden


# --------------------------------- forward -------------------------------------
def rnn_model_forward(dev_params, tokens, hidden, *, ntoken, ninp, nhid,
                      nhidlast, nlayers, n_experts):
    """tokens: (T, B) int32.  Returns (log_prob (T, B, ntoken), new_hidden)."""
    T, B = tokens.shape
    B_pad = _round_up(B, SUBLANE)
    ninp_p = _round_up(ninp, LANE)
    ntok_p = _round_up(ntoken, LANE)
    nhl_p = _round_up(nhidlast, LANE)

    # Embedding lookup (glue: plain JAX gather) + pad batch to 8 sublanes.
    # TODO(synk): for large ninp, fuse the gather into the gates pre-pass via
    # scalar-prefetched token ids and a pl.Element row-gather index_map.
    emb = jnp.take(dev_params["encoder"], tokens, axis=0)          # (T, B, ninp_p)
    emb = jnp.pad(emb, ((0, 0), (0, B_pad - B), (0, 0)))           # (T, B_pad, ninp_p)

    raw = emb
    new_hidden = []
    for l, lp in enumerate(dev_params["rnns"]):
        h_log = nhid if l != nlayers - 1 else nhidlast
        din_p = lp["W"].shape[0]
        h_p = lp["U"].shape[0]
        # Hoisted input projection: one big matmul over all timesteps.
        gx = matmul_bias(raw.reshape(T * B_pad, din_p), lp["W"], lp["b"])
        gx = gx.reshape(T, B_pad, 4 * h_p)
        h0 = jnp.zeros((B_pad, h_p), jnp.float32).at[:B, :h_log].set(hidden[l][0][0])
        c0 = jnp.zeros((B_pad, h_p), jnp.float32).at[:B, :h_log].set(hidden[l][1][0])
        raw, hT, cT = lstm_layer(gx, lp["U"], h0, c0)              # raw: (T, B_pad, h_p)
        new_hidden.append((hT[:B, :h_log][None], cT[:B, :h_log][None]))

    h_flat = raw.reshape(T * B_pad, nhl_p)                         # lane-dense slab
    log_prob = mos_head(h_flat,
                        dev_params["latent_W"], dev_params["latent_b"],
                        dev_params["decoder_W"], dev_params["decoder_b"],
                        dev_params["prior_W"],
                        n_experts=n_experts, ninp_p=ninp_p)
    model_output = log_prob.reshape(T, B_pad, ntok_p)[:, :B, :ntoken]
    return model_output, new_hidden


# ----------------------------------- main ---------------------------------------
if __name__ == "__main__":
    ntoken, ninp, nhid, nhidlast = 64, 16, 32, 16
    nlayers, n_experts = 2, 4
    T, B = 8, 2

    key = jax.random.PRNGKey(0)
    kp, kt = jax.random.split(key)
    params = init_params(kp, ntoken=ntoken, ninp=ninp, nhid=nhid,
                         nhidlast=nhidlast, nlayers=nlayers, n_experts=n_experts)
    dev_params = prepare_params(params, ntoken=ntoken, ninp=ninp, nhid=nhid,
                                nhidlast=nhidlast, nlayers=nlayers,
                                n_experts=n_experts)
    tokens = jax.random.randint(kt, (T, B), 0, ntoken, dtype=jnp.int32)
    hidden = init_hidden(B, nhid=nhid, nhidlast=nhidlast, nlayers=nlayers)

    fwd = jax.jit(functools.partial(
        rnn_model_forward, ntoken=ntoken, ninp=ninp, nhid=nhid,
        nhidlast=nhidlast, nlayers=nlayers, n_experts=n_experts))

    model_output, new_hidden = fwd(dev_params, tokens, hidden)
    jax.block_until_ready(model_output)
    for h, c in new_hidden:
        jax.block_until_ready(h)
        jax.block_until_ready(c)

    assert model_output.shape == (T, B, ntoken)
    assert new_hidden[0][0].shape == (1, B, nhid)
    assert new_hidden[-1][0].shape == (1, B, nhidlast)
    # log-probabilities: each row should (approximately) sum to 1 in prob space.
    row_sums = jnp.exp(model_output).sum(-1)
    assert bool(jnp.all(jnp.abs(row_sums - 1.0) < 1e-3))
    print("KERNEL_OK")
</pallas_src>

<mosaic_0001>
module attributes {stable_mosaic.version = 11 : i64} {
  func.func @_lstm_recurrence_kernel(%arg0: i32, %arg1: memref<8x8x512xf32, #tpu.memory_space<vmem>>, %arg2: memref<128x512xbf16, #tpu.memory_space<vmem>>, %arg3: memref<8x128xf32, #tpu.memory_space<vmem>>, %arg4: memref<8x128xf32, #tpu.memory_space<vmem>>, %arg5: memref<8x8x128xf32, #tpu.memory_space<vmem>>, %arg6: memref<8x128xf32, #tpu.memory_space<vmem>>, %arg7: memref<8x128xf32, #tpu.memory_space<vmem>>) attributes {dimension_semantics = [#tpu.dimension_semantics<arbitrary>], iteration_bounds = array<i64: 1>, scalar_prefetch = 0 : i64, scratch_operands = 0 : i64, tpu.core_type = #tpu.core_type<tc>, window_params = [{pipeline_mode = #tpu.pipeline_mode<synchronous>, transform_indices = @transform_0, window_bounds = array<i64: 8, 8, 512>}, {pipeline_mode = #tpu.pipeline_mode<synchronous>, transform_indices = @transform_1, window_bounds = array<i64: 128, 512>}, {pipeline_mode = #tpu.pipeline_mode<synchronous>, transform_indices = @transform_2, window_bounds = array<i64: 8, 128>}, {pipeline_mode = #tpu.pipeline_mode<synchronous>, transform_indices = @transform_3, window_bounds = array<i64: 8, 128>}, {pipeline_mode = #tpu.pipeline_mode<synchronous>, transform_indices = @transform_4, window_bounds = array<i64: 8, 8, 128>}, {pipeline_mode = #tpu.pipeline_mode<synchronous>, transform_indices = @transform_5, window_bounds = array<i64: 8, 128>}, {pipeline_mode = #tpu.pipeline_mode<synchronous>, transform_indices = @transform_6, window_bounds = array<i64: 8, 128>}]} {
    %c0 = arith.constant 0 : index
    %c0_0 = arith.constant 0 : index
    %0 = vector.load %arg3[%c0, %c0_0] : memref<8x128xf32, #tpu.memory_space<vmem>>, vector<8x128xf32>
    %c0_1 = arith.constant 0 : index
    %c0_2 = arith.constant 0 : index
    %1 = vector.load %arg4[%c0_1, %c0_2] : memref<8x128xf32, #tpu.memory_space<vmem>>, vector<8x128xf32>
    %c0_i32 = arith.constant 0 : i32
    %c8_i32 = arith.constant 8 : i32
    %2 = arith.addi %c0_i32, %c8_i32 : i32
    %c1_i32 = arith.constant 1 : i32
    %3:2 = scf.for %arg8 = %c0_i32 to %2 step %c1_i32 iter_args(%arg9 = %0, %arg10 = %1) -> (vector<8x128xf32>, vector<8x128xf32>)  : i32 {
      %6 = arith.index_cast %arg8 : i32 to index
      %c0_8 = arith.constant 0 : index
      %c0_9 = arith.constant 0 : index
      %7 = vector.load %arg1[%6, %c0_8, %c0_9] : memref<8x8x512xf32, #tpu.memory_space<vmem>>, vector<1x8x512xf32>
      %8 = vector.shape_cast %7 : vector<1x8x512xf32> to vector<8x512xf32>
      %9 = arith.truncf %arg9 : vector<8x128xf32> to vector<8x128xbf16>
      %c0_10 = arith.constant 0 : index
      %c0_11 = arith.constant 0 : index
      %10 = vector.load %arg2[%c0_10, %c0_11] : memref<128x512xbf16, #tpu.memory_space<vmem>>, vector<128x512xbf16>
      %cst = arith.constant dense<0.000000e+00> : vector<8x512xf32>
      %11 = tpu.matmul %9, %10, %cst {dimension_numbers = #tpu.dot_dimension_numbers<[1], [0], [0], [1], [0, 0, 1, 1], [], []>} : vector<8x128xbf16>, vector<128x512xbf16>, vector<8x512xf32> -> vector<8x512xf32>
      %12 = arith.addf %8, %11 : vector<8x512xf32>
      %13 = vector.extract_strided_slice %12 {offsets = [0, 0], sizes = [8, 128], strides = [1, 1]} : vector<8x512xf32> to vector<8x128xf32>
      %14 = arith.negf %13 : vector<8x128xf32>
      %15 = math.exp %14 : vector<8x128xf32>
      %cst_12 = arith.constant 1.000000e+00 : f32
      %16 = vector.broadcast %cst_12 : f32 to vector<8x128xf32>
      %17 = arith.addf %16, %15 : vector<8x128xf32>
      %18 = arith.divf %16, %17 : vector<8x128xf32>
      %19 = vector.extract_strided_slice %12 {offsets = [0, 128], sizes = [8, 128], strides = [1, 1]} : vector<8x512xf32> to vector<8x128xf32>
      %20 = arith.negf %19 : vector<8x128xf32>
      %21 = math.exp %20 : vector<8x128xf32>
      %cst_13 = arith.constant 1.000000e+00 : f32
      %22 = vector.broadcast %cst_13 : f32 to vector<8x128xf32>
      %23 = arith.addf %22, %21 : vector<8x128xf32>
      %24 = arith.divf %22, %23 : vector<8x128xf32>
      %25 = vector.extract_strided_slice %12 {offsets = [0, 256], sizes = [8, 128], strides = [1, 1]} : vector<8x512xf32> to vector<8x128xf32>
      %26 = math.tanh %25 : vector<8x128xf32>
      %27 = vector.extract_strided_slice %12 {offsets = [0, 384], sizes = [8, 128], strides = [1, 1]} : vector<8x512xf32> to vector<8x128xf32>
      %28 = arith.negf %27 : vector<8x128xf32>
      %29 = math.exp %28 : vector<8x128xf32>
      %cst_14 = arith.constant 1.000000e+00 : f32
      %30 = vector.broadcast %cst_14 : f32 to vector<8x128xf32>
      %31 = arith.addf %30, %29 : vector<8x128xf32>
      %32 = arith.divf %30, %31 : vector<8x128xf32>
      %33 = arith.mulf %24, %arg10 : vector<8x128xf32>
      %34 = arith.mulf %18, %26 : vector<8x128xf32>
      %35 = arith.addf %33, %34 : vector<8x128xf32>
      %36 = math.tanh %35 : vector<8x128xf32>
      %37 = arith.mulf %32, %36 : vector<8x128xf32>
      %38 = arith.index_cast %arg8 : i32 to index
      %c0_15 = arith.constant 0 : index
      %c0_16 = arith.constant 0 : index
      %39 = vector.load %arg5[%38, %c0_15, %c0_16] : memref<8x8x128xf32, #tpu.memory_space<vmem>>, vector<1x8x128xf32>
      %40 = vector.shape_cast %39 : vector<1x8x128xf32> to vector<8x128xf32>
      %41 = vector.shape_cast %37 : vector<8x128xf32> to vector<1x8x128xf32>
      tpu.vector_store %arg5[%38, %c0_15, %c0_16], %41 {strides = array<i32>} : memref<8x8x128xf32, #tpu.memory_space<vmem>>, vector<1x8x128xf32>,
      scf.yield %37, %35 : vector<8x128xf32>, vector<8x128xf32>
    }
    %c8_i32_3 = arith.constant 8 : i32
    %c0_4 = arith.constant 0 : index
    %c0_5 = arith.constant 0 : index
    %4 = vector.load %arg6[%c0_4, %c0_5] : memref<8x128xf32, #tpu.memory_space<vmem>>, vector<8x128xf32>
    tpu.vector_store %arg6[%c0_4, %c0_5], %3#0 {strides = array<i32>} : memref<8x128xf32, #tpu.memory_space<vmem>>, vector<8x128xf32>,
    %c0_6 = arith.constant 0 : index
    %c0_7 = arith.constant 0 : index
    %5 = vector.load %arg7[%c0_6, %c0_7] : memref<8x128xf32, #tpu.memory_space<vmem>>, vector<8x128xf32>
    tpu.vector_store %arg7[%c0_6, %c0_7], %3#1 {strides = array<i32>} : memref<8x128xf32, #tpu.memory_space<vmem>>, vector<8x128xf32>,
    return
  }
  func.func @transform_0(%arg0: i32) -> (i32, i32, i32) {
    %c0_i32 = arith.constant 0 : i32
    %c0_i32_0 = arith.constant 0 : i32
    %c0_i32_1 = arith.constant 0 : i32
    %c0_i32_2 = arith.constant 0 : i32
    return %c0_i32, %c0_i32_0, %c0_i32_1 : i32, i32, i32
  }
  func.func @transform_1(%arg0: i32) -> (i32, i32) {
    %c0_i32 = arith.constant 0 : i32
    %c0_i32_0 = arith.constant 0 : i32
    %c0_i32_1 = arith.constant 0 : i32
    return %c0_i32, %c0_i32_0 : i32, i32
  }
  func.func @transform_2(%arg0: i32) -> (i32, i32) {
    %c0_i32 = arith.constant 0 : i32
    %c0_i32_0 = arith.constant 0 : i32
    %c0_i32_1 = arith.constant 0 : i32
    return %c0_i32, %c0_i32_0 : i32, i32
  }
  func.func @transform_3(%arg0: i32) -> (i32, i32) {
    %c0_i32 = arith.constant 0 : i32
    %c0_i32_0 = arith.constant 0 : i32
    %c0_i32_1 = arith.constant 0 : i32
    return %c0_i32, %c0_i32_0 : i32, i32
  }
  func.func @transform_4(%arg0: i32) -> (i32, i32, i32) {
    %c0_i32 = arith.constant 0 : i32
    %c0_i32_0 = arith.constant 0 : i32
    %c0_i32_1 = arith.constant 0 : i32
    %c0_i32_2 = arith.constant 0 : i32
    return %c0_i32, %c0_i32_0, %c0_i32_1 : i32, i32, i32
  }
  func.func @transform_5(%arg0: i32) -> (i32, i32) {
    %c0_i32 = arith.constant 0 : i32
    %c0_i32_0 = arith.constant 0 : i32
    %c0_i32_1 = arith.constant 0 : i32
    return %c0_i32, %c0_i32_0 : i32, i32
  }
  func.func @transform_6(%arg0: i32) -> (i32, i32) {
    %c0_i32 = arith.constant 0 : i32
    %c0_i32_0 = arith.constant 0 : i32
    %c0_i32_1 = arith.constant 0 : i32
    return %c0_i32, %c0_i32_0 : i32, i32
  }
}

module attributes {stable_mosaic.version = 11 : i64} {
  func.func @_matmul_bias_kernel(%arg0: i32, %arg1: memref<64x128xf32, #tpu.memory_space<vmem>>, %arg2: memref<128x512xbf16, #tpu.memory_space<vmem>>, %arg3: memref<1x512xf32, #tpu.memory_space<vmem>>, %arg4: memref<64x512xf32, #tpu.memory_space<vmem>>) attributes {dimension_semantics = [#tpu.dimension_semantics<parallel>], iteration_bounds = array<i64: 1>, scalar_prefetch = 0 : i64, scratch_operands = 0 : i64, tpu.core_type = #tpu.core_type<tc>, window_params = [{transform_indices = @transform_0, window_bounds = array<i64: 64, 128>}, {pipeline_mode = #tpu.pipeline_mode<synchronous>, transform_indices = @transform_1, window_bounds = array<i64: 128, 512>}, {pipeline_mode = #tpu.pipeline_mode<synchronous>, transform_indices = @transform_2, window_bounds = array<i64: 1, 512>}, {transform_indices = @transform_3, window_bounds = array<i64: 64, 512>}]} {
    %c0 = arith.constant 0 : index
    %c0_0 = arith.constant 0 : index
    %0 = vector.load %arg1[%c0, %c0_0] : memref<64x128xf32, #tpu.memory_space<vmem>>, vector<64x128xf32>
    %1 = arith.truncf %0 : vector<64x128xf32> to vector<64x128xbf16>
    %c0_1 = arith.constant 0 : index
    %c0_2 = arith.constant 0 : index
    %2 = vector.load %arg2[%c0_1, %c0_2] : memref<128x512xbf16, #tpu.memory_space<vmem>>, vector<128x512xbf16>
    %cst = arith.constant dense<0.000000e+00> : vector<64x512xf32>
    %3 = tpu.matmul %1, %2, %cst {dimension_numbers = #tpu.dot_dimension_numbers<[1], [0], [0], [1], [0, 0, 1, 1], [], []>} : vector<64x128xbf16>, vector<128x512xbf16>, vector<64x512xf32> -> vector<64x512xf32>
    %c0_3 = arith.constant 0 : index
    %c0_4 = arith.constant 0 : index
    %4 = vector.load %arg3[%c0_3, %c0_4] : memref<1x512xf32, #tpu.memory_space<vmem>>, vector<1x512xf32>
    %5 = vector.broadcast %4 : vector<1x512xf32> to vector<64x512xf32>
    %6 = arith.addf %3, %5 : vector<64x512xf32>
    %c0_5 = arith.constant 0 : index
    %c0_6 = arith.constant 0 : index
    %7 = vector.load %arg4[%c0_5, %c0_6] : memref<64x512xf32, #tpu.memory_space<vmem>>, vector<64x512xf32>
    tpu.vector_store %arg4[%c0_5, %c0_6], %6 {strides = array<i32>} : memref<64x512xf32, #tpu.memory_space<vmem>>, vector<64x512xf32>,
    return
  }
  func.func @transform_0(%arg0: i32) -> (i32, i32) {
    %c0_i32 = arith.constant 0 : i32
    %c0_i32_0 = arith.constant 0 : i32
    return %arg0, %c0_i32 : i32, i32
  }
  func.func @transform_1(%arg0: i32) -> (i32, i32) {
    %c0_i32 = arith.constant 0 : i32
    %c0_i32_0 = arith.constant 0 : i32
    %c0_i32_1 = arith.constant 0 : i32
    return %c0_i32, %c0_i32_0 : i32, i32
  }
  func.func @transform_2(%arg0: i32) -> (i32, i32) {
    %c0_i32 = arith.constant 0 : i32
    %c0_i32_0 = arith.constant 0 : i32
    %c0_i32_1 = arith.constant 0 : i32
    return %c0_i32, %c0_i32_0 : i32, i32
  }
  func.func @transform_3(%arg0: i32) -> (i32, i32) {
    %c0_i32 = arith.constant 0 : i32
    %c0_i32_0 = arith.constant 0 : i32
    return %arg0, %c0_i32 : i32, i32
  }
}

module attributes {stable_mosaic.version = 11 : i64} {
  func.func @_matmul_bias_kernel(%arg0: i32, %arg1: memref<64x128xf32, #tpu.memory_space<vmem>>, %arg2: memref<128x512xbf16, #tpu.memory_space<vmem>>, %arg3: memref<1x512xf32, #tpu.memory_space<vmem>>, %arg4: memref<64x512xf32, #tpu.memory_space<vmem>>) attributes {dimension_semantics = [#tpu.dimension_semantics<parallel>], iteration_bounds = array<i64: 1>, scalar_prefetch = 0 : i64, scratch_operands = 0 : i64, tpu.core_type = #tpu.core_type<tc>, window_params = [{transform_indices = @transform_0, window_bounds = array<i64: 64, 128>}, {pipeline_mode = #tpu.pipeline_mode<synchronous>, transform_indices = @transform_1, window_bounds = array<i64: 128, 512>}, {pipeline_mode = #tpu.pipeline_mode<synchronous>, transform_indices = @transform_2, window_bounds = array<i64: 1, 512>}, {transform_indices = @transform_3, window_bounds = array<i64: 64, 512>}]} {
    %c0 = arith.constant 0 : index
    %c0_0 = arith.constant 0 : index
    %0 = vector.load %arg1[%c0, %c0_0] : memref<64x128xf32, #tpu.memory_space<vmem>>, vector<64x128xf32>
    %1 = arith.truncf %0 : vector<64x128xf32> to vector<64x128xbf16>
    %c0_1 = arith.constant 0 : index
    %c0_2 = arith.constant 0 : index
    %2 = vector.load %arg2[%c0_1, %c0_2] : memref<128x512xbf16, #tpu.memory_space<vmem>>, vector<128x512xbf16>
    %cst = arith.constant dense<0.000000e+00> : vector<64x512xf32>
    %3 = tpu.matmul %1, %2, %cst {dimension_numbers = #tpu.dot_dimension_numbers<[1], [0], [0], [1], [0, 0, 1, 1], [], []>} : vector<64x128xbf16>, vector<128x512xbf16>, vector<64x512xf32> -> vector<64x512xf32>
    %c0_3 = arith.constant 0 : index
    %c0_4 = arith.constant 0 : index
    %4 = vector.load %arg3[%c0_3, %c0_4] : memref<1x512xf32, #tpu.memory_space<vmem>>, vector<1x512xf32>
    %5 = vector.broadcast %4 : vector<1x512xf32> to vector<64x512xf32>
    %6 = arith.addf %3, %5 : vector<64x512xf32>
    %c0_5 = arith.constant 0 : index
    %c0_6 = arith.constant 0 : index
    %7 = vector.load %arg4[%c0_5, %c0_6] : memref<64x512xf32, #tpu.memory_space<vmem>>, vector<64x512xf32>
    tpu.vector_store %arg4[%c0_5, %c0_6], %6 {strides = array<i32>} : memref<64x512xf32, #tpu.memory_space<vmem>>, vector<64x512xf32>,
    return
  }
  func.func @transform_0(%arg0: i32) -> (i32, i32) {
    %c0_i32 = arith.constant 0 : i32
    %c0_i32_0 = arith.constant 0 : i32
    return %arg0, %c0_i32 : i32, i32
  }
  func.func @transform_1(%arg0: i32) -> (i32, i32) {
    %c0_i32 = arith.constant 0 : i32
    %c0_i32_0 = arith.constant 0 : i32
    %c0_i32_1 = arith.constant 0 : i32
    return %c0_i32, %c0_i32_0 : i32, i32
  }
  func.func @transform_2(%arg0: i32) -> (i32, i32) {
    %c0_i32 = arith.constant 0 : i32
    %c0_i32_0 = arith.constant 0 : i32
    %c0_i32_1 = arith.constant 0 : i32
    return %c0_i32, %c0_i32_0 : i32, i32
  }
  func.func @transform_3(%arg0: i32) -> (i32, i32) {
    %c0_i32 = arith.constant 0 : i32
    %c0_i32_0 = arith.constant 0 : i32
    return %arg0, %c0_i32 : i32, i32
  }
}

module attributes {stable_mosaic.version = 11 : i64} {
  func.func @_mos_head_kernel(%arg0: i32, %arg1: memref<64x128xf32, #tpu.memory_space<vmem>>, %arg2: memref<128x512xbf16, #tpu.memory_space<vmem>>, %arg3: memref<1x512xf32, #tpu.memory_space<vmem>>, %arg4: memref<128x128xbf16, #tpu.memory_space<vmem>>, %arg5: memref<1x128xf32, #tpu.memory_space<vmem>>, %arg6: memref<128x4xbf16, #tpu.memory_space<vmem>>, %arg7: memref<64x128xf32, #tpu.memory_space<vmem>>) attributes {dimension_semantics = [#tpu.dimension_semantics<parallel>], iteration_bounds = array<i64: 1>, scalar_prefetch = 0 : i64, scratch_operands = 0 : i64, tpu.core_type = #tpu.core_type<tc>, window_params = [{transform_indices = @transform_0, window_bounds = array<i64: 64, 128>}, {pipeline_mode = #tpu.pipeline_mode<synchronous>, transform_indices = @transform_1, window_bounds = array<i64: 128, 512>}, {pipeline_mode = #tpu.pipeline_mode<synchronous>, transform_indices = @transform_2, window_bounds = array<i64: 1, 512>}, {pipeline_mode = #tpu.pipeline_mode<synchronous>, transform_indices = @transform_3, window_bounds = array<i64: 128, 128>}, {pipeline_mode = #tpu.pipeline_mode<synchronous>, transform_indices = @transform_4, window_bounds = array<i64: 1, 128>}, {pipeline_mode = #tpu.pipeline_mode<synchronous>, transform_indices = @transform_5, window_bounds = array<i64: 128, 4>}, {transform_indices = @transform_6, window_bounds = array<i64: 64, 128>}]} {
    %c0 = arith.constant 0 : index
    %c0_0 = arith.constant 0 : index
    %0 = vector.load %arg1[%c0, %c0_0] : memref<64x128xf32, #tpu.memory_space<vmem>>, vector<64x128xf32>
    %1 = arith.truncf %0 : vector<64x128xf32> to vector<64x128xbf16>
    %c0_1 = arith.constant 0 : index
    %c0_2 = arith.constant 0 : index
    %2 = vector.load %arg2[%c0_1, %c0_2] : memref<128x512xbf16, #tpu.memory_space<vmem>>, vector<128x512xbf16>
    %cst = arith.constant dense<0.000000e+00> : vector<64x512xf32>
    %3 = tpu.matmul %1, %2, %cst {dimension_numbers = #tpu.dot_dimension_numbers<[1], [0], [0], [1], [0, 0, 1, 1], [], []>} : vector<64x128xbf16>, vector<128x512xbf16>, vector<64x512xf32> -> vector<64x512xf32>
    %c0_3 = arith.constant 0 : index
    %c0_4 = arith.constant 0 : index
    %4 = vector.load %arg3[%c0_3, %c0_4] : memref<1x512xf32, #tpu.memory_space<vmem>>, vector<1x512xf32>
    %5 = vector.broadcast %4 : vector<1x512xf32> to vector<64x512xf32>
    %6 = arith.addf %3, %5 : vector<64x512xf32>
    %7 = math.tanh %6 : vector<64x512xf32>
    %c0_5 = arith.constant 0 : index
    %c0_6 = arith.constant 0 : index
    %8 = vector.load %arg6[%c0_5, %c0_6] : memref<128x4xbf16, #tpu.memory_space<vmem>>, vector<128x4xbf16>
    %cst_7 = arith.constant dense<0.000000e+00> : vector<64x4xf32>
    %9 = tpu.matmul %1, %8, %cst_7 {dimension_numbers = #tpu.dot_dimension_numbers<[1], [0], [0], [1], [0, 0, 1, 1], [], []>} : vector<64x128xbf16>, vector<128x4xbf16>, vector<64x4xf32> -> vector<64x4xf32>
    %cst_8 = arith.constant dense<0xFF800000> : vector<64xf32>
    %10 = vector.multi_reduction <maximumf>, %9, %cst_8 [1] : vector<64x4xf32> to vector<64xf32>
    %cst_9 = arith.constant 0xFF800000 : f32
    %11 = vector.broadcast %cst_9 : f32 to vector<64xf32>
    %12 = arith.maximumf %11, %10 : vector<64xf32>
    %13 = vector.shape_cast %12 : vector<64xf32> to vector<64x1xf32>
    %14 = vector.broadcast %13 : vector<64x1xf32> to vector<64x4xf32>
    %15 = arith.subf %9, %14 : vector<64x4xf32>
    %16 = math.exp %15 : vector<64x4xf32>
    %cst_10 = arith.constant dense<0.000000e+00> : vector<64xf32>
    %17 = vector.multi_reduction <add>, %16, %cst_10 [1] : vector<64x4xf32> to vector<64xf32>
    %18 = vector.shape_cast %17 : vector<64xf32> to vector<64x1xf32>
    %19 = vector.broadcast %18 : vector<64x1xf32> to vector<64x4xf32>
    %20 = arith.divf %16, %19 : vector<64x4xf32>
    %21 = vector.extract_strided_slice %7 {offsets = [0, 0], sizes = [64, 128], strides = [1, 1]} : vector<64x512xf32> to vector<64x128xf32>
    %22 = vector.extract_strided_slice %7 {offsets = [0, 128], sizes = [64, 128], strides = [1, 1]} : vector<64x512xf32> to vector<64x128xf32>
    %23 = vector.extract_strided_slice %7 {offsets = [0, 256], sizes = [64, 128], strides = [1, 1]} : vector<64x512xf32> to vector<64x128xf32>
    %24 = vector.extract_strided_slice %7 {offsets = [0, 384], sizes = [64, 128], strides = [1, 1]} : vector<64x512xf32> to vector<64x128xf32>
    %25 = tpu.concatenate %21, %22, %23, %24 in 0 : vector<64x128xf32>, vector<64x128xf32>, vector<64x128xf32>, vector<64x128xf32> -> vector<256x128xf32>
    %26 = arith.truncf %25 : vector<256x128xf32> to vector<256x128xbf16>
    %c0_11 = arith.constant 0 : index
    %c0_12 = arith.constant 0 : index
    %27 = vector.load %arg4[%c0_11, %c0_12] : memref<128x128xbf16, #tpu.memory_space<vmem>>, vector<128x128xbf16>
    %cst_13 = arith.constant dense<0.000000e+00> : vector<256x128xf32>
    %28 = tpu.matmul %26, %27, %cst_13 {dimension_numbers = #tpu.dot_dimension_numbers<[1], [0], [0], [1], [0, 0, 1, 1], [], []>} : vector<256x128xbf16>, vector<128x128xbf16>, vector<256x128xf32> -> vector<256x128xf32>
    %c0_14 = arith.constant 0 : index
    %c0_15 = arith.constant 0 : index
    %29 = vector.load %arg5[%c0_14, %c0_15] : memref<1x128xf32, #tpu.memory_space<vmem>>, vector<1x128xf32>
    %30 = vector.broadcast %29 : vector<1x128xf32> to vector<256x128xf32>
    %31 = arith.addf %28, %30 : vector<256x128xf32>
    %cst_16 = arith.constant dense<0xFF800000> : vector<256xf32>
    %32 = vector.multi_reduction <maximumf>, %31, %cst_16 [1] : vector<256x128xf32> to vector<256xf32>
    %cst_17 = arith.constant 0xFF800000 : f32
    %33 = vector.broadcast %cst_17 : f32 to vector<256xf32>
    %34 = arith.maximumf %33, %32 : vector<256xf32>
    %35 = vector.shape_cast %34 : vector<256xf32> to vector<256x1xf32>
    %36 = vector.broadcast %35 : vector<256x1xf32> to vector<256x128xf32>
    %37 = arith.subf %31, %36 : vector<256x128xf32>
    %38 = math.exp %37 : vector<256x128xf32>
    %cst_18 = arith.constant dense<0.000000e+00> : vector<256xf32>
    %39 = vector.multi_reduction <add>, %38, %cst_18 [1] : vector<256x128xf32> to vector<256xf32>
    %40 = vector.shape_cast %39 : vector<256xf32> to vector<256x1xf32>
    %41 = vector.broadcast %40 : vector<256x1xf32> to vector<256x128xf32>
    %42 = arith.divf %38, %41 : vector<256x128xf32>
    %cst_19 = arith.constant 0.000000e+00 : f32
    %43 = vector.broadcast %cst_19 : f32 to vector<64x128xf32>
    %44 = vector.extract_strided_slice %42 {offsets = [0, 0], sizes = [64, 128], strides = [1, 1]} : vector<256x128xf32> to vector<64x128xf32>
    %45 = vector.extract_strided_slice %20 {offsets = [0, 0], sizes = [64, 1], strides = [1, 1]} : vector<64x4xf32> to vector<64x1xf32>
    %46 = vector.broadcast %45 : vector<64x1xf32> to vector<64x128xf32>
    %47 = arith.mulf %44, %46 : vector<64x128xf32>
    %48 = arith.addf %43, %47 : vector<64x128xf32>
    %49 = vector.extract_strided_slice %42 {offsets = [64, 0], sizes = [64, 128], strides = [1, 1]} : vector<256x128xf32> to vector<64x128xf32>
    %50 = vector.extract_strided_slice %20 {offsets = [0, 1], sizes = [64, 1], strides = [1, 1]} : vector<64x4xf32> to vector<64x1xf32>
    %51 = vector.broadcast %50 : vector<64x1xf32> to vector<64x128xf32>
    %52 = arith.mulf %49, %51 : vector<64x128xf32>
    %53 = arith.addf %48, %52 : vector<64x128xf32>
    %54 = vector.extract_strided_slice %42 {offsets = [128, 0], sizes = [64, 128], strides = [1, 1]} : vector<256x128xf32> to vector<64x128xf32>
    %55 = vector.extract_strided_slice %20 {offsets = [0, 2], sizes = [64, 1], strides = [1, 1]} : vector<64x4xf32> to vector<64x1xf32>
    %56 = vector.broadcast %55 : vector<64x1xf32> to vector<64x128xf32>
    %57 = arith.mulf %54, %56 : vector<64x128xf32>
    %58 = arith.addf %53, %57 : vector<64x128xf32>
    %59 = vector.extract_strided_slice %42 {offsets = [192, 0], sizes = [64, 128], strides = [1, 1]} : vector<256x128xf32> to vector<64x128xf32>
    %60 = vector.extract_strided_slice %20 {offsets = [0, 3], sizes = [64, 1], strides = [1, 1]} : vector<64x4xf32> to vector<64x1xf32>
    %61 = vector.broadcast %60 : vector<64x1xf32> to vector<64x128xf32>
    %62 = arith.mulf %59, %61 : vector<64x128xf32>
    %63 = arith.addf %58, %62 : vector<64x128xf32>
    %cst_20 = arith.constant 9.99999993E-9 : f32
    %64 = vector.broadcast %cst_20 : f32 to vector<64x128xf32>
    %65 = arith.addf %63, %64 : vector<64x128xf32>
    %66 = math.log %65 : vector<64x128xf32>
    %c0_21 = arith.constant 0 : index
    %c0_22 = arith.constant 0 : index
    %67 = vector.load %arg7[%c0_21, %c0_22] : memref<64x128xf32, #tpu.memory_space<vmem>>, vector<64x128xf32>
    tpu.vector_store %arg7[%c0_21, %c0_22], %66 {strides = array<i32>} : memref<64x128xf32, #tpu.memory_space<vmem>>, vector<64x128xf32>,
    return
  }
  func.func @transform_0(%arg0: i32) -> (i32, i32) {
    %c0_i32 = arith.constant 0 : i32
    %c0_i32_0 = arith.constant 0 : i32
    return %arg0, %c0_i32 : i32, i32
  }
  func.func @transform_1(%arg0: i32) -> (i32, i32) {
    %c0_i32 = arith.constant 0 : i32
    %c0_i32_0 = arith.constant 0 : i32
    %c0_i32_1 = arith.constant 0 : i32
    return %c0_i32, %c0_i32_0 : i32, i32
  }
  func.func @transform_2(%arg0: i32) -> (i32, i32) {
    %c0_i32 = arith.constant 0 : i32
    %c0_i32_0 = arith.constant 0 : i32
    %c0_i32_1 = arith.constant 0 : i32
    return %c0_i32, %c0_i32_0 : i32, i32
  }
  func.func @transform_3(%arg0: i32) -> (i32, i32) {
    %c0_i32 = arith.constant 0 : i32
    %c0_i32_0 = arith.constant 0 : i32
    %c0_i32_1 = arith.constant 0 : i32
    return %c0_i32, %c0_i32_0 : i32, i32
  }
  func.func @transform_4(%arg0: i32) -> (i32, i32) {
    %c0_i32 = arith.constant 0 : i32
    %c0_i32_0 = arith.constant 0 : i32
    %c0_i32_1 = arith.constant 0 : i32
    return %c0_i32, %c0_i32_0 : i32, i32
  }
  func.func @transform_5(%arg0: i32) -> (i32, i32) {
    %c0_i32 = arith.constant 0 : i32
    %c0_i32_0 = arith.constant 0 : i32
    %c0_i32_1 = arith.constant 0 : i32
    return %c0_i32, %c0_i32_0 : i32, i32
  }
  func.func @transform_6(%arg0: i32) -> (i32, i32) {
    %c0_i32 = arith.constant 0 : i32
    %c0_i32_0 = arith.constant 0 : i32
    return %arg0, %c0_i32 : i32, i32
  }
}

</mosaic_0001>

<bundles_post_ra>
// kernel: rnn_model_forward.6
= control target key start
LH: loop header
LB: loop body
LE: loop exit
PB: predicated region body
PF: predicated region fallthrough
CT: control target
= control target key end

     0   :  { %12 = vsyncpa [#allocation3], 0  ;;  %s658_s24 = smov [#allocation2]   ;;  %s659_s26 = smov 256   ;;  %s744_s0 = inlined_call_operand.vmem [shape: f32[8,8,512], index: 0, kind: input, shape index: {}]   ;;  %s745_s1 = inlined_call_operand.hbm [shape: bf16[128,512], index: 1, kind: input, shape index: {}]   ;;  %s746_s2 = inlined_call_operand.vmem [shape: f32[8,128], index: 2, kind: input, shape index: {}]   ;;  %s747_s3 = inlined_call_operand.vmem [shape: f32[8,128], index: 3, kind: input, shape index: {}]   ;;  %s748_s4 = inlined_call_operand.vmem [shape: f32[8,8,128], index: 4, kind: output, shape index: {0}]   ;;  %s749_s5 = inlined_call_operand.vmem [shape: f32[8,128], index: 5, kind: output, shape index: {1}]   ;;  %s750_s6 = inlined_call_operand.vmem [shape: f32[8,128], index: 6, kind: output, shape index: {2}]  }
   0x1   :  { %s19_s23 = sshll.u32 %s745_s1, 4  ;;  %s21_s25 = sshll.u32 %s658_s24, 4  ;;  %s20_s23 = int_to_ptr.hbm [resolvable:$true] %s19_s23  ;;  %s22_s25 = int_to_ptr.vmem [resolvable:$true] %s21_s25 }
   0x2   :  { %s660_s27 = smov 16  }
   0x3   :  { %27 = dma.hbm_to_vmem [thread:$0]  %s20_s23, 4096, %s22_s25, [#allocation3], %s659_s26, %s659_s26, %s660_s27  }
   0x4   :  { %644 = dma.done.wait [#allocation3], 4096  }
   0x5   :  { %645 = vsyncadd [#allocation3], 4294963200  ;;  %v36_v0 = vld [vmem:[%s746_s2] sm:$0xff]   ;;  %s709_s1 = smov 0  }
   0x6   :  { %v37_v1 = vld [vmem:[%s747_s3] sm:$0xff]  }
   0x7 LB: > { %v514_v2 = vld [vmem:[#allocation2 + $0xe0] sm:$0xf]  ;;  %v563_v3 = vld [vmem:[#allocation2 + $0xec] sm:$0xf0]  ;;  %v561_v4 = vld [vmem:[#allocation2 + $0xe4] sm:$0xf]  ;;  %s656_s1 = sphi %s709_s1, %s43_s1   ;;  %v652_v0 = vphi %v36_v0, %v752_v0   ;;  %v648_v1 = vphi %v37_v1, %v751_v1  }
   0x8   : > { %v515_v5 = vor.u32 %v563_v3, %v514_v2  ;;  %v516_v6 = vld [vmem:[#allocation2 + $0xf0] sm:$0xf0]  ;;  %v562_v7 = vld [vmem:[#allocation2 + $0xec] sm:$0xf]  ;;  %v524_v8 = vld [vmem:[#allocation2 + $0xf8] sm:$0xf0] }
   0x9   : > { %v519_v9 = vor.u32 %v561_v4, %v516_v6  ;;  %v527_v10 = vor.u32 %v562_v7, %v524_v8  ;;  %v498_v11 = vld [vmem:[#allocation2 + $0xc0] sm:$0xf]  ;;  %v559_v12 = vld [vmem:[#allocation2 + $0xcc] sm:$0xf0]  ;;  %v557_v13 = vld [vmem:[#allocation2 + $0xc4] sm:$0xf] }
   0xa   : > { %246 = vmatpush.bf16.msra.mxu0 %v515_v5  ;;  %v499_v14 = vor.u32 %v559_v12, %v498_v11  ;;  %v500_v15 = vld [vmem:[#allocation2 + $0xd0] sm:$0xf0]  ;;  %v558_v16 = vld [vmem:[#allocation2 + $0xcc] sm:$0xf]  ;;  %v508_v17 = vld [vmem:[#allocation2 + $0xd8] sm:$0xf0] }
   0xb   : > { %259 = vmatpush.bf16.msra.mxu1 %v519_v9  ;;  %285 = vmatpush.bf16.msra.mxu3 %v527_v10  ;;  %v503_v18 = vor.u32 %v557_v13, %v500_v15  ;;  %v511_v19 = vor.u32 %v558_v16, %v508_v17  ;;  %v522_v20 = vld [vmem:[#allocation2 + $0xe8] sm:$0xf]  ;;  %v564_v21 = vld [vmem:[#allocation2 + $0xf4] sm:$0xf0]  ;;  %v482_v22 = vld [vmem:[#allocation2 + $0xa0] sm:$0xf] }
   0xc   : > { %v523_v23 = vor.u32 %v564_v21, %v522_v20  ;;  %v555_v24 = vld [vmem:[#allocation2 + $0xac] sm:$0xf0]  ;;  %v553_v25 = vld [vmem:[#allocation2 + $0xa4] sm:$0xf]  ;;  %v484_v26 = vld [vmem:[#allocation2 + $0xb0] sm:$0xf0] }
   0xd   : > { %v554_v27 = vld [vmem:[#allocation2 + $0xac] sm:$0xf]  ;;  %v492_v28 = vld [vmem:[#allocation2 + $0xb8] sm:$0xf0]  ;;  %v506_v29 = vld [vmem:[#allocation2 + $0xc8] sm:$0xf]  ;;  %v483_v30 = vor.u32 %v555_v24, %v482_v22  ;;  %v487_v34 = vor.u32 %v553_v25, %v484_v26 }
   0xe   : > { %247 = vmatpush.bf16.msra.mxu0 %v499_v14  ;;  %272 = vmatpush.bf16.msra.mxu2 %v523_v23  ;;  %v560_v31 = vld [vmem:[#allocation2 + $0xd4] sm:$0xf0]  ;;  %v466_v32 = vld [vmem:[#allocation2 + $0x80] sm:$0xf]  ;;  %v551_v33 = vld [vmem:[#allocation2 + $0x8c] sm:$0xf0]  ;;  %v495_v35 = vor.u32 %v554_v27, %v492_v28 }
   0xf   : > { %260 = vmatpush.bf16.msra.mxu1 %v503_v18  ;;  %286 = vmatpush.bf16.msra.mxu3 %v511_v19  ;;  %v507_v36 = vor.u32 %v560_v31, %v506_v29  ;;  %v549_v37 = vld [vmem:[#allocation2 + $0x84] sm:$0xf]  ;;  %v468_v38 = vld [vmem:[#allocation2 + $0x90] sm:$0xf0]  ;;  %v550_v39 = vld [vmem:[#allocation2 + $0x8c] sm:$0xf]  ;;  %v467_v43 = vor.u32 %v551_v33, %v466_v32 }
  0x10   : > { %v476_v40 = vld [vmem:[#allocation2 + $0x98] sm:$0xf0]  ;;  %v490_v41 = vld [vmem:[#allocation2 + $0xa8] sm:$0xf]  ;;  %v556_v42 = vld [vmem:[#allocation2 + $0xb4] sm:$0xf0]  ;;  %v471_v47 = vor.u32 %v549_v37, %v468_v38 }
  0x11   : > { %v491_v44 = vor.u32 %v556_v42, %v490_v41  ;;  %v450_v45 = vld [vmem:[#allocation2 + $0x60] sm:$0xf]  ;;  %v547_v46 = vld [vmem:[#allocation2 + $0x6c] sm:$0xf0]  ;;  %v479_v48 = vor.u32 %v550_v39, %v476_v40  ;;  %v545_v49 = vld [vmem:[#allocation2 + $0x64] sm:$0xf] }
  0x12   : > { %248 = vmatpush.bf16.msra.mxu0 %v483_v30  ;;  %273 = vmatpush.bf16.msra.mxu2 %v507_v36  ;;  %v474_v50 = vld [vmem:[#allocation2 + $0x88] sm:$0xf]  ;;  %v552_v51 = vld [vmem:[#allocation2 + $0x94] sm:$0xf0]  ;;  %v452_v52 = vld [vmem:[#allocation2 + $0x70] sm:$0xf0]  ;;  %v451_v55 = vor.u32 %v547_v46, %v450_v45 }
  0x13   : > { %261 = vmatpush.bf16.msra.mxu1 %v487_v34  ;;  %287 = vmatpush.bf16.msra.mxu3 %v495_v35  ;;  %v546_v53 = vld [vmem:[#allocation2 + $0x6c] sm:$0xf]  ;;  %v460_v54 = vld [vmem:[#allocation2 + $0x78] sm:$0xf0]  ;;  %v475_v56 = vor.u32 %v552_v51, %v474_v50  ;;  %v434_v57 = vld [vmem:[#allocation2 + $0x40] sm:$0xf]  ;;  %v455_v59 = vor.u32 %v545_v49, %v452_v52  ;;  %v53_v35 = vpack.c.bf16 %v652_v0, %v652_v0 }
  0x14   : > { %v543_v58 = vld [vmem:[#allocation2 + $0x4c] sm:$0xf0]  ;;  %v463_v60 = vor.u32 %v546_v53, %v460_v54  ;;  %v541_v61 = vld [vmem:[#allocation2 + $0x44] sm:$0xf]  ;;  %v458_v62 = vld [vmem:[#allocation2 + $0x68] sm:$0xf] }
  0x15   : > { %v548_v63 = vld [vmem:[#allocation2 + $0x74] sm:$0xf0]  ;;  %v436_v2 = vld [vmem:[#allocation2 + $0x50] sm:$0xf0]  ;;  %v542_v3 = vld [vmem:[#allocation2 + $0x4c] sm:$0xf]  ;;  %v435_v5 = vor.u32 %v543_v58, %v434_v57 }
  0x16   : > { %249 = vmatpush.bf16.msra.mxu0 %v467_v43  ;;  %274 = vmatpush.bf16.msra.mxu2 %v491_v44  ;;  %v444_v4 = vld [vmem:[#allocation2 + $0x58] sm:$0xf0]  ;;  %v459_v6 = vor.u32 %v548_v63, %v458_v62  ;;  %v418_v7 = vld [vmem:[#allocation2 + $0x20] sm:$0xf]  ;;  %v539_v8 = vld [vmem:[#allocation2 + $0x2c] sm:$0xf0]  ;;  %v439_v9 = vor.u32 %v541_v61, %v436_v2 }
  0x17   : > { %262 = vmatpush.bf16.msra.mxu1 %v471_v47  ;;  %288 = vmatpush.bf16.msra.mxu3 %v479_v48  ;;  %v447_v10 = vor.u32 %v542_v3, %v444_v4  ;;  %v537_v11 = vld [vmem:[#allocation2 + $0x24] sm:$0xf]  ;;  %v442_v12 = vld [vmem:[#allocation2 + $0x48] sm:$0xf]  ;;  %v544_v13 = vld [vmem:[#allocation2 + $0x54] sm:$0xf0]  ;;  %v419_v17 = vor.u32 %v539_v8, %v418_v7 }
  0x18   : > { %v420_v14 = vld [vmem:[#allocation2 + $0x30] sm:$0xf0]  ;;  %v538_v15 = vld [vmem:[#allocation2 + $0x2c] sm:$0xf]  ;;  %v428_v16 = vld [vmem:[#allocation2 + $0x38] sm:$0xf0]  ;;  %v443_v18 = vor.u32 %v544_v13, %v442_v12 }
  0x19   : > { %v402_v19 = vld [vmem:[#allocation2] sm:$0xf]  ;;  %v535_v20 = vld [vmem:[#allocation2 + $0xc] sm:$0xf0]  ;;  %v423_v21 = vor.u32 %v537_v11, %v420_v14  ;;  %v431_v22 = vor.u32 %v538_v15, %v428_v16  ;;  %v533_v23 = vld [vmem:[#allocation2 + $0x4] sm:$0xf] }
  0x1a   : > { %250 = vmatpush.bf16.msra.mxu0 %v451_v55  ;;  %275 = vmatpush.bf16.msra.mxu2 %v475_v56  ;;  %v426_v24 = vld [vmem:[#allocation2 + $0x28] sm:$0xf]  ;;  %v540_v25 = vld [vmem:[#allocation2 + $0x34] sm:$0xf0]  ;;  %v404_v26 = vld [vmem:[#allocation2 + $0x10] sm:$0xf0]  ;;  %v403_v29 = vor.u32 %v535_v20, %v402_v19 }
  0x1b   : > { %263 = vmatpush.bf16.msra.mxu1 %v455_v59  ;;  %289 = vmatpush.bf16.msra.mxu3 %v463_v60  ;;  %v534_v27 = vld [vmem:[#allocation2 + $0xc] sm:$0xf]  ;;  %v412_v28 = vld [vmem:[#allocation2 + $0x18] sm:$0xf0]  ;;  %v427_v30 = vor.u32 %v540_v25, %v426_v24  ;;  %v407_v31 = vor.u32 %v533_v23, %v404_v26  ;;  %v410_v33 = vld [vmem:[#allocation2 + $0x8] sm:$0xf] }
  0x1c   : > { %v415_v32 = vor.u32 %v534_v27, %v412_v28  ;;  %v536_v34 = vld [vmem:[#allocation2 + $0x14] sm:$0xf0]  ;;  %s532_s2 = sshll.u32 %s656_s1, 5  ;;  %s531_s10 = sshll.u32 %s656_s1, 3 }
  0x1d   : > { %v411_v36 = vor.u32 %v536_v34, %v410_v33  ;;  %s48_s9 = scalar_lea.vmem %s744_s0, %s532_s2  ;;  %s366_s13 = scalar_lea.vmem %s748_s4, %s531_s10 }
  0x1e   : > { %251 = vmatpush.bf16.msra.mxu0 %v435_v5  ;;  %276 = vmatpush.bf16.msra.mxu2 %v459_v6  ;;  %v49_v37 = vld [vmem:[%s48_s9] sm:$0xff]  ;;  %v50_v38 = vld [vmem:[%s48_s9 + $0x8] sm:$0xff]  ;;  %v52_v44 = vld [vmem:[%s48_s9 + $0x18] sm:$0xff]  ;;  %s43_s1 = sadd.s32 1, %s656_s1  }
  0x1f   : > { %264 = vmatpush.bf16.msra.mxu1 %v439_v9  ;;  %290 = vmatpush.bf16.msra.mxu3 %v447_v10  ;;  %v51_v55 = vld [vmem:[%s48_s9 + $0x10] sm:$0xff]  ;;  %p40_p0 = scmp.ge.s32.totalorder %s43_s1, 8  }
  0x22   : > { %252 = vmatpush.bf16.msra.mxu0 %v419_v17  ;;  %277 = vmatpush.bf16.msra.mxu2 %v443_v18 }
  0x23   : > { %265 = vmatpush.bf16.msra.mxu1 %v423_v21  ;;  %291 = vmatpush.bf16.msra.mxu3 %v431_v22 }
  0x26   : > { %253 = vmatpush.bf16.msra.mxu0 %v403_v29  ;;  %278 = vmatpush.bf16.msra.mxu2 %v427_v30 }
  0x27   : > { %266 = vmatpush.bf16.msra.mxu1 %v407_v31  ;;  %292 = vmatpush.bf16.msra.mxu3 %v415_v32 }
  0x29   : > { %254 = vmatmul.bf16.vlgmr.msra.gmra.mxu0 %v53_v35 }
  0x2a   : > { %267 = vmatmul.bf16.vlgmr.msra.gmra.mxu1 %v53_v35  ;;  %293 = vmatmul.bf16.vlgmr.msra.gmra.mxu3 %v53_v35 }
  0x2b   : > { %279 = vmatpush.bf16.msra.mxu2 %v411_v36 }
  0x2e   : > { %280 = vmatmul.bf16.vlgmr.msra.gmra.mxu2 %v53_v35 }
  0xa6   : > { %v255_v39 = vpop.f32.mrf.mxu0 }
  0xa7   : > { %v298_v40 = vadd.f32 %v255_v39, %v49_v37  ;;  %v268_v0 = vpop.f32.mrf.mxu1 }
  0xa8   : > { %v299_v41 = vadd.f32 %v268_v0, %v50_v38 }
  0xa9   : > { %v528_v42 = vmul.f32 -1.442695, %v298_v40 }
  0xaa   : > { %v529_v43 = vmul.f32 -1.442695, %v299_v41 }
  0xab   : > { %592 = vpow2.f32 %v528_v42 }
  0xac   : > { %594 = vpow2.f32 %v529_v43 }
  0xad   : > { %v294_v45 = vpop.f32.mrf.mxu3 }
  0xae   : > { %v301_v46 = vadd.f32 %v294_v45, %v52_v44  ;;  %v257_v47 = vpop.f32.mrf.mxu0 }
  0xaf   : > { %v270_v48 = vpop.f32.mrf.mxu1 }
  0xb0   : > { %v530_v49 = vmul.f32 -1.442695, %v301_v46 }
  0xb1   : > { %v593_v50 = vpop.eup %592  ;;  %v281_v51 = vpop.f32.mrf.mxu2 }
  0xb2   : > { %v595_v52 = vpop.eup %594  ;;  %v305_v53 = vadd.f32 1.0, %v593_v50  ;;  %596 = vpow2.f32 %v530_v49  ;;  %v300_v58 = vadd.f32 %v281_v51, %v51_v55 }
  0xb3   : > { %v324_v54 = vadd.f32 1.0, %v595_v52 }
  0xb4   : > { %598 = vrcp.f32 %v305_v53  ;;  %v317_v5 = vand.u32 2147483648, %v305_v53  ;;  %v315_v8 = vand.u32 2147483647, %v305_v53  ;;  %vm311_vm2 = vweird.f32 %v305_v53 }
  0xb5   : > { %600 = vrcp.f32 %v324_v54  ;;  %v296_v56 = vpop.f32.mrf.mxu3  ;;  %v336_v6 = vand.u32 2147483648, %v324_v54  ;;  %v334_v10 = vand.u32 2147483647, %v324_v54  ;;  %vm330_vm3 = vweird.f32 %v324_v54 }
  0xb6   : > { %v318_v15 = vor.u32 1.1754944e-38, %v317_v5  ;;  %vm316_vm6 = vcmp.eq.f32.partialorder %v315_v8, 8.507059e+37 }
  0xb7   : > { %v337_v17 = vor.u32 1.1754944e-38, %v336_v6  ;;  %vm335_vm7 = vcmp.eq.f32.partialorder %v334_v10, 8.507059e+37 }
  0xb8   : > { %v597_v57 = vpop.eup %596 }
  0xb9   : > { %v344_v59 = vadd.f32 1.0, %v597_v57  ;;  %v283_v60 = vpop.f32.mrf.mxu2 }
  0xba   : > { %v599_v61 = vpop.eup %598 }
  0xbb   : > { %v601_v62 = vpop.eup %600  ;;  %v307_v63 = vmul.f32 %v599_v61, %v305_v53  ;;  %602 = vrcp.f32 %v344_v59  ;;  %vm312_vm0 = vweird.f32 %v599_v61  ;;  %v356_v28 = vand.u32 2147483648, %v344_v59 }
  0xbc   : > { %v326_v2 = vmul.f32 %v601_v62, %v324_v54  ;;  %604 = vtanh.f32 %v300_v58  ;;  %vm331_vm1 = vweird.f32 %v601_v62  ;;  %vm313_vm4 = vmor %vm311_vm2, %vm312_vm0  ;;  %vm350_vm9 = vweird.f32 %v344_v59 }
  0xbd   : > { %v308_v3 = vsub.f32 1.0, %v307_v63  ;;  %vm332_vm5 = vmor %vm330_vm3, %vm331_vm1  ;;  %v354_v29 = vand.u32 2147483647, %v344_v59  ;;  %v357_v31 = vor.u32 1.1754944e-38, %v356_v28 }
  0xbe   : > { %v327_v4 = vsub.f32 1.0, %v326_v2 }
  0xbf   : > { %v309_v7 = vmul.f32 %v599_v61, %v308_v3  ;;  %vm355_vm11 = vcmp.eq.f32.partialorder %v354_v29, 8.507059e+37 }
  0xc0   : > { %v328_v9 = vmul.f32 %v601_v62, %v327_v4 }
  0xc1   : > { %v603_v11 = vpop.eup %602  ;;  %v310_v12 = vadd.f32 %v599_v61, %v309_v7 }
  0xc2   : > { %v605_v13 = vpop.eup %604  ;;  %v346_v14 = vmul.f32 %v603_v11, %v344_v59  ;;  %v329_v16 = vadd.f32 %v601_v62, %v328_v9  ;;  %vm351_vm8 = vweird.f32 %v603_v11 }
  0xc3   : > { %v314_v18 = vsel %vm313_vm4, %v599_v61, %v310_v12  ;;  %vm352_vm10 = vmor %vm350_vm9, %vm351_vm8 }
  0xc4   : > { %v347_v19 = vsub.f32 1.0, %v346_v14  ;;  %v319_v20 = vsel %vm316_vm6, %v318_v15, %v314_v18  ;;  %v333_v21 = vsel %vm332_vm5, %v601_v62, %v329_v16 }
  0xc5   : > { %v338_v22 = vsel %vm335_vm7, %v337_v17, %v333_v21  ;;  %v361_v23 = vmul.f32 %v605_v13, %v319_v20 }
  0xc6   : > { %v348_v24 = vmul.f32 %v603_v11, %v347_v19  ;;  %v360_v25 = vmul.f32 %v648_v1, %v338_v22 }
  0xc8   : > { %v362_v26 = vadd.f32 %v361_v23, %v360_v25   ;;  %v349_v27 = vadd.f32 %v603_v11, %v348_v24 }
  0xca   : > { %606 = vtanh.f32 %v362_v26  ;;  %v353_v30 = vsel %vm352_vm10, %v603_v11, %v349_v27  ;;  %v751_v1 = vmov %v362_v26  ;;  %369 = vst [vmem:[%s750_s6] sm:$0xff] (%p40_p0), %v362_v26 }
  0xcb   : > { %v358_v33 = vsel %vm355_vm11, %v357_v31, %v353_v30 }
  0xcf   :  { %42 = sbr.rel (!%p40_p0) target bundleno = 7 (0x7), region = 65 }
  0xd0   : > { %v607_v32 = vpop.eup %606 }
  0xd1   : > { %v364_v34 = vmul.f32 %v607_v32, %v358_v33  }
  0xd3   : > { %367 = vst [vmem:[%s366_s13] sm:$0xff] %v364_v34  ;;  %v752_v0 = vmov %v364_v34 }
  0xd4   :  { %368 = vst [vmem:[%s749_s5] sm:$0xff] %v364_v34 }
  0xd5   :  { %382 = vsyncpa [#allocation3], 1 }

// kernel: rnn_model_forward.5
= control target key start
LH: loop header
LB: loop body
LE: loop exit
PB: predicated region body
PF: predicated region fallthrough
CT: control target
= control target key end

     0   :  { %s915_s1 = inlined_call_operand.vmem [shape: bf16[128,512], index: 1, kind: input, shape index: {}]   ;;  %s916_s0 = inlined_call_operand.vmem [shape: f32[64,128], index: 0, kind: input, shape index: {}]   ;;  %s917_s2 = inlined_call_operand.vmem [shape: f32[1,512], index: 2, kind: input, shape index: {}]   ;;  %s918_s3 = inlined_call_operand.vmem [shape: f32[64,512], index: 3, kind: output, shape index: {}]  }
   0x1   :  { %v494_v0 = vld [vmem:[%s915_s1 + $0xe0] sm:$0xf]  ;;  %v538_v1 = vld [vmem:[%s915_s1 + $0xec] sm:$0xf0]  ;;  %v536_v2 = vld [vmem:[%s915_s1 + $0xe4] sm:$0xf] }
   0x2   :  { %v495_v3 = vor.u32 %v538_v1, %v494_v0  ;;  %v496_v4 = vld [vmem:[%s915_s1 + $0xf0] sm:$0xf0]  ;;  %v502_v5 = vld [vmem:[%s915_s1 + $0xe8] sm:$0xf]  ;;  %v539_v6 = vld [vmem:[%s915_s1 + $0xf4] sm:$0xf0] }
   0x3   :  { %v499_v7 = vor.u32 %v536_v2, %v496_v4  ;;  %v503_v8 = vor.u32 %v539_v6, %v502_v5  ;;  %v537_v9 = vld [vmem:[%s915_s1 + $0xec] sm:$0xf]  ;;  %v504_v10 = vld [vmem:[%s915_s1 + $0xf8] sm:$0xf0]  ;;  %v478_v11 = vld [vmem:[%s915_s1 + $0xc0] sm:$0xf] }
   0x4   :  { %228 = vmatpush.bf16.msra.mxu0 %v495_v3  ;;  %v507_v12 = vor.u32 %v537_v9, %v504_v10  ;;  %v534_v13 = vld [vmem:[%s915_s1 + $0xcc] sm:$0xf0]  ;;  %v532_v14 = vld [vmem:[%s915_s1 + $0xc4] sm:$0xf]  ;;  %v480_v15 = vld [vmem:[%s915_s1 + $0xd0] sm:$0xf0] }
   0x5   :  { %257 = vmatpush.bf16.msra.mxu1 %v499_v7  ;;  %286 = vmatpush.bf16.msra.mxu2 %v503_v8  ;;  %v479_v16 = vor.u32 %v534_v13, %v478_v11  ;;  %v483_v17 = vor.u32 %v532_v14, %v480_v15  ;;  %v486_v18 = vld [vmem:[%s915_s1 + $0xc8] sm:$0xf]  ;;  %v535_v19 = vld [vmem:[%s915_s1 + $0xd4] sm:$0xf0]  ;;  %v533_v20 = vld [vmem:[%s915_s1 + $0xcc] sm:$0xf] }
   0x6   :  { %315 = vmatpush.bf16.msra.mxu3 %v507_v12  ;;  %v487_v21 = vor.u32 %v535_v19, %v486_v18  ;;  %v488_v22 = vld [vmem:[%s915_s1 + $0xd8] sm:$0xf0]  ;;  %v462_v23 = vld [vmem:[%s915_s1 + $0xa0] sm:$0xf]  ;;  %v530_v24 = vld [vmem:[%s915_s1 + $0xac] sm:$0xf0] }
   0x7   :  { %v491_v25 = vor.u32 %v533_v20, %v488_v22  ;;  %v528_v26 = vld [vmem:[%s915_s1 + $0xa4] sm:$0xf]  ;;  %v464_v27 = vld [vmem:[%s915_s1 + $0xb0] sm:$0xf0]  ;;  %v470_v28 = vld [vmem:[%s915_s1 + $0xa8] sm:$0xf]  ;;  %v463_v29 = vor.u32 %v530_v24, %v462_v23 }
   0x8   :  { %229 = vmatpush.bf16.msra.mxu0 %v479_v16  ;;  %v531_v30 = vld [vmem:[%s915_s1 + $0xb4] sm:$0xf0]  ;;  %v529_v31 = vld [vmem:[%s915_s1 + $0xac] sm:$0xf]  ;;  %v472_v32 = vld [vmem:[%s915_s1 + $0xb8] sm:$0xf0]  ;;  %v467_v33 = vor.u32 %v528_v26, %v464_v27 }
   0x9   :  { %258 = vmatpush.bf16.msra.mxu1 %v483_v17  ;;  %287 = vmatpush.bf16.msra.mxu2 %v487_v21  ;;  %v471_v34 = vor.u32 %v531_v30, %v470_v28  ;;  %v446_v35 = vld [vmem:[%s915_s1 + $0x80] sm:$0xf]  ;;  %v526_v36 = vld [vmem:[%s915_s1 + $0x8c] sm:$0xf0]  ;;  %v524_v37 = vld [vmem:[%s915_s1 + $0x84] sm:$0xf]  ;;  %v475_v38 = vor.u32 %v529_v31, %v472_v32 }
   0xa   :  { %316 = vmatpush.bf16.msra.mxu3 %v491_v25  ;;  %v448_v39 = vld [vmem:[%s915_s1 + $0x90] sm:$0xf0]  ;;  %v454_v40 = vld [vmem:[%s915_s1 + $0x88] sm:$0xf]  ;;  %v527_v41 = vld [vmem:[%s915_s1 + $0x94] sm:$0xf0]  ;;  %v447_v44 = vor.u32 %v526_v36, %v446_v35 }
   0xb   :  { %v525_v42 = vld [vmem:[%s915_s1 + $0x8c] sm:$0xf]  ;;  %v456_v43 = vld [vmem:[%s915_s1 + $0x98] sm:$0xf0]  ;;  %v451_v45 = vor.u32 %v524_v37, %v448_v39  ;;  %v455_v46 = vor.u32 %v527_v41, %v454_v40  ;;  %v430_v47 = vld [vmem:[%s915_s1 + $0x60] sm:$0xf] }
   0xc   :  { %230 = vmatpush.bf16.msra.mxu0 %v463_v29  ;;  %v522_v48 = vld [vmem:[%s915_s1 + $0x6c] sm:$0xf0]  ;;  %v520_v49 = vld [vmem:[%s915_s1 + $0x64] sm:$0xf]  ;;  %v459_v50 = vor.u32 %v525_v42, %v456_v43  ;;  %v432_v51 = vld [vmem:[%s915_s1 + $0x70] sm:$0xf0] }
   0xd   :  { %259 = vmatpush.bf16.msra.mxu1 %v467_v33  ;;  %288 = vmatpush.bf16.msra.mxu2 %v471_v34  ;;  %v438_v52 = vld [vmem:[%s915_s1 + $0x68] sm:$0xf]  ;;  %v523_v53 = vld [vmem:[%s915_s1 + $0x74] sm:$0xf0]  ;;  %v521_v54 = vld [vmem:[%s915_s1 + $0x6c] sm:$0xf]  ;;  %v431_v56 = vor.u32 %v522_v48, %v430_v47  ;;  %v435_v57 = vor.u32 %v520_v49, %v432_v51 }
   0xe   :  { %317 = vmatpush.bf16.msra.mxu3 %v475_v38  ;;  %v440_v55 = vld [vmem:[%s915_s1 + $0x78] sm:$0xf0]  ;;  %v439_v58 = vor.u32 %v523_v53, %v438_v52  ;;  %v414_v59 = vld [vmem:[%s915_s1 + $0x40] sm:$0xf]  ;;  %v518_v60 = vld [vmem:[%s915_s1 + $0x4c] sm:$0xf0] }
   0xf   :  { %v516_v61 = vld [vmem:[%s915_s1 + $0x44] sm:$0xf]  ;;  %v443_v62 = vor.u32 %v521_v54, %v440_v55  ;;  %v416_v63 = vld [vmem:[%s915_s1 + $0x50] sm:$0xf0]  ;;  %v422_v0 = vld [vmem:[%s915_s1 + $0x48] sm:$0xf]  ;;  %v415_v4 = vor.u32 %v518_v60, %v414_v59 }
  0x10   :  { %231 = vmatpush.bf16.msra.mxu0 %v447_v44  ;;  %v519_v1 = vld [vmem:[%s915_s1 + $0x54] sm:$0xf0]  ;;  %v517_v2 = vld [vmem:[%s915_s1 + $0x4c] sm:$0xf]  ;;  %v424_v3 = vld [vmem:[%s915_s1 + $0x58] sm:$0xf0]  ;;  %v419_v5 = vor.u32 %v516_v61, %v416_v63 }
  0x11   :  { %260 = vmatpush.bf16.msra.mxu1 %v451_v45  ;;  %289 = vmatpush.bf16.msra.mxu2 %v455_v46  ;;  %v423_v6 = vor.u32 %v519_v1, %v422_v0  ;;  %v398_v7 = vld [vmem:[%s915_s1 + $0x20] sm:$0xf]  ;;  %v514_v8 = vld [vmem:[%s915_s1 + $0x2c] sm:$0xf0]  ;;  %v512_v9 = vld [vmem:[%s915_s1 + $0x24] sm:$0xf]  ;;  %v427_v10 = vor.u32 %v517_v2, %v424_v3 }
  0x12   :  { %318 = vmatpush.bf16.msra.mxu3 %v459_v50  ;;  %v400_v11 = vld [vmem:[%s915_s1 + $0x30] sm:$0xf0]  ;;  %v406_v12 = vld [vmem:[%s915_s1 + $0x28] sm:$0xf]  ;;  %v515_v13 = vld [vmem:[%s915_s1 + $0x34] sm:$0xf0]  ;;  %v399_v16 = vor.u32 %v514_v8, %v398_v7 }
  0x13   :  { %v513_v14 = vld [vmem:[%s915_s1 + $0x2c] sm:$0xf]  ;;  %v408_v15 = vld [vmem:[%s915_s1 + $0x38] sm:$0xf0]  ;;  %v403_v17 = vor.u32 %v512_v9, %v400_v11  ;;  %v407_v18 = vor.u32 %v515_v13, %v406_v12  ;;  %v382_v19 = vld [vmem:[%s915_s1] sm:$0xf] }
  0x14   :  { %232 = vmatpush.bf16.msra.mxu0 %v431_v56  ;;  %v510_v20 = vld [vmem:[%s915_s1 + $0xc] sm:$0xf0]  ;;  %v508_v21 = vld [vmem:[%s915_s1 + $0x4] sm:$0xf]  ;;  %v411_v22 = vor.u32 %v513_v14, %v408_v15  ;;  %v384_v23 = vld [vmem:[%s915_s1 + $0x10] sm:$0xf0] }
  0x15   :  { %261 = vmatpush.bf16.msra.mxu1 %v435_v57  ;;  %290 = vmatpush.bf16.msra.mxu2 %v439_v58  ;;  %v390_v24 = vld [vmem:[%s915_s1 + $0x8] sm:$0xf]  ;;  %v511_v25 = vld [vmem:[%s915_s1 + $0x14] sm:$0xf0]  ;;  %v509_v26 = vld [vmem:[%s915_s1 + $0xc] sm:$0xf]  ;;  %v383_v28 = vor.u32 %v510_v20, %v382_v19  ;;  %v387_v31 = vor.u32 %v508_v21, %v384_v23 }
  0x16   :  { %319 = vmatpush.bf16.msra.mxu3 %v443_v62  ;;  %v392_v27 = vld [vmem:[%s915_s1 + $0x18] sm:$0xf0]  ;;  %v14_v29 = vld [vmem:[%s916_s0] sm:$0xff]  ;;  %v15_v30 = vld [vmem:[%s916_s0 + $0x8] sm:$0xff]  ;;  %v391_v32 = vor.u32 %v511_v25, %v390_v24 }
  0x17   :  { %v395_v33 = vor.u32 %v509_v26, %v392_v27  ;;  %v22_v34 = vpack.c.bf16 %v15_v30, %v14_v29  ;;  %v16_v35 = vld [vmem:[%s916_s0 + $0x10] sm:$0xff]  ;;  %v17_v36 = vld [vmem:[%s916_s0 + $0x18] sm:$0xff]  ;;  %v18_v38 = vld [vmem:[%s916_s0 + $0x20] sm:$0xff] }
  0x18   :  { %233 = vmatpush.bf16.msra.mxu0 %v415_v4  ;;  %v23_v37 = vpack.c.bf16 %v17_v36, %v16_v35  ;;  %v19_v39 = vld [vmem:[%s916_s0 + $0x28] sm:$0xff]  ;;  %v20_v41 = vld [vmem:[%s916_s0 + $0x30] sm:$0xff]  ;;  %v21_v42 = vld [vmem:[%s916_s0 + $0x38] sm:$0xff] }
  0x19   :  { %262 = vmatpush.bf16.msra.mxu1 %v419_v5  ;;  %291 = vmatpush.bf16.msra.mxu2 %v423_v6  ;;  %v24_v40 = vpack.c.bf16 %v19_v39, %v18_v38  ;;  %v25_v43 = vpack.c.bf16 %v21_v42, %v20_v41  ;;  %v58_v44 = vld [vmem:[%s917_s2] sm:$0xf] }
  0x1a   :  { %320 = vmatpush.bf16.msra.mxu3 %v427_v10  ;;  %v779_v45 = vperm.slane %v58_v44, 0  ;;  %v781_v46 = vperm.slane %v58_v44, 1  ;;  %v791_v51 = vperm.slane %v58_v44, 2  ;;  %v793_v52 = vperm.slane %v58_v44, 3 }
  0x1c   :  { %234 = vmatpush.bf16.msra.mxu0 %v399_v16 }
  0x1d   :  { %263 = vmatpush.bf16.msra.mxu1 %v403_v17  ;;  %292 = vmatpush.bf16.msra.mxu2 %v407_v18 }
  0x1e   :  { %321 = vmatpush.bf16.msra.mxu3 %v411_v22 }
  0x20   :  { %235 = vmatpush.bf16.msra.mxu0 %v383_v28 }
  0x21   :  { %264 = vmatpush.bf16.msra.mxu1 %v387_v31  ;;  %293 = vmatpush.bf16.msra.mxu2 %v391_v32 }
  0x22   :  { %322 = vmatpush.bf16.msra.mxu3 %v395_v33 }
  0x23   :  { %236 = vmatmul.bf16.vlgmr.msra.gmra.mxu0 %v22_v34 }
  0x24   :  { %265 = vmatmul.bf16.vlgmr.msra.gmra.mxu1 %v22_v34  ;;  %294 = vmatmul.bf16.vlgmr.msra.gmra.mxu2 %v22_v34 }
  0x25   :  { %323 = vmatmul.bf16.vlgmr.msra.gmra.mxu3 %v22_v34 }
  0x33   :  { %241 = vmatmul.bf16.gmra.mxu0 %v23_v37 }
  0x34   :  { %270 = vmatmul.bf16.gmra.mxu1 %v23_v37  ;;  %299 = vmatmul.bf16.gmra.mxu2 %v23_v37 }
  0x35   :  { %328 = vmatmul.bf16.gmra.mxu3 %v23_v37 }
  0x43   :  { %246 = vmatmul.bf16.gmra.mxu0 %v24_v40 }
  0x44   :  { %275 = vmatmul.bf16.gmra.mxu1 %v24_v40  ;;  %304 = vmatmul.bf16.gmra.mxu2 %v24_v40 }
  0x45   :  { %333 = vmatmul.bf16.gmra.mxu3 %v24_v40 }
  0x53   :  { %251 = vmatmul.bf16.gmra.mxu0 %v25_v43 }
  0x54   :  { %280 = vmatmul.bf16.gmra.mxu1 %v25_v43  ;;  %309 = vmatmul.bf16.gmra.mxu2 %v25_v43 }
  0x55   :  { %338 = vmatmul.bf16.gmra.mxu3 %v25_v43 }
  0xa0   :  { %v237_v47 = vpop.f32.mrf.mxu0 }
  0xa1   :  { %v238_v48 = vadd.f32 %v237_v47, %v779_v45  ;;  %v266_v49 = vpop.f32.mrf.mxu1 }
  0xa2   :  { %v267_v50 = vadd.f32 %v266_v49, %v781_v46 }
  0xa3   :  { %344 = vst [vmem:[%s918_s3] sm:$0xff] %v238_v48 }
  0xa4   :  { %345 = vst [vmem:[%s918_s3 + $0x8] sm:$0xff] %v267_v50 }
  0xa7   :  { %v295_v53 = vpop.f32.mrf.mxu2 }
  0xa8   :  { %v296_v54 = vadd.f32 %v295_v53, %v791_v51  ;;  %v324_v55 = vpop.f32.mrf.mxu3  ;;  %v239_v56 = vpop.f32.mrf.mxu0 }
  0xa9   :  { %v325_v57 = vadd.f32 %v324_v55, %v793_v52  ;;  %v240_v58 = vadd.f32 %v239_v56, %v779_v45  ;;  %v268_v59 = vpop.f32.mrf.mxu1 }
  0xaa   :  { %346 = vst [vmem:[%s918_s3 + $0x10] sm:$0xff] %v296_v54  ;;  %v269_v60 = vadd.f32 %v268_v59, %v781_v46 }
  0xab   :  { %347 = vst [vmem:[%s918_s3 + $0x18] sm:$0xff] %v325_v57 }
  0xac   :  { %348 = vst [vmem:[%s918_s3 + $0x20] sm:$0xff] %v240_v58 }
  0xad   :  { %349 = vst [vmem:[%s918_s3 + $0x28] sm:$0xff] %v269_v60 }
  0xaf   :  { %v297_v61 = vpop.f32.mrf.mxu2 }
  0xb0   :  { %v298_v62 = vadd.f32 %v297_v61, %v791_v51  ;;  %v326_v63 = vpop.f32.mrf.mxu3  ;;  %v242_v0 = vpop.f32.mrf.mxu0 }
  0xb1   :  { %v327_v1 = vadd.f32 %v326_v63, %v793_v52  ;;  %v243_v2 = vadd.f32 %v242_v0, %v779_v45  ;;  %v271_v3 = vpop.f32.mrf.mxu1 }
  0xb2   :  { %350 = vst [vmem:[%s918_s3 + $0x30] sm:$0xff] %v298_v62  ;;  %v272_v4 = vadd.f32 %v271_v3, %v781_v46 }
  0xb3   :  { %351 = vst [vmem:[%s918_s3 + $0x38] sm:$0xff] %v327_v1 }
  0xb4   :  { %352 = vst [vmem:[%s918_s3 + $0x40] sm:$0xff] %v243_v2 }
  0xb5   :  { %353 = vst [vmem:[%s918_s3 + $0x48] sm:$0xff] %v272_v4 }
  0xb7   :  { %v300_v5 = vpop.f32.mrf.mxu2 }
  0xb8   :  { %v301_v6 = vadd.f32 %v300_v5, %v791_v51  ;;  %v329_v7 = vpop.f32.mrf.mxu3  ;;  %v244_v8 = vpop.f32.mrf.mxu0 }
  0xb9   :  { %v330_v9 = vadd.f32 %v329_v7, %v793_v52  ;;  %v245_v10 = vadd.f32 %v244_v8, %v779_v45  ;;  %v273_v11 = vpop.f32.mrf.mxu1 }
  0xba   :  { %354 = vst [vmem:[%s918_s3 + $0x50] sm:$0xff] %v301_v6  ;;  %v274_v12 = vadd.f32 %v273_v11, %v781_v46 }
  0xbb   :  { %355 = vst [vmem:[%s918_s3 + $0x58] sm:$0xff] %v330_v9 }
  0xbc   :  { %356 = vst [vmem:[%s918_s3 + $0x60] sm:$0xff] %v245_v10 }
  0xbd   :  { %357 = vst [vmem:[%s918_s3 + $0x68] sm:$0xff] %v274_v12 }
  0xbf   :  { %v302_v13 = vpop.f32.mrf.mxu2 }
  0xc0   :  { %v303_v14 = vadd.f32 %v302_v13, %v791_v51  ;;  %v331_v15 = vpop.f32.mrf.mxu3  ;;  %v247_v16 = vpop.f32.mrf.mxu0 }
  0xc1   :  { %v332_v17 = vadd.f32 %v331_v15, %v793_v52  ;;  %v248_v18 = vadd.f32 %v247_v16, %v779_v45  ;;  %v276_v19 = vpop.f32.mrf.mxu1 }
  0xc2   :  { %358 = vst [vmem:[%s918_s3 + $0x70] sm:$0xff] %v303_v14  ;;  %v277_v20 = vadd.f32 %v276_v19, %v781_v46 }
  0xc3   :  { %359 = vst [vmem:[%s918_s3 + $0x78] sm:$0xff] %v332_v17 }
  0xc4   :  { %360 = vst [vmem:[%s918_s3 + $0x80] sm:$0xff] %v248_v18 }
  0xc5   :  { %361 = vst [vmem:[%s918_s3 + $0x88] sm:$0xff] %v277_v20 }
  0xc7   :  { %v305_v21 = vpop.f32.mrf.mxu2 }
  0xc8   :  { %v306_v22 = vadd.f32 %v305_v21, %v791_v51  ;;  %v334_v23 = vpop.f32.mrf.mxu3  ;;  %v249_v24 = vpop.f32.mrf.mxu0 }
  0xc9   :  { %v335_v25 = vadd.f32 %v334_v23, %v793_v52  ;;  %v250_v26 = vadd.f32 %v249_v24, %v779_v45  ;;  %v278_v27 = vpop.f32.mrf.mxu1 }
  0xca   :  { %362 = vst [vmem:[%s918_s3 + $0x90] sm:$0xff] %v306_v22  ;;  %v279_v28 = vadd.f32 %v278_v27, %v781_v46 }
  0xcb   :  { %363 = vst [vmem:[%s918_s3 + $0x98] sm:$0xff] %v335_v25 }
  0xcc   :  { %364 = vst [vmem:[%s918_s3 + $0xa0] sm:$0xff] %v250_v26 }
  0xcd   :  { %365 = vst [vmem:[%s918_s3 + $0xa8] sm:$0xff] %v279_v28 }
  0xcf   :  { %v307_v29 = vpop.f32.mrf.mxu2 }
  0xd0   :  { %v308_v30 = vadd.f32 %v307_v29, %v791_v51  ;;  %v336_v31 = vpop.f32.mrf.mxu3  ;;  %v252_v32 = vpop.f32.mrf.mxu0 }
  0xd1   :  { %v337_v33 = vadd.f32 %v336_v31, %v793_v52  ;;  %v253_v34 = vadd.f32 %v252_v32, %v779_v45  ;;  %v281_v35 = vpop.f32.mrf.mxu1 }
  0xd2   :  { %366 = vst [vmem:[%s918_s3 + $0xb0] sm:$0xff] %v308_v30  ;;  %v282_v36 = vadd.f32 %v281_v35, %v781_v46 }
  0xd3   :  { %367 = vst [vmem:[%s918_s3 + $0xb8] sm:$0xff] %v337_v33 }
  0xd4   :  { %368 = vst [vmem:[%s918_s3 + $0xc0] sm:$0xff] %v253_v34 }
  0xd5   :  { %369 = vst [vmem:[%s918_s3 + $0xc8] sm:$0xff] %v282_v36 }
  0xd7   :  { %v310_v37 = vpop.f32.mrf.mxu2 }
  0xd8   :  { %v311_v38 = vadd.f32 %v310_v37, %v791_v51  ;;  %v339_v39 = vpop.f32.mrf.mxu3  ;;  %v254_v40 = vpop.f32.mrf.mxu0 }
  0xd9   :  { %v340_v41 = vadd.f32 %v339_v39, %v793_v52  ;;  %v255_v42 = vadd.f32 %v254_v40, %v779_v45  ;;  %v283_v43 = vpop.f32.mrf.mxu1 }
  0xda   :  { %370 = vst [vmem:[%s918_s3 + $0xd0] sm:$0xff] %v311_v38  ;;  %v284_v44 = vadd.f32 %v283_v43, %v781_v46 }
  0xdb   :  { %371 = vst [vmem:[%s918_s3 + $0xd8] sm:$0xff] %v340_v41 }
  0xdc   :  { %372 = vst [vmem:[%s918_s3 + $0xe0] sm:$0xff] %v255_v42 }
  0xdd   :  { %373 = vst [vmem:[%s918_s3 + $0xe8] sm:$0xff] %v284_v44 }
  0xdf   :  { %v312_v45 = vpop.f32.mrf.mxu2 }
  0xe0   :  { %v313_v47 = vadd.f32 %v312_v45, %v791_v51  ;;  %v341_v48 = vpop.f32.mrf.mxu3 }
  0xe1   :  { %v342_v49 = vadd.f32 %v341_v48, %v793_v52 }
  0xe2   :  { %374 = vst [vmem:[%s918_s3 + $0xf0] sm:$0xff] %v313_v47 }
  0xe3   :  { %375 = vst [vmem:[%s918_s3 + $0xf8] sm:$0xff] %v342_v49 }

// kernel: rnn_model_forward.7
= control target key start
LH: loop header
LB: loop body
LE: loop exit
PB: predicated region body
PF: predicated region fallthrough
CT: control target
= control target key end

     0   :  { %8 = vsyncpa [#allocation3], 0  ;;  %s586_s15 = smov [#allocation2]   ;;  %s587_s17 = smov 256   ;;  %s775_s0 = inlined_call_operand.vmem [shape: f32[64,128], index: 0, kind: input, shape index: {}]   ;;  %s776_s1 = inlined_call_operand.hbm [shape: bf16[128,512], index: 1, kind: input, shape index: {}]   ;;  %s777_s2 = inlined_call_operand.vmem [shape: f32[1,512], index: 2, kind: input, shape index: {}]   ;;  %s778_s3 = inlined_call_operand.vmem [shape: f32[64,512], index: 3, kind: output, shape index: {}]  }
   0x1   :  { %s15_s14 = sshll.u32 %s776_s1, 4  ;;  %s17_s16 = sshll.u32 %s586_s15, 4  ;;  %s16_s14 = int_to_ptr.hbm [resolvable:$true] %s15_s14  ;;  %s18_s16 = int_to_ptr.vmem [resolvable:$true] %s17_s16 }
   0x2   :  { %s588_s18 = smov 16  }
   0x3   :  { %23 = dma.hbm_to_vmem [thread:$0]  %s16_s14, 4096, %s18_s16, [#allocation3], %s587_s17, %s587_s17, %s588_s18  }
   0x4   :  { %584 = dma.done.wait [#allocation3], 4096  }
   0x5   :  { %585 = vsyncadd [#allocation3], 4294963200  ;;  %v511_v0 = vld [vmem:[#allocation2 + $0xe0] sm:$0xf]  ;;  %v555_v1 = vld [vmem:[#allocation2 + $0xec] sm:$0xf0] }
   0x6   :  { %v553_v2 = vld [vmem:[#allocation2 + $0xe4] sm:$0xf]  ;;  %v512_v3 = vor.u32 %v555_v1, %v511_v0  ;;  %v513_v4 = vld [vmem:[#allocation2 + $0xf0] sm:$0xf0]  ;;  %v519_v5 = vld [vmem:[#allocation2 + $0xe8] sm:$0xf] }
   0x7   :  { %v556_v6 = vld [vmem:[#allocation2 + $0xf4] sm:$0xf0]  ;;  %v516_v7 = vor.u32 %v553_v2, %v513_v4  ;;  %v554_v9 = vld [vmem:[#allocation2 + $0xec] sm:$0xf]  ;;  %v521_v10 = vld [vmem:[#allocation2 + $0xf8] sm:$0xf0] }
   0x8   :  { %v520_v8 = vor.u32 %v556_v6, %v519_v5  ;;  %v495_v11 = vld [vmem:[#allocation2 + $0xc0] sm:$0xf]  ;;  %244 = vmatpush.bf16.msra.mxu0 %v512_v3  ;;  %v524_v12 = vor.u32 %v554_v9, %v521_v10  ;;  %v551_v13 = vld [vmem:[#allocation2 + $0xcc] sm:$0xf0]  ;;  %v549_v14 = vld [vmem:[#allocation2 + $0xc4] sm:$0xf] }
   0x9   :  { %v497_v15 = vld [vmem:[#allocation2 + $0xd0] sm:$0xf0]  ;;  %273 = vmatpush.bf16.msra.mxu1 %v516_v7  ;;  %v496_v16 = vor.u32 %v551_v13, %v495_v11  ;;  %v503_v18 = vld [vmem:[#allocation2 + $0xc8] sm:$0xf]  ;;  %v552_v19 = vld [vmem:[#allocation2 + $0xd4] sm:$0xf0] }
   0xa   :  { %302 = vmatpush.bf16.msra.mxu2 %v520_v8  ;;  %v500_v17 = vor.u32 %v549_v14, %v497_v15  ;;  %v550_v20 = vld [vmem:[#allocation2 + $0xcc] sm:$0xf]  ;;  %331 = vmatpush.bf16.msra.mxu3 %v524_v12  ;;  %v504_v21 = vor.u32 %v552_v19, %v503_v18  ;;  %v505_v22 = vld [vmem:[#allocation2 + $0xd8] sm:$0xf0]  ;;  %v479_v23 = vld [vmem:[#allocation2 + $0xa0] sm:$0xf] }
   0xb   :  { %v547_v24 = vld [vmem:[#allocation2 + $0xac] sm:$0xf0]  ;;  %v508_v25 = vor.u32 %v550_v20, %v505_v22  ;;  %v545_v26 = vld [vmem:[#allocation2 + $0xa4] sm:$0xf]  ;;  %v481_v27 = vld [vmem:[#allocation2 + $0xb0] sm:$0xf0] }
   0xc   :  { %v487_v28 = vld [vmem:[#allocation2 + $0xa8] sm:$0xf]  ;;  %245 = vmatpush.bf16.msra.mxu0 %v496_v16  ;;  %v480_v29 = vor.u32 %v547_v24, %v479_v23  ;;  %v548_v30 = vld [vmem:[#allocation2 + $0xb4] sm:$0xf0]  ;;  %v546_v31 = vld [vmem:[#allocation2 + $0xac] sm:$0xf]  ;;  %v484_v33 = vor.u32 %v545_v26, %v481_v27 }
   0xd   :  { %v489_v32 = vld [vmem:[#allocation2 + $0xb8] sm:$0xf0]  ;;  %274 = vmatpush.bf16.msra.mxu1 %v500_v17  ;;  %v488_v34 = vor.u32 %v548_v30, %v487_v28  ;;  %v463_v35 = vld [vmem:[#allocation2 + $0x80] sm:$0xf]  ;;  %v543_v36 = vld [vmem:[#allocation2 + $0x8c] sm:$0xf0] }
   0xe   :  { %303 = vmatpush.bf16.msra.mxu2 %v504_v21  ;;  %v541_v37 = vld [vmem:[#allocation2 + $0x84] sm:$0xf]  ;;  %332 = vmatpush.bf16.msra.mxu3 %v508_v25  ;;  %v492_v38 = vor.u32 %v546_v31, %v489_v32  ;;  %v465_v39 = vld [vmem:[#allocation2 + $0x90] sm:$0xf0]  ;;  %v471_v40 = vld [vmem:[#allocation2 + $0x88] sm:$0xf]  ;;  %v464_v44 = vor.u32 %v543_v36, %v463_v35 }
   0xf   :  { %v544_v41 = vld [vmem:[#allocation2 + $0x94] sm:$0xf0]  ;;  %v542_v42 = vld [vmem:[#allocation2 + $0x8c] sm:$0xf]  ;;  %v473_v43 = vld [vmem:[#allocation2 + $0x98] sm:$0xf0]  ;;  %v468_v45 = vor.u32 %v541_v37, %v465_v39 }
  0x10   :  { %246 = vmatpush.bf16.msra.mxu0 %v480_v29  ;;  %v472_v46 = vor.u32 %v544_v41, %v471_v40  ;;  %v447_v47 = vld [vmem:[#allocation2 + $0x60] sm:$0xf]  ;;  %v539_v48 = vld [vmem:[#allocation2 + $0x6c] sm:$0xf0]  ;;  %v537_v49 = vld [vmem:[#allocation2 + $0x64] sm:$0xf]  ;;  %v476_v50 = vor.u32 %v542_v42, %v473_v43 }
  0x11   :  { %275 = vmatpush.bf16.msra.mxu1 %v484_v33  ;;  %v449_v51 = vld [vmem:[#allocation2 + $0x70] sm:$0xf0]  ;;  %v455_v52 = vld [vmem:[#allocation2 + $0x68] sm:$0xf]  ;;  %v540_v53 = vld [vmem:[#allocation2 + $0x74] sm:$0xf0]  ;;  %v448_v56 = vor.u32 %v539_v48, %v447_v47 }
  0x12   :  { %304 = vmatpush.bf16.msra.mxu2 %v488_v34  ;;  %333 = vmatpush.bf16.msra.mxu3 %v492_v38  ;;  %v538_v54 = vld [vmem:[#allocation2 + $0x6c] sm:$0xf]  ;;  %v457_v55 = vld [vmem:[#allocation2 + $0x78] sm:$0xf0]  ;;  %v452_v57 = vor.u32 %v537_v49, %v449_v51  ;;  %v456_v58 = vor.u32 %v540_v53, %v455_v52  ;;  %v431_v59 = vld [vmem:[#allocation2 + $0x40] sm:$0xf] }
  0x13   :  { %v535_v60 = vld [vmem:[#allocation2 + $0x4c] sm:$0xf0]  ;;  %v533_v61 = vld [vmem:[#allocation2 + $0x44] sm:$0xf]  ;;  %v460_v62 = vor.u32 %v538_v54, %v457_v55  ;;  %v433_v63 = vld [vmem:[#allocation2 + $0x50] sm:$0xf0] }
  0x14   :  { %247 = vmatpush.bf16.msra.mxu0 %v464_v44  ;;  %v439_v0 = vld [vmem:[#allocation2 + $0x48] sm:$0xf]  ;;  %v536_v1 = vld [vmem:[#allocation2 + $0x54] sm:$0xf0]  ;;  %v534_v2 = vld [vmem:[#allocation2 + $0x4c] sm:$0xf]  ;;  %v432_v4 = vor.u32 %v535_v60, %v431_v59  ;;  %v436_v5 = vor.u32 %v533_v61, %v433_v63 }
  0x15   :  { %276 = vmatpush.bf16.msra.mxu1 %v468_v45  ;;  %v441_v3 = vld [vmem:[#allocation2 + $0x58] sm:$0xf0]  ;;  %v440_v6 = vor.u32 %v536_v1, %v439_v0  ;;  %v415_v7 = vld [vmem:[#allocation2 + $0x20] sm:$0xf]  ;;  %v531_v8 = vld [vmem:[#allocation2 + $0x2c] sm:$0xf0] }
  0x16   :  { %305 = vmatpush.bf16.msra.mxu2 %v472_v46  ;;  %334 = vmatpush.bf16.msra.mxu3 %v476_v50  ;;  %v529_v9 = vld [vmem:[#allocation2 + $0x24] sm:$0xf]  ;;  %v444_v10 = vor.u32 %v534_v2, %v441_v3  ;;  %v417_v11 = vld [vmem:[#allocation2 + $0x30] sm:$0xf0]  ;;  %v423_v12 = vld [vmem:[#allocation2 + $0x28] sm:$0xf]  ;;  %v416_v16 = vor.u32 %v531_v8, %v415_v7 }
  0x17   :  { %v532_v13 = vld [vmem:[#allocation2 + $0x34] sm:$0xf0]  ;;  %v530_v14 = vld [vmem:[#allocation2 + $0x2c] sm:$0xf]  ;;  %v425_v15 = vld [vmem:[#allocation2 + $0x38] sm:$0xf0]  ;;  %v420_v17 = vor.u32 %v529_v9, %v417_v11 }
  0x18   :  { %248 = vmatpush.bf16.msra.mxu0 %v448_v56  ;;  %v424_v18 = vor.u32 %v532_v13, %v423_v12  ;;  %v399_v19 = vld [vmem:[#allocation2] sm:$0xf]  ;;  %v527_v20 = vld [vmem:[#allocation2 + $0xc] sm:$0xf0]  ;;  %v525_v21 = vld [vmem:[#allocation2 + $0x4] sm:$0xf]  ;;  %v428_v22 = vor.u32 %v530_v14, %v425_v15 }
  0x19   :  { %277 = vmatpush.bf16.msra.mxu1 %v452_v57  ;;  %v401_v23 = vld [vmem:[#allocation2 + $0x10] sm:$0xf0]  ;;  %v407_v24 = vld [vmem:[#allocation2 + $0x8] sm:$0xf]  ;;  %v528_v25 = vld [vmem:[#allocation2 + $0x14] sm:$0xf0]  ;;  %v400_v28 = vor.u32 %v527_v20, %v399_v19 }
  0x1a   :  { %306 = vmatpush.bf16.msra.mxu2 %v456_v58  ;;  %335 = vmatpush.bf16.msra.mxu3 %v460_v62  ;;  %v526_v26 = vld [vmem:[#allocation2 + $0xc] sm:$0xf]  ;;  %v409_v27 = vld [vmem:[#allocation2 + $0x18] sm:$0xf0]  ;;  %v30_v29 = vld [vmem:[%s775_s0] sm:$0xff]  ;;  %v404_v31 = vor.u32 %v525_v21, %v401_v23  ;;  %v408_v32 = vor.u32 %v528_v25, %v407_v24 }
  0x1b   :  { %v31_v30 = vld [vmem:[%s775_s0 + $0x8] sm:$0xff]  ;;  %v412_v33 = vor.u32 %v526_v26, %v409_v27  ;;  %v32_v35 = vld [vmem:[%s775_s0 + $0x10] sm:$0xff]  ;;  %v33_v36 = vld [vmem:[%s775_s0 + $0x18] sm:$0xff] }
  0x1c   :  { %249 = vmatpush.bf16.msra.mxu0 %v432_v4  ;;  %v38_v34 = vpack.c.bf16 %v31_v30, %v30_v29  ;;  %v39_v37 = vpack.c.bf16 %v33_v36, %v32_v35  ;;  %v34_v38 = vld [vmem:[%s775_s0 + $0x20] sm:$0xff]  ;;  %v35_v39 = vld [vmem:[%s775_s0 + $0x28] sm:$0xff]  ;;  %v36_v41 = vld [vmem:[%s775_s0 + $0x30] sm:$0xff] }
  0x1d   :  { %278 = vmatpush.bf16.msra.mxu1 %v436_v5  ;;  %v40_v40 = vpack.c.bf16 %v35_v39, %v34_v38  ;;  %v37_v42 = vld [vmem:[%s775_s0 + $0x38] sm:$0xff]  ;;  %v74_v44 = vld [vmem:[%s777_s2] sm:$0xf] }
  0x1e   :  { %307 = vmatpush.bf16.msra.mxu2 %v440_v6  ;;  %336 = vmatpush.bf16.msra.mxu3 %v444_v10  ;;  %v41_v43 = vpack.c.bf16 %v37_v42, %v36_v41  ;;  %v639_v45 = vperm.slane %v74_v44, 0  ;;  %v641_v46 = vperm.slane %v74_v44, 1  ;;  %v651_v51 = vperm.slane %v74_v44, 2 }
  0x1f   :  { %v653_v52 = vperm.slane %v74_v44, 3 }
  0x20   :  { %250 = vmatpush.bf16.msra.mxu0 %v416_v16 }
  0x21   :  { %279 = vmatpush.bf16.msra.mxu1 %v420_v17 }
  0x22   :  { %308 = vmatpush.bf16.msra.mxu2 %v424_v18  ;;  %337 = vmatpush.bf16.msra.mxu3 %v428_v22 }
  0x24   :  { %251 = vmatpush.bf16.msra.mxu0 %v400_v28 }
  0x25   :  { %280 = vmatpush.bf16.msra.mxu1 %v404_v31 }
  0x26   :  { %309 = vmatpush.bf16.msra.mxu2 %v408_v32  ;;  %338 = vmatpush.bf16.msra.mxu3 %v412_v33 }
  0x27   :  { %252 = vmatmul.bf16.vlgmr.msra.gmra.mxu0 %v38_v34 }
  0x28   :  { %281 = vmatmul.bf16.vlgmr.msra.gmra.mxu1 %v38_v34 }
  0x29   :  { %310 = vmatmul.bf16.vlgmr.msra.gmra.mxu2 %v38_v34  ;;  %339 = vmatmul.bf16.vlgmr.msra.gmra.mxu3 %v38_v34 }
  0x37   :  { %257 = vmatmul.bf16.gmra.mxu0 %v39_v37 }
  0x38   :  { %286 = vmatmul.bf16.gmra.mxu1 %v39_v37 }
  0x39   :  { %315 = vmatmul.bf16.gmra.mxu2 %v39_v37  ;;  %344 = vmatmul.bf16.gmra.mxu3 %v39_v37 }
  0x47   :  { %262 = vmatmul.bf16.gmra.mxu0 %v40_v40 }
  0x48   :  { %291 = vmatmul.bf16.gmra.mxu1 %v40_v40 }
  0x49   :  { %320 = vmatmul.bf16.gmra.mxu2 %v40_v40  ;;  %349 = vmatmul.bf16.gmra.mxu3 %v40_v40 }
  0x57   :  { %267 = vmatmul.bf16.gmra.mxu0 %v41_v43 }
  0x58   :  { %296 = vmatmul.bf16.gmra.mxu1 %v41_v43 }
  0x59   :  { %325 = vmatmul.bf16.gmra.mxu2 %v41_v43  ;;  %354 = vmatmul.bf16.gmra.mxu3 %v41_v43 }
  0xa4   :  { %v253_v47 = vpop.f32.mrf.mxu0 }
  0xa5   :  { %v254_v48 = vadd.f32 %v253_v47, %v639_v45  ;;  %v282_v49 = vpop.f32.mrf.mxu1 }
  0xa6   :  { %v283_v50 = vadd.f32 %v282_v49, %v641_v46 }
  0xa7   :  { %360 = vst [vmem:[%s778_s3] sm:$0xff] %v254_v48 }
  0xa8   :  { %361 = vst [vmem:[%s778_s3 + $0x8] sm:$0xff] %v283_v50 }
  0xac   :  { %v311_v53 = vpop.f32.mrf.mxu2  ;;  %v340_v55 = vpop.f32.mrf.mxu3 }
  0xad   :  { %v312_v54 = vadd.f32 %v311_v53, %v651_v51  ;;  %v255_v56 = vpop.f32.mrf.mxu0  ;;  %v341_v57 = vadd.f32 %v340_v55, %v653_v52  ;;  %v284_v59 = vpop.f32.mrf.mxu1 }
  0xae   :  { %v256_v58 = vadd.f32 %v255_v56, %v639_v45  ;;  %v285_v60 = vadd.f32 %v284_v59, %v641_v46 }
  0xaf   :  { %362 = vst [vmem:[%s778_s3 + $0x10] sm:$0xff] %v312_v54 }
  0xb0   :  { %363 = vst [vmem:[%s778_s3 + $0x18] sm:$0xff] %v341_v57 }
  0xb1   :  { %364 = vst [vmem:[%s778_s3 + $0x20] sm:$0xff] %v256_v58 }
  0xb2   :  { %365 = vst [vmem:[%s778_s3 + $0x28] sm:$0xff] %v285_v60 }
  0xb4   :  { %v313_v61 = vpop.f32.mrf.mxu2  ;;  %v342_v63 = vpop.f32.mrf.mxu3 }
  0xb5   :  { %v314_v62 = vadd.f32 %v313_v61, %v651_v51  ;;  %v258_v0 = vpop.f32.mrf.mxu0  ;;  %v343_v1 = vadd.f32 %v342_v63, %v653_v52  ;;  %v287_v3 = vpop.f32.mrf.mxu1 }
  0xb6   :  { %v259_v2 = vadd.f32 %v258_v0, %v639_v45  ;;  %v288_v4 = vadd.f32 %v287_v3, %v641_v46 }
  0xb7   :  { %366 = vst [vmem:[%s778_s3 + $0x30] sm:$0xff] %v314_v62 }
  0xb8   :  { %367 = vst [vmem:[%s778_s3 + $0x38] sm:$0xff] %v343_v1 }
  0xb9   :  { %368 = vst [vmem:[%s778_s3 + $0x40] sm:$0xff] %v259_v2 }
  0xba   :  { %369 = vst [vmem:[%s778_s3 + $0x48] sm:$0xff] %v288_v4 }
  0xbc   :  { %v316_v5 = vpop.f32.mrf.mxu2  ;;  %v345_v7 = vpop.f32.mrf.mxu3 }
  0xbd   :  { %v317_v6 = vadd.f32 %v316_v5, %v651_v51  ;;  %v260_v8 = vpop.f32.mrf.mxu0  ;;  %v346_v9 = vadd.f32 %v345_v7, %v653_v52  ;;  %v289_v11 = vpop.f32.mrf.mxu1 }
  0xbe   :  { %v261_v10 = vadd.f32 %v260_v8, %v639_v45  ;;  %v290_v12 = vadd.f32 %v289_v11, %v641_v46 }
  0xbf   :  { %370 = vst [vmem:[%s778_s3 + $0x50] sm:$0xff] %v317_v6 }
  0xc0   :  { %371 = vst [vmem:[%s778_s3 + $0x58] sm:$0xff] %v346_v9 }
  0xc1   :  { %372 = vst [vmem:[%s778_s3 + $0x60] sm:$0xff] %v261_v10 }
  0xc2   :  { %373 = vst [vmem:[%s778_s3 + $0x68] sm:$0xff] %v290_v12 }
  0xc4   :  { %v318_v13 = vpop.f32.mrf.mxu2  ;;  %v347_v15 = vpop.f32.mrf.mxu3 }
  0xc5   :  { %v319_v14 = vadd.f32 %v318_v13, %v651_v51  ;;  %v263_v16 = vpop.f32.mrf.mxu0  ;;  %v348_v17 = vadd.f32 %v347_v15, %v653_v52  ;;  %v292_v19 = vpop.f32.mrf.mxu1 }
  0xc6   :  { %v264_v18 = vadd.f32 %v263_v16, %v639_v45  ;;  %v293_v20 = vadd.f32 %v292_v19, %v641_v46 }
  0xc7   :  { %374 = vst [vmem:[%s778_s3 + $0x70] sm:$0xff] %v319_v14 }
  0xc8   :  { %375 = vst [vmem:[%s778_s3 + $0x78] sm:$0xff] %v348_v17 }
  0xc9   :  { %376 = vst [vmem:[%s778_s3 + $0x80] sm:$0xff] %v264_v18 }
  0xca   :  { %377 = vst [vmem:[%s778_s3 + $0x88] sm:$0xff] %v293_v20 }
  0xcc   :  { %v321_v21 = vpop.f32.mrf.mxu2  ;;  %v350_v23 = vpop.f32.mrf.mxu3 }
  0xcd   :  { %v322_v22 = vadd.f32 %v321_v21, %v651_v51  ;;  %v265_v24 = vpop.f32.mrf.mxu0  ;;  %v351_v25 = vadd.f32 %v350_v23, %v653_v52  ;;  %v294_v27 = vpop.f32.mrf.mxu1 }
  0xce   :  { %v266_v26 = vadd.f32 %v265_v24, %v639_v45  ;;  %v295_v28 = vadd.f32 %v294_v27, %v641_v46 }
  0xcf   :  { %378 = vst [vmem:[%s778_s3 + $0x90] sm:$0xff] %v322_v22 }
  0xd0   :  { %379 = vst [vmem:[%s778_s3 + $0x98] sm:$0xff] %v351_v25 }
  0xd1   :  { %380 = vst [vmem:[%s778_s3 + $0xa0] sm:$0xff] %v266_v26 }
  0xd2   :  { %381 = vst [vmem:[%s778_s3 + $0xa8] sm:$0xff] %v295_v28 }
  0xd4   :  { %v323_v29 = vpop.f32.mrf.mxu2  ;;  %v352_v31 = vpop.f32.mrf.mxu3 }
  0xd5   :  { %v324_v30 = vadd.f32 %v323_v29, %v651_v51  ;;  %v268_v32 = vpop.f32.mrf.mxu0  ;;  %v353_v33 = vadd.f32 %v352_v31, %v653_v52  ;;  %v297_v35 = vpop.f32.mrf.mxu1 }
  0xd6   :  { %v269_v34 = vadd.f32 %v268_v32, %v639_v45  ;;  %v298_v36 = vadd.f32 %v297_v35, %v641_v46 }
  0xd7   :  { %382 = vst [vmem:[%s778_s3 + $0xb0] sm:$0xff] %v324_v30 }
  0xd8   :  { %383 = vst [vmem:[%s778_s3 + $0xb8] sm:$0xff] %v353_v33 }
  0xd9   :  { %384 = vst [vmem:[%s778_s3 + $0xc0] sm:$0xff] %v269_v34 }
  0xda   :  { %385 = vst [vmem:[%s778_s3 + $0xc8] sm:$0xff] %v298_v36 }
  0xdc   :  { %v326_v37 = vpop.f32.mrf.mxu2  ;;  %v355_v39 = vpop.f32.mrf.mxu3 }
  0xdd   :  { %v327_v38 = vadd.f32 %v326_v37, %v651_v51  ;;  %v270_v40 = vpop.f32.mrf.mxu0  ;;  %v356_v41 = vadd.f32 %v355_v39, %v653_v52  ;;  %v299_v43 = vpop.f32.mrf.mxu1 }
  0xde   :  { %v271_v42 = vadd.f32 %v270_v40, %v639_v45  ;;  %v300_v44 = vadd.f32 %v299_v43, %v641_v46 }
  0xdf   :  { %386 = vst [vmem:[%s778_s3 + $0xd0] sm:$0xff] %v327_v38 }
  0xe0   :  { %387 = vst [vmem:[%s778_s3 + $0xd8] sm:$0xff] %v356_v41 }
  0xe1   :  { %388 = vst [vmem:[%s778_s3 + $0xe0] sm:$0xff] %v271_v42 }
  0xe2   :  { %389 = vst [vmem:[%s778_s3 + $0xe8] sm:$0xff] %v300_v44 }
  0xe4   :  { %v328_v45 = vpop.f32.mrf.mxu2  ;;  %v357_v48 = vpop.f32.mrf.mxu3 }
  0xe5   :  { %v329_v47 = vadd.f32 %v328_v45, %v651_v51  ;;  %v358_v49 = vadd.f32 %v357_v48, %v653_v52 }
  0xe7   :  { %390 = vst [vmem:[%s778_s3 + $0xf0] sm:$0xff] %v329_v47 }
  0xe8   :  { %391 = vst [vmem:[%s778_s3 + $0xf8] sm:$0xff] %v358_v49 }
  0xe9   :  { %396 = vsyncpa [#allocation3], 1 }

// kernel: rnn_model_forward.9
= control target key start
LH: loop header
LB: loop body
LE: loop exit
PB: predicated region body
PF: predicated region fallthrough
CT: control target
= control target key end

     0   :  { %11 = vsyncpa [#allocation3], 0  ;;  %s2369_s24 = smov [#allocation2]   ;;  %s2370_s26 = smov 256   ;;  %s3679_s0 = inlined_call_operand.vmem [shape: f32[64,128], index: 0, kind: input, shape index: {}]   ;;  %s3680_s1 = inlined_call_operand.hbm [shape: bf16[128,512], index: 1, kind: input, shape index: {}]   ;;  %s3681_s2 = inlined_call_operand.vmem [shape: f32[1,512], index: 2, kind: input, shape index: {}]   ;;  %s3682_s3 = inlined_call_operand.vmem [shape: bf16[128,128], index: 3, kind: input, shape index: {}]   ;;  %s3683_s4 = inlined_call_operand.vmem [shape: f32[1,128], index: 4, kind: input, shape index: {}]   ;;  %s3684_s5 = inlined_call_operand.vmem [shape: bf16[128,4], index: 5, kind: input, shape index: {}]   ;;  %s3685_s6 = inlined_call_operand.vmem [shape: f32[64,128], index: 6, kind: output, shape index: {}]  }
   0x1   :  { %s18_s23 = sshll.u32 %s3680_s1, 4  ;;  %s20_s25 = sshll.u32 %s2369_s24, 4  ;;  %s19_s23 = int_to_ptr.hbm [resolvable:$true] %s18_s23  ;;  %s21_s25 = int_to_ptr.vmem [resolvable:$true] %s20_s25 }
   0x2   :  { %s2371_s27 = smov 16  }
   0x3   :  { %26 = dma.hbm_to_vmem [thread:$0]  %s19_s23, 4096, %s21_s25, [#allocation3], %s2370_s26, %s2370_s26, %s2371_s27  }
   0x4   :  { %2367 = dma.done.wait [#allocation3], 4096  }
   0x5   :  { %2368 = vsyncadd [#allocation3], 4294963200  ;;  %v1915_v0 = vld [vmem:[#allocation2 + $0xe0] sm:$0xf]  ;;  %v2023_v1 = vld [vmem:[#allocation2 + $0xec] sm:$0xf0] }
   0x6   :  { %v2021_v2 = vld [vmem:[#allocation2 + $0xe4] sm:$0xf]  ;;  %v1916_v3 = vor.u32 %v2023_v1, %v1915_v0  ;;  %v1917_v4 = vld [vmem:[#allocation2 + $0xf0] sm:$0xf0]  ;;  %v1923_v5 = vld [vmem:[#allocation2 + $0xe8] sm:$0xf] }
   0x7   :  { %v2024_v6 = vld [vmem:[#allocation2 + $0xf4] sm:$0xf0]  ;;  %v1920_v7 = vor.u32 %v2021_v2, %v1917_v4  ;;  %v1899_v9 = vld [vmem:[#allocation2 + $0xc0] sm:$0xf]  ;;  %v2019_v10 = vld [vmem:[#allocation2 + $0xcc] sm:$0xf0] }
   0x8   :  { %v1924_v8 = vor.u32 %v2024_v6, %v1923_v5  ;;  %v2017_v11 = vld [vmem:[#allocation2 + $0xc4] sm:$0xf]  ;;  %253 = vmatpush.bf16.msra.mxu0 %v1916_v3  ;;  %v1900_v12 = vor.u32 %v2019_v10, %v1899_v9  ;;  %v1901_v13 = vld [vmem:[#allocation2 + $0xd0] sm:$0xf0]  ;;  %v1907_v14 = vld [vmem:[#allocation2 + $0xc8] sm:$0xf] }
   0x9   :  { %v2020_v15 = vld [vmem:[#allocation2 + $0xd4] sm:$0xf0]  ;;  %282 = vmatpush.bf16.msra.mxu1 %v1920_v7  ;;  %v1904_v16 = vor.u32 %v2017_v11, %v1901_v13  ;;  %v1883_v18 = vld [vmem:[#allocation2 + $0xa0] sm:$0xf]  ;;  %v2015_v19 = vld [vmem:[#allocation2 + $0xac] sm:$0xf0] }
   0xa   :  { %311 = vmatpush.bf16.msra.mxu2 %v1924_v8  ;;  %v1908_v17 = vor.u32 %v2020_v15, %v1907_v14  ;;  %v2013_v20 = vld [vmem:[#allocation2 + $0xa4] sm:$0xf]  ;;  %v1885_v21 = vld [vmem:[#allocation2 + $0xb0] sm:$0xf0]  ;;  %v1891_v22 = vld [vmem:[#allocation2 + $0xa8] sm:$0xf]  ;;  %v1884_v24 = vor.u32 %v2015_v19, %v1883_v18 }
   0xb   :  { %v2016_v23 = vld [vmem:[#allocation2 + $0xb4] sm:$0xf0]  ;;  %v1888_v25 = vor.u32 %v2013_v20, %v1885_v21  ;;  %v1867_v27 = vld [vmem:[#allocation2 + $0x80] sm:$0xf]  ;;  %v2011_v28 = vld [vmem:[#allocation2 + $0x8c] sm:$0xf0] }
   0xc   :  { %254 = vmatpush.bf16.msra.mxu0 %v1900_v12  ;;  %v1892_v26 = vor.u32 %v2016_v23, %v1891_v22  ;;  %v2009_v29 = vld [vmem:[#allocation2 + $0x84] sm:$0xf]  ;;  %v1869_v30 = vld [vmem:[#allocation2 + $0x90] sm:$0xf0]  ;;  %v1875_v31 = vld [vmem:[#allocation2 + $0x88] sm:$0xf]  ;;  %v1868_v33 = vor.u32 %v2011_v28, %v1867_v27 }
   0xd   :  { %283 = vmatpush.bf16.msra.mxu1 %v1904_v16  ;;  %v2012_v32 = vld [vmem:[#allocation2 + $0x94] sm:$0xf0]  ;;  %v1872_v34 = vor.u32 %v2009_v29, %v1869_v30  ;;  %v1851_v36 = vld [vmem:[#allocation2 + $0x60] sm:$0xf]  ;;  %v2007_v37 = vld [vmem:[#allocation2 + $0x6c] sm:$0xf0] }
   0xe   :  { %312 = vmatpush.bf16.msra.mxu2 %v1908_v17  ;;  %v1876_v35 = vor.u32 %v2012_v32, %v1875_v31  ;;  %v2005_v38 = vld [vmem:[#allocation2 + $0x64] sm:$0xf]  ;;  %v1853_v39 = vld [vmem:[#allocation2 + $0x70] sm:$0xf0]  ;;  %v1859_v40 = vld [vmem:[#allocation2 + $0x68] sm:$0xf]  ;;  %v1852_v42 = vor.u32 %v2007_v37, %v1851_v36 }
   0xf   :  { %v2008_v41 = vld [vmem:[#allocation2 + $0x74] sm:$0xf0]  ;;  %v1856_v43 = vor.u32 %v2005_v38, %v1853_v39  ;;  %v1835_v45 = vld [vmem:[#allocation2 + $0x40] sm:$0xf]  ;;  %v2003_v46 = vld [vmem:[#allocation2 + $0x4c] sm:$0xf0] }
  0x10   :  { %255 = vmatpush.bf16.msra.mxu0 %v1884_v24  ;;  %v1860_v44 = vor.u32 %v2008_v41, %v1859_v40  ;;  %v2001_v47 = vld [vmem:[#allocation2 + $0x44] sm:$0xf]  ;;  %v1837_v48 = vld [vmem:[#allocation2 + $0x50] sm:$0xf0]  ;;  %v1843_v49 = vld [vmem:[#allocation2 + $0x48] sm:$0xf]  ;;  %v1836_v51 = vor.u32 %v2003_v46, %v1835_v45 }
  0x11   :  { %284 = vmatpush.bf16.msra.mxu1 %v1888_v25  ;;  %v2004_v50 = vld [vmem:[#allocation2 + $0x54] sm:$0xf0]  ;;  %v1840_v52 = vor.u32 %v2001_v47, %v1837_v48  ;;  %v1819_v54 = vld [vmem:[#allocation2 + $0x20] sm:$0xf]  ;;  %v1999_v55 = vld [vmem:[#allocation2 + $0x2c] sm:$0xf0] }
  0x12   :  { %313 = vmatpush.bf16.msra.mxu2 %v1892_v26  ;;  %v1844_v53 = vor.u32 %v2004_v50, %v1843_v49  ;;  %v1997_v56 = vld [vmem:[#allocation2 + $0x24] sm:$0xf]  ;;  %v1821_v57 = vld [vmem:[#allocation2 + $0x30] sm:$0xf0]  ;;  %v1827_v58 = vld [vmem:[#allocation2 + $0x28] sm:$0xf]  ;;  %v1820_v60 = vor.u32 %v1999_v55, %v1819_v54 }
  0x13   :  { %v2000_v59 = vld [vmem:[#allocation2 + $0x34] sm:$0xf0]  ;;  %v1824_v61 = vor.u32 %v1997_v56, %v1821_v57  ;;  %v1803_v63 = vld [vmem:[#allocation2] sm:$0xf]  ;;  %v1995_v0 = vld [vmem:[#allocation2 + $0xc] sm:$0xf0] }
  0x14   :  { %256 = vmatpush.bf16.msra.mxu0 %v1868_v33  ;;  %v1828_v62 = vor.u32 %v2000_v59, %v1827_v58  ;;  %v1993_v1 = vld [vmem:[#allocation2 + $0x4] sm:$0xf]  ;;  %v1805_v2 = vld [vmem:[#allocation2 + $0x10] sm:$0xf0]  ;;  %v1811_v3 = vld [vmem:[#allocation2 + $0x8] sm:$0xf]  ;;  %v1804_v5 = vor.u32 %v1995_v0, %v1803_v63 }
  0x15   :  { %285 = vmatpush.bf16.msra.mxu1 %v1872_v34  ;;  %v1996_v4 = vld [vmem:[#allocation2 + $0x14] sm:$0xf0]  ;;  %v39_v6 = vld [vmem:[%s3679_s0] sm:$0xff]  ;;  %v40_v7 = vld [vmem:[%s3679_s0 + $0x8] sm:$0xff]  ;;  %v1808_v8 = vor.u32 %v1993_v1, %v1805_v2  ;;  %vm494_vm0 = vcmask 31744  }
  0x16   :  { %314 = vmatpush.bf16.msra.mxu2 %v1876_v35  ;;  %v1812_v9 = vor.u32 %v1996_v4, %v1811_v3  ;;  %v2032_v10 = vld [vmem:[%s3684_s5 + $0x38] sm:$0xff]  ;;  %v2423_v11 = vpack.c.bf16 %v40_v7, %v39_v6  ;;  %v2031_v12 = vld [vmem:[%s3684_s5 + $0x30] sm:$0xff]  ;;  %v2022_v13 = vld [vmem:[#allocation2 + $0xec] sm:$0xf] }
  0x17   :  { %v1925_v14 = vld [vmem:[#allocation2 + $0xf8] sm:$0xf0]  ;;  %v2018_v16 = vld [vmem:[#allocation2 + $0xcc] sm:$0xf]  ;;  %v2029_v22 = vld [vmem:[%s3684_s5 + $0x20] sm:$0xff] }
  0x18   :  { %257 = vmatpush.bf16.msra.mxu0 %v1852_v42  ;;  %v1928_v15 = vor.u32 %v2022_v13, %v1925_v14  ;;  %v1909_v17 = vld [vmem:[#allocation2 + $0xd8] sm:$0xf0]  ;;  %v2030_v18 = vld [vmem:[%s3684_s5 + $0x28] sm:$0xff]  ;;  %v41_v23 = vld [vmem:[%s3679_s0 + $0x10] sm:$0xff] }
  0x19   :  { %286 = vmatpush.bf16.msra.mxu1 %v1856_v43  ;;  %v1912_v19 = vor.u32 %v2018_v16, %v1909_v17  ;;  %v2014_v20 = vld [vmem:[#allocation2 + $0xac] sm:$0xf]  ;;  %v1893_v21 = vld [vmem:[#allocation2 + $0xb8] sm:$0xf0]  ;;  %v2027_v31 = vld [vmem:[%s3684_s5 + $0x10] sm:$0xff] }
  0x1a   :  { %315 = vmatpush.bf16.msra.mxu2 %v1860_v44  ;;  %340 = vmatpush.bf16.msra.mxu3 %v1928_v15  ;;  %v1896_v24 = vor.u32 %v2014_v20, %v1893_v21  ;;  %v42_v25 = vld [vmem:[%s3679_s0 + $0x18] sm:$0xff]  ;;  %v2010_v26 = vld [vmem:[#allocation2 + $0x8c] sm:$0xf]  ;;  %v2025_v41 = vld [vmem:[%s3684_s5] sm:$0xff] }
  0x1b   :  { %v1877_v27 = vld [vmem:[#allocation2 + $0x98] sm:$0xf0]  ;;  %v48_v29 = vpack.c.bf16 %v42_v25, %v41_v23  ;;  %v2006_v32 = vld [vmem:[#allocation2 + $0x6c] sm:$0xf]  ;;  %v43_v42 = vld [vmem:[%s3679_s0 + $0x20] sm:$0xff] }
  0x1c   :  { %258 = vmatpush.bf16.msra.mxu0 %v1836_v51  ;;  %v2028_v28 = vld [vmem:[%s3684_s5 + $0x18] sm:$0xff]  ;;  %v1880_v30 = vor.u32 %v2010_v26, %v1877_v27  ;;  %v2002_v35 = vld [vmem:[#allocation2 + $0x4c] sm:$0xf]  ;;  %v45_v49 = vld [vmem:[%s3679_s0 + $0x30] sm:$0xff] }
  0x1d   :  { %287 = vmatpush.bf16.msra.mxu1 %v1840_v52  ;;  %v1861_v33 = vld [vmem:[#allocation2 + $0x78] sm:$0xf0]  ;;  %v2026_v37 = vld [vmem:[%s3684_s5 + $0x8] sm:$0xff]  ;;  %v2037_v55 = vld [vmem:[%s3682_s3 + $0x20] sm:$0xff] }
  0x1e   :  { %316 = vmatpush.bf16.msra.mxu2 %v1844_v53  ;;  %341 = vmatpush.bf16.msra.mxu3 %v1912_v19  ;;  %v1864_v34 = vor.u32 %v2006_v32, %v1861_v33  ;;  %v1845_v36 = vld [vmem:[#allocation2 + $0x58] sm:$0xf0]  ;;  %v1998_v39 = vld [vmem:[#allocation2 + $0x2c] sm:$0xf]  ;;  %v2039_v53 = vld [vmem:[%s3682_s3 + $0x30] sm:$0xff] }
  0x1f   :  { %v1848_v38 = vor.u32 %v2002_v35, %v1845_v36  ;;  %v1829_v40 = vld [vmem:[#allocation2 + $0x38] sm:$0xf0]  ;;  %v44_v44 = vld [vmem:[%s3679_s0 + $0x28] sm:$0xff]  ;;  %v2035_v57 = vld [vmem:[%s3682_s3 + $0x10] sm:$0xff] }
  0x20   :  { %259 = vmatpush.bf16.msra.mxu0 %v1820_v60  ;;  %v1832_v43 = vor.u32 %v1998_v39, %v1829_v40  ;;  %v1994_v45 = vld [vmem:[#allocation2 + $0xc] sm:$0xf]  ;;  %v1813_v46 = vld [vmem:[#allocation2 + $0x18] sm:$0xf0]  ;;  %v49_v47 = vpack.c.bf16 %v44_v44, %v43_v42  ;;  %v2033_v59 = vld [vmem:[%s3682_s3] sm:$0xff] }
  0x21   :  { %288 = vmatpush.bf16.msra.mxu1 %v1824_v61  ;;  %v1816_v48 = vor.u32 %v1994_v45, %v1813_v46  ;;  %v46_v50 = vld [vmem:[%s3679_s0 + $0x38] sm:$0xff]  ;;  %v2038_v54 = vld [vmem:[%s3682_s3 + $0x28] sm:$0xff]  ;;  %v2496_v60 = vld [vmem:[%s3681_s2] sm:$0xf] }
  0x22   :  { %317 = vmatpush.bf16.msra.mxu2 %v1828_v62  ;;  %342 = vmatpush.bf16.msra.mxu3 %v1896_v24  ;;  %v50_v51 = vpack.c.bf16 %v46_v50, %v45_v49  ;;  %v2040_v52 = vld [vmem:[%s3682_s3 + $0x38] sm:$0xff]  ;;  %v2034_v58 = vld [vmem:[%s3682_s3 + $0x8] sm:$0xff]  ;;  %v85_v63 = vperm.slane %v2496_v60, 0  ;;  %v2526_v46 = vperm.slane %v2496_v60, 2 }
  0x23   :  { %v2036_v56 = vld [vmem:[%s3682_s3 + $0x18] sm:$0xff] }
  0x24   :  { %260 = vmatpush.bf16.msra.mxu0 %v1804_v5 }
  0x25   :  { %289 = vmatpush.bf16.msra.mxu1 %v1808_v8 }
  0x26   :  { %318 = vmatpush.bf16.msra.mxu2 %v1812_v9  ;;  %343 = vmatpush.bf16.msra.mxu3 %v1880_v30 }
  0x27   :  { %261 = vmatmul.bf16.vlgmr.msra.gmra.mxu0 %v2423_v11 }
  0x28   :  { %465 = vmatpush.bf16.msrb.mxu0 %v2032_v10  ;;  %290 = vmatmul.bf16.vlgmr.msra.gmra.mxu1 %v2423_v11 }
  0x29   :  { %319 = vmatmul.bf16.vlgmr.msra.gmra.mxu2 %v2423_v11  ;;  %2041 = vmatpush.bf16.msrb.mxu1 %v2040_v52 }
  0x2a   :  { %344 = vmatpush.bf16.msra.mxu3 %v1864_v34  ;;  %2042 = vmatpush.bf16.msrb.mxu2 %v2040_v52 }
  0x2c   :  { %466 = vmatpush.bf16.msrb.mxu0 %v2031_v12 }
  0x2d   :  { %2044 = vmatpush.bf16.msrb.mxu1 %v2039_v53 }
  0x2e   :  { %345 = vmatpush.bf16.msra.mxu3 %v1848_v38  ;;  %2045 = vmatpush.bf16.msrb.mxu2 %v2039_v53 }
  0x30   :  { %467 = vmatpush.bf16.msrb.mxu0 %v2030_v18 }
  0x31   :  { %2047 = vmatpush.bf16.msrb.mxu1 %v2038_v54 }
  0x32   :  { %346 = vmatpush.bf16.msra.mxu3 %v1832_v43  ;;  %2048 = vmatpush.bf16.msrb.mxu2 %v2038_v54 }
  0x34   :  { %468 = vmatpush.bf16.msrb.mxu0 %v2029_v22  ;;  %v2516_v22 = vperm.slane %v2496_v60, 1 }
  0x35   :  { %2050 = vmatpush.bf16.msrb.mxu1 %v2037_v55 }
  0x36   :  { %347 = vmatpush.bf16.msra.mxu3 %v1816_v48  ;;  %2051 = vmatpush.bf16.msrb.mxu2 %v2037_v55 }
  0x37   :  { %266 = vmatmul.bf16.gmra.mxu0 %v48_v29 }
  0x38   :  { %469 = vmatpush.bf16.msrb.mxu0 %v2028_v28  ;;  %295 = vmatmul.bf16.gmra.mxu1 %v48_v29 }
  0x39   :  { %324 = vmatmul.bf16.gmra.mxu2 %v48_v29  ;;  %348 = vmatmul.bf16.vlgmr.msra.gmra.mxu3 %v2423_v11 }
  0x3a   :  { %2043 = vmatpush.bf16.msrb.mxu3 %v2040_v52  ;;  %2053 = vmatpush.bf16.msrb.mxu1 %v2036_v56 }
  0x3b   :  { %2054 = vmatpush.bf16.msrb.mxu2 %v2036_v56 }
  0x3c   :  { %470 = vmatpush.bf16.msrb.mxu0 %v2027_v31 }
  0x3e   :  { %2046 = vmatpush.bf16.msrb.mxu3 %v2039_v53  ;;  %2056 = vmatpush.bf16.msrb.mxu1 %v2035_v57 }
  0x3f   :  { %2057 = vmatpush.bf16.msrb.mxu2 %v2035_v57 }
  0x40   :  { %471 = vmatpush.bf16.msrb.mxu0 %v2026_v37 }
  0x42   :  { %2049 = vmatpush.bf16.msrb.mxu3 %v2038_v54  ;;  %2059 = vmatpush.bf16.msrb.mxu1 %v2034_v58 }
  0x43   :  { %2060 = vmatpush.bf16.msrb.mxu2 %v2034_v58 }
  0x44   :  { %472 = vmatpush.bf16.msrb.mxu0 %v2025_v41 }
  0x46   :  { %2052 = vmatpush.bf16.msrb.mxu3 %v2037_v55  ;;  %2062 = vmatpush.bf16.msrb.mxu1 %v2033_v59 }
  0x47   :  { %271 = vmatmul.bf16.gmra.mxu0 %v49_v47  ;;  %2063 = vmatpush.bf16.msrb.mxu2 %v2033_v59 }
  0x48   :  { %300 = vmatmul.bf16.gmra.mxu1 %v49_v47  ;;  %771 = vmatpush.bf16.msra.mxu0 %v2040_v52 }
  0x49   :  { %329 = vmatmul.bf16.gmra.mxu2 %v49_v47  ;;  %353 = vmatmul.bf16.gmra.mxu3 %v48_v29 }
  0x4a   :  { %2055 = vmatpush.bf16.msrb.mxu3 %v2036_v56 }
  0x4c   :  { %772 = vmatpush.bf16.msra.mxu0 %v2039_v53 }
  0x4e   :  { %2058 = vmatpush.bf16.msrb.mxu3 %v2035_v57 }
  0x50   :  { %773 = vmatpush.bf16.msra.mxu0 %v2038_v54 }
  0x52   :  { %2061 = vmatpush.bf16.msrb.mxu3 %v2034_v58 }
  0x54   :  { %774 = vmatpush.bf16.msra.mxu0 %v2037_v55 }
  0x56   :  { %2064 = vmatpush.bf16.msrb.mxu3 %v2033_v59 }
  0x57   :  { %276 = vmatmul.bf16.gmra.mxu0 %v50_v51 }
  0x58   :  { %305 = vmatmul.bf16.gmra.mxu1 %v50_v51  ;;  %775 = vmatpush.bf16.msra.mxu0 %v2036_v56 }
  0x59   :  { %334 = vmatmul.bf16.gmra.mxu2 %v50_v51  ;;  %358 = vmatmul.bf16.gmra.mxu3 %v49_v47 }
  0x5c   :  { %776 = vmatpush.bf16.msra.mxu0 %v2035_v57 }
  0x60   :  { %777 = vmatpush.bf16.msra.mxu0 %v2034_v58 }
  0x64   :  { %778 = vmatpush.bf16.msra.mxu0 %v2033_v59 }
  0x67   :  { %473 = vmatmul.bf16.vlgmr.msrb.gmra.mxu0 %v2423_v11 }
  0x69   :  { %363 = vmatmul.bf16.gmra.mxu3 %v50_v51 }
  0x77   :  { %478 = vmatmul.bf16.gmra.mxu0 %v48_v29 }
  0x87   :  { %483 = vmatmul.bf16.gmra.mxu0 %v49_v47 }
  0x97   :  { %488 = vmatmul.bf16.gmra.mxu0 %v50_v51 }
  0xa4   :  { %v262_v61 = vpop.f32.mrf.mxu0 }
  0xa5   :  { %v2498_v62 = vpop.f32.mrf.mxu1  ;;  %v263_v0 = vadd.f32 %v262_v61, %v85_v63 }
  0xa6   :  { %v292_v59 = vadd.f32 %v2498_v62, %v2516_v22 }
  0xa7   :  { %2103 = vtanh.f32 %v263_v0 }
  0xac   :  { %v2501_v1 = vpop.f32.mrf.mxu2  ;;  %v264_v2 = vpop.f32.mrf.mxu0 }
  0xad   :  { %v265_v3 = vadd.f32 %v264_v2, %v85_v63  ;;  %v2503_v4 = vpop.f32.mrf.mxu1  ;;  %v2104_v6 = vpop.eup %2103  ;;  %v2542_v2 = vperm.slane %v2496_v60, 3 }
  0xae   :  { %v294_v0 = vadd.f32 %v2503_v4, %v2516_v22 }
  0xaf   :  { %2105 = vtanh.f32 %v265_v3 }
  0xb4   :  { %v2505_v5 = vpop.f32.mrf.mxu2  ;;  %v267_v7 = vpop.f32.mrf.mxu0 }
  0xb5   :  { %v2106_v8 = vpop.eup %2105  ;;  %v2507_v9 = vpop.f32.mrf.mxu1  ;;  %v268_v11 = vadd.f32 %v267_v7, %v85_v63  ;;  %v323_v7 = vadd.f32 %v2505_v5, %v2526_v46 }
  0xb6   :  { %v687_v10 = vpack.c.bf16 %v2106_v8, %v2104_v6 }
  0xb7   :  { %2107 = vtanh.f32 %v268_v11 }
  0xb8   :  { %779 = vmatmul.bf16.vlgmr.msra.gmra.mxu0 %v687_v10 }
  0xbc   :  { %v2509_v12 = vpop.f32.mrf.mxu2  ;;  %v269_v13 = vpop.f32.mrf.mxu0 }
  0xbd   :  { %v270_v14 = vadd.f32 %v269_v13, %v85_v63  ;;  %v2511_v15 = vpop.f32.mrf.mxu1  ;;  %v2108_v17 = vpop.eup %2107 }
  0xbe   :  { %v349_v36 = vpop.f32.mrf.mxu3 }
  0xbf   :  { %2109 = vtanh.f32 %v270_v14 }
  0xc4   :  { %v2513_v16 = vpop.f32.mrf.mxu2  ;;  %v272_v18 = vpop.f32.mrf.mxu0 }
  0xc5   :  { %v2110_v19 = vpop.eup %2109  ;;  %v301_v20 = vpop.f32.mrf.mxu1  ;;  %v273_v23 = vadd.f32 %v272_v18, %v85_v63 }
  0xc6   :  { %v688_v21 = vpack.c.bf16 %v2110_v19, %v2108_v17  ;;  %v302_v24 = vadd.f32 %v301_v20, %v2516_v22  ;;  %v351_v48 = vpop.f32.mrf.mxu3 }
  0xc7   :  { %2111 = vtanh.f32 %v273_v23  ;;  %v352_v60 = vadd.f32 %v351_v48, %v2542_v2  ;;  %v297_v23 = vadd.f32 %v2507_v9, %v2516_v22 }
  0xc8   :  { %784 = vmatmul.bf16.vlgmr.msrb.gmra.mxu1 %v688_v21  ;;  %2113 = vtanh.f32 %v302_v24 }
  0xcc   :  { %v2519_v25 = vpop.f32.mrf.mxu2  ;;  %v274_v26 = vpop.f32.mrf.mxu0 }
  0xcd   :  { %v275_v27 = vadd.f32 %v274_v26, %v85_v63  ;;  %v303_v28 = vpop.f32.mrf.mxu1  ;;  %v2112_v30 = vpop.eup %2111 }
  0xce   :  { %v304_v29 = vadd.f32 %v303_v28, %v2516_v22  ;;  %v2114_v32 = vpop.eup %2113  ;;  %v354_v3 = vpop.f32.mrf.mxu3  ;;  %v299_v28 = vadd.f32 %v2511_v15, %v2516_v22 }
  0xcf   :  { %2115 = vtanh.f32 %v275_v27  ;;  %v326_v27 = vadd.f32 %v2509_v12, %v2526_v46  ;;  %v355_v9 = vadd.f32 %v354_v3, %v2542_v2 }
  0xd0   :  { %2117 = vtanh.f32 %v304_v29  ;;  %v328_v29 = vadd.f32 %v2513_v16, %v2526_v46 }
  0xd4   :  { %v2522_v31 = vpop.f32.mrf.mxu2  ;;  %v277_v33 = vpop.f32.mrf.mxu0 }
  0xd5   :  { %v2116_v34 = vpop.eup %2115  ;;  %v306_v35 = vpop.f32.mrf.mxu1  ;;  %v278_v40 = vadd.f32 %v277_v33, %v85_v63 }
  0xd6   :  { %v2118_v37 = vpop.eup %2117  ;;  %v689_v38 = vpack.c.bf16 %v2116_v34, %v2112_v30  ;;  %v307_v41 = vadd.f32 %v306_v35, %v2516_v22  ;;  %v356_v14 = vpop.f32.mrf.mxu3 }
  0xd7   :  { %v693_v39 = vpack.c.bf16 %v2118_v37, %v2114_v32  ;;  %2119 = vtanh.f32 %v278_v40  ;;  %v357_v15 = vadd.f32 %v356_v14, %v2542_v2 }
  0xd8   :  { %789 = vmatmul.bf16.gmra.mxu1 %v689_v38  ;;  %2121 = vtanh.f32 %v307_v41 }
  0xd9   :  { %809 = vmatmul.bf16.vlgmr.msrb.gmra.mxu2 %v693_v39 }
  0xdc   :  { %v335_v42 = vpop.f32.mrf.mxu2  ;;  %v279_v43 = vpop.f32.mrf.mxu0 }
  0xdd   :  { %v280_v44 = vadd.f32 %v279_v43, %v85_v63  ;;  %v308_v45 = vpop.f32.mrf.mxu1  ;;  %v336_v49 = vadd.f32 %v335_v42, %v2526_v46  ;;  %v2120_v50 = vpop.eup %2119  ;;  %v321_v63 = vadd.f32 %v2501_v1, %v2526_v46  ;;  %v350_v1 = vadd.f32 %v349_v36, %v2542_v2 }
  0xde   :  { %v309_v47 = vadd.f32 %v308_v45, %v2516_v22  ;;  %v2122_v52 = vpop.eup %2121  ;;  %v359_v12 = vpop.f32.mrf.mxu3  ;;  %v331_v43 = vadd.f32 %v2519_v25, %v2526_v46 }
  0xdf   :  { %2123 = vtanh.f32 %v280_v44  ;;  %v333_v44 = vadd.f32 %v2522_v31, %v2526_v46  ;;  %v360_v48 = vadd.f32 %v359_v12, %v2542_v2 }
  0xe0   :  { %2125 = vtanh.f32 %v309_v47 }
  0xe1   :  { %2127 = vtanh.f32 %v336_v49 }
  0xe4   :  { %v337_v51 = vpop.f32.mrf.mxu2  ;;  %v2531_v54 = vpop.f32.mrf.mxu0 }
  0xe5   :  { %v338_v53 = vadd.f32 %v337_v51, %v2526_v46  ;;  %v2124_v55 = vpop.eup %2123  ;;  %v495_v56 = vsel %vm494_vm0, %v2531_v54, -inf }
  0xe6   :  { %v2126_v57 = vpop.eup %2125  ;;  %496 = vmax.xlane.f32.xlu0 %v495_v56  ;;  %v690_v58 = vpack.c.bf16 %v2124_v55, %v2120_v50  ;;  %v361_v41 = vpop.f32.mrf.mxu3 }
  0xe7   :  { %2129 = vtanh.f32 %v338_v53  ;;  %v694_v61 = vpack.c.bf16 %v2126_v57, %v2122_v52  ;;  %v2128_v6 = vpop.eup %2127  ;;  %v362_v50 = vadd.f32 %v361_v41, %v2542_v2 }
  0xe8   :  { %794 = vmatmul.bf16.gmra.mxu1 %v690_v58  ;;  %2131 = vtanh.f32 %v292_v59 }
  0xe9   :  { %814 = vmatmul.bf16.gmra.mxu2 %v694_v61  ;;  %2133 = vtanh.f32 %v321_v63 }
  0xea   :  { %2135 = vtanh.f32 %v294_v0 }
  0xeb   :  { %2137 = vtanh.f32 %v323_v7 }
  0xec   :  { %v2546_v62 = vpop.f32.mrf.mxu0  ;;  %2139 = vtanh.f32 %v350_v1 }
  0xed   :  { %v2130_v8 = vpop.eup %2129  ;;  %v498_v4 = vsel %vm494_vm0, %v2546_v62, -inf  ;;  %2141 = vtanh.f32 %v352_v60 }
  0xee   :  { %v698_v10 = vpack.c.bf16 %v2130_v8, %v2128_v6  ;;  %499 = vmax.xlane.f32.xlu0 %v498_v4  ;;  %v2132_v11 = vpop.eup %2131  ;;  %2143 = vtanh.f32 %v297_v23  ;;  %v364_v25 = vpop.f32.mrf.mxu3  ;;  %v2597_v8 = vld [vmem:[%s3683_s4] ss:$0 sm:$0xff] }
  0xef   :  { %v2134_v5 = vpop.eup %2133  ;;  %2145 = vtanh.f32 %v326_v27  ;;  %v365_v61 = vadd.f32 %v364_v25, %v2542_v2 }
  0xf0   :  { %834 = vmatmul.bf16.vlgmr.msrb.gmra.mxu3 %v698_v10  ;;  %v2136_v13 = vpop.eup %2135  ;;  %2147 = vtanh.f32 %v299_v28 }
  0xf1   :  { %v2138_v17 = vpop.eup %2137  ;;  %v691_v20 = vpack.c.bf16 %v2136_v13, %v2132_v11  ;;  %2149 = vtanh.f32 %v328_v29 }
  0xf2   :  { %v2140_v21 = vpop.eup %2139  ;;  %v695_v24 = vpack.c.bf16 %v2138_v17, %v2134_v5  ;;  %2151 = vtanh.f32 %v355_v9 }
  0xf3   :  { %v2142_v26 = vpop.eup %2141  ;;  %2153 = vtanh.f32 %v357_v15 }
  0xf4   :  { %v2552_v18 = vpop.f32.mrf.mxu0  ;;  %v699_v30 = vpack.c.bf16 %v2142_v26, %v2140_v21  ;;  %v2144_v22 = vpop.eup %2143  ;;  %2155 = vtanh.f32 %v331_v43 }
  0xf5   :  { %v501_v19 = vsel %vm494_vm0, %v2552_v18, -inf  ;;  %v2146_v16 = vpop.eup %2145  ;;  %2157 = vtanh.f32 %v333_v44 }
  0xf6   :  { %502 = vmax.xlane.f32.xlu1 %v501_v19  ;;  %v2148_v34 = vpop.eup %2147  ;;  %2159 = vtanh.f32 %v360_v48  ;;  %v366_v58 = vpop.f32.mrf.mxu3 }
  0xf7   :  { %v2150_v35 = vpop.eup %2149  ;;  %v692_v38 = vpack.c.bf16 %v2148_v34, %v2144_v22  ;;  %2161 = vtanh.f32 %v362_v50  ;;  %v367_v0 = vadd.f32 %v366_v58, %v2542_v2 }
  0xf8   :  { %799 = vmatmul.bf16.gmra.mxu1 %v691_v20  ;;  %v2152_v39 = vpop.eup %2151  ;;  %v696_v40 = vpack.c.bf16 %v2150_v35, %v2146_v16  ;;  %2163 = vtanh.f32 %v365_v61 }
  0xf9   :  { %819 = vmatmul.bf16.gmra.mxu2 %v695_v24  ;;  %v2154_v42 = vpop.eup %2153  ;;  %2165 = vtanh.f32 %v367_v0 }
  0xfa   :  { %v700_v45 = vpack.c.bf16 %v2154_v42, %v2152_v39  ;;  %v2156_v51 = vpop.eup %2155 }
  0xfb   :  { %v2158_v52 = vpop.eup %2157 }
  0xfc   :  { %v2564_v32 = vpop.f32.mrf.mxu0  ;;  %v2160_v53 = vpop.eup %2159  ;;  %v697_v55 = vpack.c.bf16 %v2158_v52, %v2156_v51 }
  0xfd   :  { %v504_v33 = vsel %vm494_vm0, %v2564_v32, -inf  ;;  %v2162_v56 = vpop.eup %2161 }
  0xfe   :  { %505 = vmax.xlane.f32.xlu1 %v504_v33  ;;  %v701_v57 = vpack.c.bf16 %v2162_v56, %v2160_v53  ;;  %v2164_v3 = vpop.eup %2163 }
  0xff   :  { %v2166_v6 = vpop.eup %2165 }
 0x100   :  { %839 = vmatmul.bf16.gmra.mxu3 %v699_v30  ;;  %v702_v7 = vpack.c.bf16 %v2166_v6, %v2164_v3 }
 0x104   :  { %v2570_v36 = vpop.f32.mrf.mxu0 }
 0x105   :  { %v507_v37 = vsel %vm494_vm0, %v2570_v36, -inf }
 0x106   :  { %508 = vmax.xlane.f32.xlu2 %v507_v37 }
 0x108   :  { %804 = vmatmul.bf16.gmra.mxu1 %v692_v38 }
 0x109   :  { %824 = vmatmul.bf16.gmra.mxu2 %v696_v40 }
 0x10c   :  { %v2578_v47 = vpop.f32.mrf.mxu0 }
 0x10d   :  { %v510_v49 = vsel %vm494_vm0, %v2578_v47, -inf }
 0x10e   :  { %511 = vmax.xlane.f32.xlu2 %v510_v49 }
 0x110   :  { %844 = vmatmul.bf16.gmra.mxu3 %v700_v45 }
 0x114   :  { %v2584_v31 = vpop.f32.mrf.mxu0 }
 0x115   :  { %v513_v46 = vsel %vm494_vm0, %v2584_v31, -inf }
 0x116   :  { %514 = vmax.xlane.f32.xlu0 %v513_v46 }
 0x119   :  { %829 = vmatmul.bf16.gmra.mxu2 %v697_v55 }
 0x11c   :  { %v2588_v59 = vpop.f32.mrf.mxu0 }
 0x11d   :  { %v516_v63 = vsel %vm494_vm0, %v2588_v59, -inf }
 0x11e   :  { %517 = vmax.xlane.f32.xlu1 %v516_v63 }
 0x120   :  { %849 = vmatmul.bf16.gmra.mxu3 %v701_v57 }
 0x130   :  { %854 = vmatmul.bf16.gmra.mxu3 %v702_v7 }
 0x135   :  { %v780_v1 = vpop.f32.mrf.mxu0 }
 0x136   :  { %v2600_v10 = vadd.f32 %v2597_v8, %v780_v1 }
 0x138   :  { %860 = vmax.xlane.f32.xlu1 %v2600_v10 }
 0x13d   :  { %v782_v4 = vpop.f32.mrf.mxu0 }
 0x13e   :  { %v2604_v2 = vadd.f32 %v2597_v8, %v782_v4 }
 0x140   :  { %862 = vmax.xlane.f32.xlu2 %v2604_v2 }
 0x145   :  { %v785_v60 = vpop.f32.mrf.mxu1 }
 0x146   :  { %v2608_v11 = vadd.f32 %v2597_v8, %v785_v60 }
 0x148   :  { %864 = vmax.xlane.f32.xlu0 %v2608_v11 }
 0x14d   :  { %v787_v5 = vpop.f32.mrf.mxu1 }
 0x14e   :  { %v2612_v13 = vadd.f32 %v2597_v8, %v787_v5 }
 0x150   :  { %866 = vmax.xlane.f32.xlu1 %v2612_v13 }
 0x155   :  { %v790_v14 = vpop.f32.mrf.mxu1 }
 0x156   :  { %v2616_v17 = vadd.f32 %v2597_v8, %v790_v14 }
 0x158   :  { %868 = vmax.xlane.f32.xlu2 %v2616_v17 }
 0x159   :  { %v497_v19 = vpop.xlane.xlu0 %496 }
 0x15a   :  { %v519_v20 = vsub.f32 %v2531_v54, %v497_v19 }
 0x15c   :  { %v527_v21 = vmul.f32 1.442695, %v519_v20  ;;  %v810_v23 = vpop.f32.mrf.mxu2 }
 0x15d   :  { %v2621_v24 = vadd.f32 %v2597_v8, %v810_v23  ;;  %v792_v26 = vpop.f32.mrf.mxu1 }
 0x15e   :  { %2167 = vpow2.f32 %v527_v21  ;;  %v2624_v27 = vadd.f32 %v2597_v8, %v792_v26 }
 0x15f   :  { %884 = vmax.xlane.f32.xlu1 %v2621_v24 }
 0x160   :  { %870 = vmax.xlane.f32.xlu0 %v2624_v27 }
 0x161   :  { %v500_v28 = vpop.xlane.xlu0 %499 }
 0x162   :  { %v520_v29 = vsub.f32 %v2546_v62, %v500_v28 }
 0x164   :  { %v2629_v30 = vpop.eup %2167  ;;  %v529_v54 = vmul.f32 1.442695, %v520_v29  ;;  %v812_v9 = vpop.f32.mrf.mxu2 }
 0x165   :  { %v795_v33 = vpop.f32.mrf.mxu1  ;;  %v543_v12 = vsel %vm494_vm0, %v2629_v30, 0.0  ;;  %v2641_v62 = vadd.f32 %v2597_v8, %v812_v9 }
 0x166   :  { %2169 = vpow2.f32 %v529_v54  ;;  %v2634_v15 = vadd.f32 %v2597_v8, %v795_v33  ;;  %544 = vadd.xlane.f32.xlu2 %v543_v12 }
 0x168   :  { %872 = vmax.xlane.f32.xlu1 %v2634_v15 }
 0x169   :  { %v503_v22 = vpop.xlane.xlu1 %502 }
 0x16a   :  { %v521_v16 = vsub.f32 %v2552_v18, %v503_v22 }
 0x16c   :  { %v2638_v34 = vpop.eup %2169  ;;  %v531_v35 = vmul.f32 1.442695, %v521_v16  ;;  %v815_v37 = vpop.f32.mrf.mxu2 }
 0x16d   :  { %v797_v38 = vpop.f32.mrf.mxu1  ;;  %v546_v39 = vsel %vm494_vm0, %v2638_v34, 0.0  ;;  %v2647_v41 = vadd.f32 %v2597_v8, %v815_v37 }
 0x16e   :  { %2171 = vpow2.f32 %v531_v35  ;;  %547 = vadd.xlane.f32.xlu0 %v546_v39  ;;  %886 = vmax.xlane.f32.xlu2 %v2641_v62  ;;  %v2652_v43 = vadd.f32 %v2597_v8, %v797_v38 }
 0x171   :  { %v506_v40 = vpop.xlane.xlu1 %505 }
 0x172   :  { %v522_v44 = vsub.f32 %v2564_v32, %v506_v40 }
 0x173   :  { %v835_v18 = vpop.f32.mrf.mxu3 }
 0x174   :  { %v2649_v42 = vpop.eup %2171  ;;  %v817_v45 = vpop.f32.mrf.mxu2  ;;  %v533_v50 = vmul.f32 1.442695, %v522_v44  ;;  %v2660_v52 = vadd.f32 %v2597_v8, %v835_v18 }
 0x175   :  { %v549_v48 = vsel %vm494_vm0, %v2649_v42, 0.0  ;;  %v800_v49 = vpop.f32.mrf.mxu1  ;;  %v2667_v55 = vadd.f32 %v2597_v8, %v817_v45 }
 0x176   :  { %888 = vmax.xlane.f32.xlu0 %v2647_v41  ;;  %874 = vmax.xlane.f32.xlu2 %v2652_v43  ;;  %2173 = vpow2.f32 %v533_v50  ;;  %v2663_v46 = vadd.f32 %v2597_v8, %v800_v49 }
 0x177   :  { %550 = vadd.xlane.f32.xlu1 %v549_v48 }
 0x179   :  { %v509_v25 = vpop.xlane.xlu2 %508 }
 0x17a   :  { %v523_v32 = vsub.f32 %v2570_v36, %v509_v25 }
 0x17b   :  { %v837_v51 = vpop.f32.mrf.mxu3 }
 0x17c   :  { %v820_v53 = vpop.f32.mrf.mxu2  ;;  %v535_v56 = vmul.f32 1.442695, %v523_v32  ;;  %v2672_v58 = vpop.eup %2173  ;;  %v2675_v0 = vadd.f32 %v2597_v8, %v837_v51 }
 0x17d   :  { %v802_v57 = vpop.f32.mrf.mxu1  ;;  %v552_v7 = vsel %vm494_vm0, %v2672_v58, 0.0  ;;  %v2691_v14 = vadd.f32 %v2597_v8, %v820_v53 }
 0x17e   :  { %876 = vmax.xlane.f32.xlu0 %v2663_v46  ;;  %904 = vmax.xlane.f32.xlu2 %v2660_v52  ;;  %2175 = vpow2.f32 %v535_v56  ;;  %v2678_v3 = vadd.f32 %v2597_v8, %v802_v57 }
 0x17f   :  { %890 = vmax.xlane.f32.xlu1 %v2667_v55 }
 0x181   :  { %v512_v61 = vpop.xlane.xlu2 %511 }
 0x182   :  { %v524_v6 = vsub.f32 %v2578_v47, %v512_v61 }
 0x183   :  { %v840_v63 = vpop.f32.mrf.mxu3 }
 0x184   :  { %v822_v36 = vpop.f32.mrf.mxu2  ;;  %v537_v1 = vmul.f32 1.442695, %v524_v6  ;;  %v2685_v4 = vpop.eup %2175  ;;  %v2688_v5 = vadd.f32 %v2597_v8, %v840_v63 }
 0x185   :  { %v555_v47 = vsel %vm494_vm0, %v2685_v4, 0.0  ;;  %v805_v20 = vpop.f32.mrf.mxu1  ;;  %v2700_v28 = vadd.f32 %v2597_v8, %v822_v36 }
 0x186   :  { %906 = vmax.xlane.f32.xlu0 %v2675_v0  ;;  %553 = vadd.xlane.f32.xlu2 %v552_v7  ;;  %2177 = vpow2.f32 %v537_v1  ;;  %v2703_v29 = vadd.f32 %v2597_v8, %v805_v20 }
 0x187   :  { %878 = vmax.xlane.f32.xlu1 %v2678_v3 }
 0x189   :  { %v515_v21 = vpop.xlane.xlu0 %514 }
 0x18a   :  { %v525_v54 = vsub.f32 %v2584_v31, %v515_v21 }
 0x18b   :  { %v842_v60 = vpop.f32.mrf.mxu3 }
 0x18c   :  { %v825_v19 = vpop.f32.mrf.mxu2  ;;  %v2697_v26 = vpop.eup %2177  ;;  %v539_v12 = vmul.f32 1.442695, %v525_v54  ;;  %v2711_v35 = vadd.f32 %v2597_v8, %v842_v60 }
 0x18d   :  { %v558_v33 = vsel %vm494_vm0, %v2697_v26, 0.0  ;;  %v807_v22 = vpop.f32.mrf.mxu1  ;;  %v2718_v39 = vadd.f32 %v2597_v8, %v825_v19 }
 0x18e   :  { %556 = vadd.xlane.f32.xlu0 %v555_v47  ;;  %892 = vmax.xlane.f32.xlu2 %v2691_v14  ;;  %2179 = vpow2.f32 %v539_v12  ;;  %v2714_v38 = vadd.f32 %v2597_v8, %v807_v22 }
 0x18f   :  { %908 = vmax.xlane.f32.xlu1 %v2688_v5 }
 0x191   :  { %v518_v16 = vpop.xlane.xlu1 %517 }
 0x192   :  { %v526_v31 = vsub.f32 %v2588_v59, %v518_v16 }
 0x193   :  { %v845_v23 = vpop.f32.mrf.mxu3 }
 0x194   :  { %v827_v9 = vpop.f32.mrf.mxu2  ;;  %v541_v40 = vmul.f32 1.442695, %v526_v31  ;;  %v2723_v44 = vpop.eup %2179  ;;  %v2726_v45 = vadd.f32 %v2597_v8, %v845_v23 }
 0x195   :  { %v561_v59 = vsel %vm494_vm0, %v2723_v44, 0.0  ;;  %v2738_v32 = vadd.f32 %v2597_v8, %v827_v9 }
 0x196   :  { %894 = vmax.xlane.f32.xlu0 %v2700_v28  ;;  %880 = vmax.xlane.f32.xlu2 %v2703_v29  ;;  %2181 = vpow2.f32 %v541_v40 }
 0x197   :  { %559 = vadd.xlane.f32.xlu1 %v558_v33 }
 0x19b   :  { %v847_v37 = vpop.f32.mrf.mxu3 }
 0x19c   :  { %v830_v18 = vpop.f32.mrf.mxu2  ;;  %v2729_v49 = vadd.f32 %v2597_v8, %v847_v37  ;;  %v2735_v50 = vpop.eup %2181 }
 0x19d   :  { %3719 = vst [vmem:[#allocation5_spill] sm:$0xff] %v2735_v50  ;;  %v564_v56 = vsel %vm494_vm0, %v2735_v50, 0.0  ;;  %v2754_v6 = vadd.f32 %v2597_v8, %v830_v18 }
 0x19e   :  { %882 = vmax.xlane.f32.xlu0 %v2714_v38  ;;  %910 = vmax.xlane.f32.xlu2 %v2711_v35 }
 0x19f   :  { %896 = vmax.xlane.f32.xlu1 %v2718_v39 }
 0x1a3   :  { %v850_v48 = vpop.f32.mrf.mxu3 }
 0x1a4   :  { %v832_v25 = vpop.f32.mrf.mxu2  ;;  %v2748_v57 = vadd.f32 %v2597_v8, %v850_v48 }
 0x1a5   :  { %v2741_v53 = vadd.f32 %v2597_v8, %v832_v25 }
 0x1a6   :  { %912 = vmax.xlane.f32.xlu0 %v2726_v45  ;;  %562 = vadd.xlane.f32.xlu2 %v561_v59 }
 0x1a7   :  { %914 = vmax.xlane.f32.xlu1 %v2729_v49 }
 0x1ab   :  { %v852_v51 = vpop.f32.mrf.mxu3  ;;  %v861_v7 = vpop.xlane.xlu1 %860 }
 0x1ac   :  { %v924_v19 = vsub.f32 %v2600_v10, %v861_v7  ;;  %v2762_v47 = vadd.f32 %v2597_v8, %v852_v51  ;;  %v3690_v7 = vmov 1  }
 0x1ad   :  { %2073 = vset.pattern.permute.xlu0 %v3690_v7 }
 0x1ae   :  { %565 = vadd.xlane.f32.xlu0 %v564_v56  ;;  %898 = vmax.xlane.f32.xlu2 %v2738_v32  ;;  %3720 = vst [vmem:[#allocation6_spill] sm:$0xff] %v2762_v47  ;;  %v956_v21 = vmul.f32 1.442695, %v924_v19 }
 0x1af   :  { %902 = vmax.xlane.f32.xlu1 %v2741_v53 }
 0x1b3   :  { %v855_v61 = vpop.f32.mrf.mxu3  ;;  %v863_v36 = vpop.xlane.xlu2 %862 }
 0x1b4   :  { %v2751_v63 = vadd.f32 %v2597_v8, %v855_v61  ;;  %v925_v1 = vsub.f32 %v2604_v2, %v863_v36 }
 0x1b6   :  { %v958_v60 = vmul.f32 1.442695, %v925_v1  ;;  %900 = vmax.xlane.f32.xlu0 %v2754_v6  ;;  %916 = vmax.xlane.f32.xlu2 %v2748_v57 }
 0x1b7   :  { %920 = vmax.xlane.f32.xlu1 %v2751_v63 }
 0x1b8   :  { %2183 = vpow2.f32 %v958_v60 }
 0x1b9   :  { %2185 = vpow2.f32 %v956_v21 }
 0x1bb   :  { %v857_v20 = vpop.f32.mrf.mxu3  ;;  %v865_v54 = vpop.xlane.xlu0 %864 }
 0x1bc   :  { %v2765_v23 = vadd.f32 %v2597_v8, %v857_v20  ;;  %v926_v2 = vsub.f32 %v2608_v11, %v865_v54 }
 0x1be   :  { %3721 = vst [vmem:[#allocation7_spill] sm:$0xff] %v2765_v23  ;;  %v2768_v9 = vpop.eup %2183  ;;  %v960_v33 = vmul.f32 1.442695, %v926_v2  ;;  %918 = vmax.xlane.f32.xlu0 %v2762_v47  ;;  %922 = vmax.xlane.f32.xlu2 %v2765_v23 }
 0x1bf   :  { %1022 = vadd.xlane.f32.xlu1 %v2768_v9  ;;  %v2774_v22 = vpop.eup %2185 }
 0x1c0   :  { %2187 = vpow2.f32 %v960_v33 }
 0x1c3   :  { %v867_v10 = vpop.xlane.xlu1 %866 }
 0x1c4   :  { %v927_v12 = vsub.f32 %v2612_v13, %v867_v10 }
 0x1c6   :  { %v2776_v8 = vpop.eup %2187  ;;  %v962_v16 = vmul.f32 1.442695, %v927_v12  ;;  %1020 = vadd.xlane.f32.xlu0 %v2774_v22 }
 0x1c7   :  { %1024 = vadd.xlane.f32.xlu2 %v2776_v8 }
 0x1c8   :  { %2189 = vpow2.f32 %v962_v16 }
 0x1cb   :  { %v869_v11 = vpop.xlane.xlu2 %868 }
 0x1cc   :  { %v928_v37 = vsub.f32 %v2616_v17, %v869_v11 }
 0x1ce   :  { %v2781_v31 = vpop.eup %2189  ;;  %v964_v40 = vmul.f32 1.442695, %v928_v37 }
 0x1cf   :  { %3722 = vst [vmem:[#allocation8_spill] sm:$0xff] %v2781_v31  ;;  %1026 = vadd.xlane.f32.xlu0 %v2781_v31 }
 0x1d0   :  { %2191 = vpow2.f32 %v964_v40 }
 0x1d2   :  { %v885_v13 = vpop.xlane.xlu1 %884 }
 0x1d3   :  { %v936_v18 = vsub.f32 %v2621_v24, %v885_v13  ;;  %v871_v48 = vpop.xlane.xlu0 %870 }
 0x1d4   :  { %v929_v59 = vsub.f32 %v2624_v27, %v871_v48 }
 0x1d5   :  { %v980_v25 = vmul.f32 1.442695, %v936_v18 }
 0x1d6   :  { %v2786_v51 = vpop.eup %2191  ;;  %v966_v56 = vmul.f32 1.442695, %v929_v59 }
 0x1d7   :  { %2193 = vpow2.f32 %v980_v25  ;;  %1028 = vadd.xlane.f32.xlu1 %v2786_v51 }
 0x1d8   :  { %2195 = vpow2.f32 %v966_v56 }
 0x1d9   :  { %v545_v17 = vpop.xlane.xlu2 %544 }
 0x1da   :  { %2197 = vrcp.f32 %v545_v17  ;;  %v578_v59 = vand.u32 2147483648, %v545_v17  ;;  %vm572_vm2 = vweird.f32 %v545_v17 }
 0x1db   :  { %v873_v61 = vpop.xlane.xlu1 %872 }
 0x1dc   :  { %v930_v36 = vsub.f32 %v2634_v15, %v873_v61 }
 0x1dd   :  { %v2791_v24 = vpop.eup %2193 }
 0x1de   :  { %v2793_v1 = vpop.eup %2195  ;;  %v968_v27 = vmul.f32 1.442695, %v930_v36  ;;  %1044 = vadd.xlane.f32.xlu0 %v2791_v24 }
 0x1df   :  { %3723 = vst [vmem:[#allocation9_spill] sm:$0xff] %v2793_v1  ;;  %1030 = vadd.xlane.f32.xlu2 %v2793_v1 }
 0x1e0   :  { %v2198_v60 = vpop.eup %2197  ;;  %2199 = vpow2.f32 %v968_v27  ;;  %v579_v27 = vor.u32 1.1754944e-38, %v578_v59 }
 0x1e1   :  { %v2797_v19 = vpop.xlane.xlu0 %547  ;;  %v887_v20 = vpop.xlane.xlu2 %886  ;;  %v568_v21 = vmul.f32 %v2198_v60, %v545_v17  ;;  %vm573_vm1 = vweird.f32 %v2198_v60 }
 0x1e2   :  { %v937_v15 = vsub.f32 %v2641_v62, %v887_v20  ;;  %v3688_v62 = vmov 0   ;;  %vm574_vm3 = vmor %vm572_vm2, %vm573_vm1  ;;  %vm587_vm6 = vweird.f32 %v2797_v19 }
 0x1e3   :  { %v569_v33 = vsub.f32 1.0, %v568_v21  ;;  %2072 = vset.pattern.permute.xlu2 %v3688_v62  ;;  %2080 = vset.pattern.permute.xlu1 %v3688_v62 }
 0x1e4   :  { %v982_v54 = vmul.f32 1.442695, %v937_v15 }
 0x1e5   :  { %v570_v37 = vmul.f32 %v2198_v60, %v569_v33 }
 0x1e6   :  { %v2800_v2 = vpop.eup %2199  ;;  %2201 = vpow2.f32 %v982_v54 }
 0x1e7   :  { %3724 = vst [vmem:[#allocation10_spill] sm:$0xff] %v2800_v2  ;;  %1032 = vadd.xlane.f32.xlu0 %v2800_v2  ;;  %v571_v48 = vadd.f32 %v2198_v60, %v570_v37 }
 0x1e9   :  { %v889_v10 = vpop.xlane.xlu0 %888  ;;  %v875_v12 = vpop.xlane.xlu2 %874  ;;  %v575_v61 = vsel %vm574_vm3, %v2198_v60, %v571_v48 }
 0x1ea   :  { %v938_v16 = vsub.f32 %v2647_v41, %v889_v10  ;;  %v931_v11 = vsub.f32 %v2652_v43, %v875_v12  ;;  %v576_v41 = vand.u32 2147483647, %v545_v17 }
 0x1ec   :  { %v984_v40 = vmul.f32 1.442695, %v938_v16  ;;  %v970_v13 = vmul.f32 1.442695, %v931_v11  ;;  %v2805_v18 = vpop.eup %2201  ;;  %vm577_vm4 = vcmp.eq.f32.partialorder %v576_v41, 8.507059e+37  ;;  %v551_v11 = vpop.xlane.xlu1 %550  ;;  %v593_v41 = vand.u32 2147483648, %v2797_v19 }
 0x1ed   :  { %1046 = vadd.xlane.f32.xlu1 %v2805_v18  ;;  %v580_v17 = vsel %vm577_vm4, %v579_v27, %v575_v61  ;;  %vm602_vm10 = vweird.f32 %v551_v11 }
 0x1ee   :  { %2203 = vpow2.f32 %v984_v40  ;;  %v3686_v40 = vmov 2  }
 0x1ef   :  { %2205 = vpow2.f32 %v970_v13 }
 0x1f0   :  { %2207 = vrcp.f32 %v2797_v19 }
 0x1f1   :  { %v905_v43 = vpop.xlane.xlu2 %904  ;;  %v2811_v56 = vpop.xlane.xlu0 %876 }
 0x1f2   :  { %v946_v25 = vsub.f32 %v2660_v52, %v905_v43  ;;  %v581_v52 = vmul.f32 %v2629_v30, %v580_v17 }
 0x1f4   :  { %v2813_v36 = vpop.eup %2203  ;;  %v1000_v20 = vmul.f32 1.442695, %v946_v25  ;;  %v591_v25 = vand.u32 2147483647, %v2797_v19 }
 0x1f5   :  { %3725 = vst [vmem:[#allocation11_spill] sm:$0xff] %v2813_v36  ;;  %v2815_v21 = vpop.eup %2205  ;;  %1048 = vadd.xlane.f32.xlu2 %v2813_v36 }
 0x1f6   :  { %3726 = vst [vmem:[#allocation12_spill] sm:$0xff] %v2815_v21  ;;  %1034 = vadd.xlane.f32.xlu1 %v2815_v21  ;;  %2209 = vpow2.f32 %v1000_v20  ;;  %v2208_v60 = vpop.eup %2207  ;;  %v594_v20 = vor.u32 1.1754944e-38, %v593_v41  ;;  %vm592_vm8 = vcmp.eq.f32.partialorder %v591_v25, 8.507059e+37  ;;  %v606_v41 = vand.u32 2147483647, %v551_v11 }
 0x1f7   :  { %v583_v10 = vmul.f32 %v2208_v60, %v2797_v19  ;;  %2211 = vrcp.f32 %v551_v11  ;;  %vm588_vm5 = vweird.f32 %v2208_v60  ;;  %v3732_v21 = vmov 1  }
 0x1f8   :  { %vm589_vm7 = vmor %vm587_vm6, %vm588_vm5  ;;  %vm607_vm12 = vcmp.eq.f32.partialorder %v606_v41, 8.507059e+37 }
 0x1f9   :  { %v2820_v15 = vpop.xlane.xlu2 %553  ;;  %v2825_v33 = vpop.xlane.xlu0 %906  ;;  %v584_v16 = vsub.f32 1.0, %v583_v10 }
 0x1fa   :  { %vm617_vm2 = vweird.f32 %v2820_v15 }
 0x1fb   :  { %1621 = vperm.xlu0 %2073, %v581_v52   ;;  %v585_v13 = vmul.f32 %v2208_v60, %v584_v16 }
 0x1fc   :  { %v2823_v54 = vpop.eup %2209 }
 0x1fd   :  { %3727 = vst [vmem:[#allocation13_spill] sm:$0xff] %v2823_v54  ;;  %v586_v59 = vadd.f32 %v2208_v60, %v585_v13  ;;  %v2212_v43 = vpop.eup %2211 }
 0x1fe   :  { %1064 = vadd.xlane.f32.xlu1 %v2823_v54  ;;  %v598_v17 = vmul.f32 %v2212_v43, %v551_v11  ;;  %vm603_vm9 = vweird.f32 %v2212_v43 }
 0x1ff   :  { %v590_v27 = vsel %vm589_vm7, %v2208_v60, %v586_v59  ;;  %v608_v60 = vand.u32 2147483648, %v551_v11  ;;  %vm604_vm11 = vmor %vm602_vm10, %vm603_vm9 }
 0x200   :  { %v599_v16 = vsub.f32 1.0, %v598_v17 }
 0x201   :  { %v893_v12 = vpop.xlane.xlu2 %892  ;;  %v2831_v48 = vpop.xlane.xlu0 %556 }
 0x202   :  { %v940_v37 = vsub.f32 %v2691_v14, %v893_v12  ;;  %v3695_v14 = vmov 3   ;;  %v595_v12 = vsel %vm592_vm8, %v594_v20, %v590_v27  ;;  %v609_v27 = vor.u32 1.1754944e-38, %v608_v60 }
 0x203   :  { %2074 = vset.pattern.permute.xlu0 %v3686_v40  ;;  %v596_v19 = vmul.f32 %v2638_v34, %v595_v12  ;;  %vm632_vm6 = vweird.f32 %v2831_v48 }
 0x204   :  { %1669 = vperm.xlu0 %2074, %v581_v52   ;;  %v988_v30 = vmul.f32 1.442695, %v940_v37  ;;  %v891_v37 = vpop.xlane.xlu1 %890 }
 0x205   :  { %v939_v11 = vsub.f32 %v2667_v55, %v891_v37  ;;  %v3730_v55 = vmov 2  }
 0x206   :  { %2213 = vpow2.f32 %v988_v30  ;;  %v600_v30 = vmul.f32 %v2212_v43, %v599_v16 }
 0x209   :  { %v2840_v10 = vpop.xlane.xlu0 %894  ;;  %v2847_v59 = vpop.xlane.xlu2 %880 }
 0x20c   :  { %2075 = vset.pattern.permute.xlu0 %v3695_v14  ;;  %v2837_v61 = vpop.eup %2213  ;;  %v2850_v34 = vpop.xlane.xlu1 %878 }
 0x20d   :  { %1566 = vperm.xlu2 %2072, %v581_v52   ;;  %1717 = vperm.xlu0 %2075, %v581_v52   ;;  %v601_v52 = vadd.f32 %v2212_v43, %v600_v30 }
 0x20e   :  { %1052 = vadd.xlane.f32.xlu1 %v2837_v61 }
 0x20f   :  { %v605_v25 = vsel %vm604_vm11, %v2212_v43, %v601_v52 }
 0x210   :  { %v610_v20 = vsel %vm607_vm12, %v609_v27, %v605_v25 }
 0x211   :  { %v2845_v13 = vpop.xlane.xlu0 %882  ;;  %v611_v12 = vmul.f32 %v2649_v42, %v610_v20  ;;  %v2855_v16 = vpop.xlane.xlu2 %910  ;;  %v3728_v42 = vmov 0  }
 0x214   :  { %v2859_v30 = vpop.xlane.xlu1 %908 }
 0x215   :  { %2077 = vset.pattern.permute.xlu2 %v3690_v7  ;;  %2076 = vset.pattern.permute.xlu0 %v3688_v62 }
 0x216   :  { %1625 = vperm.xlu2 %2077, %v596_v19  }
 0x219   :  { %v2852_v17 = vpop.xlane.xlu0 %912  ;;  %v2864_v43 = vpop.xlane.xlu2 %562 }
 0x21c   :  { %v2867_v52 = vpop.xlane.xlu1 %559 }
 0x21d   :  { %vm647_vm11 = vweird.f32 %v2867_v52 }
 0x21e   :  { %2078 = vset.pattern.permute.xlu2 %v3686_v40  ;;  %v986_v40 = vmul.f32 1.442695, %v939_v11 }
 0x21f   :  { %1673 = vperm.xlu2 %2078, %v596_v19  }
 0x220   :  { %2215 = vpow2.f32 %v986_v40  ;;  %v932_v40 = vsub.f32 %v2663_v46, %v2811_v56 }
 0x221   :  { %v2861_v62 = vpop.xlane.xlu0 %565  ;;  %v2875_v41 = vpop.xlane.xlu2 %898 }
 0x222   :  { %v972_v11 = vmul.f32 1.442695, %v932_v40 }
 0x224   :  { %v2877_v25 = vpop.xlane.xlu1 %896  ;;  %2217 = vpow2.f32 %v972_v11 }
 0x226   :  { %v2869_v60 = vpop.eup %2215 }
 0x227   :  { %1576 = vperm.xlu1 %2080, %v611_v12   ;;  %2079 = vset.pattern.permute.xlu2 %v3695_v14  ;;  %3729 = vst [vmem:[#allocation14_spill] sm:$0xff] %v2869_v60 }
 0x228   :  { %1721 = vperm.xlu2 %2079, %v596_v19  }
 0x229   :  { %v2873_v37 = vpop.xlane.xlu0 %900  ;;  %v2884_v20 = vpop.xlane.xlu2 %916 }
 0x22a   :  { %v2893_v46 = vpop.eup %2217 }
 0x22f   :  { %2081 = vset.pattern.permute.xlu1 %v3690_v7  ;;  %v2886_v7 = vpop.xlane.xlu1 %914 }
 0x230   :  { %1629 = vperm.xlu1 %2081, %v611_v12   ;;  %2084 = vset.pattern.permute.xlu2 %v3728_v42 }
 0x231   :  { %v2882_v27 = vpop.xlane.xlu0 %918  ;;  %v2891_v36 = vpop.xlane.xlu2 %922 }
 0x232   :  { %3731 = vst [vmem:[#allocation15_spill] sm:$0xff] %v2882_v27 }
 0x233   :  { %3733 = vst [vmem:[#allocation16_spill] sm:$0xff] %v2891_v36 }
 0x237   :  { %1050 = vadd.xlane.f32.xlu0 %v2869_v60  ;;  %v947_v60 = vsub.f32 %v2675_v0, %v2825_v33  ;;  %v2895_v56 = vpop.xlane.xlu1 %902 }
 0x238   :  { %2082 = vset.pattern.permute.xlu1 %v3730_v55 }
 0x239   :  { %1677 = vperm.xlu1 %2082, %v611_v12   ;;  %v1021_v54 = vpop.xlane.xlu0 %1020 }
 0x23a   :  { %2219 = vrcp.f32 %v1021_v54  ;;  %vm1089_vm14 = vweird.f32 %v1021_v54 }
 0x23f   :  { %v2907_v11 = vpop.xlane.xlu1 %920 }
 0x240   :  { %v2220_v0 = vpop.eup %2219 }
 0x241   :  { %2083 = vset.pattern.permute.xlu1 %v3695_v14  ;;  %v1002_v14 = vmul.f32 1.442695, %v947_v60  ;;  %v2904_v60 = vpop.xlane.xlu2 %1024  ;;  %v1085_v40 = vmul.f32 %v2220_v0, %v1021_v54  ;;  %vm1090_vm13 = vweird.f32 %v2220_v0 }
 0x242   :  { %1725 = vperm.xlu1 %2083, %v611_v12   ;;  %v941_v12 = vsub.f32 %v2700_v28, %v2840_v10  ;;  %v934_v28 = vsub.f32 %v2703_v29, %v2847_v59  ;;  %v933_v29 = vsub.f32 %v2678_v3, %v2850_v34  ;;  %v1095_v59 = vand.u32 2147483648, %v1021_v54  ;;  %vm1091_vm15 = vmor %vm1089_vm14, %vm1090_vm13 }
 0x243   :  { %2221 = vpow2.f32 %v1002_v14  ;;  %v1086_v10 = vsub.f32 1.0, %v1085_v40  ;;  %v1093_v40 = vand.u32 2147483647, %v1021_v54  ;;  %v623_v54 = vand.u32 2147483648, %v2820_v15 }
 0x244   :  { %v990_v33 = vmul.f32 1.442695, %v941_v12  ;;  %2223 = vrcp.f32 %v2820_v15  ;;  %v976_v31 = vmul.f32 1.442695, %v934_v28  ;;  %v1096_v47 = vor.u32 1.1754944e-38, %v1095_v59 }
 0x245   :  { %v1087_v23 = vmul.f32 %v2220_v0, %v1086_v10  ;;  %vm1094_vm0 = vcmp.eq.f32.partialorder %v1093_v40, 8.507059e+37  ;;  %vm1119_vm13 = vweird.f32 %v2904_v60 }
 0x246   :  { %2225 = vpow2.f32 %v990_v33  ;;  %v949_v33 = vsub.f32 %v2711_v35, %v2855_v16 }
 0x247   :  { %2227 = vpow2.f32 %v976_v31  ;;  %v1088_v50 = vadd.f32 %v2220_v0, %v1087_v23  ;;  %v974_v31 = vmul.f32 1.442695, %v933_v29  ;;  %v624_v29 = vor.u32 1.1754944e-38, %v623_v54 }
 0x248   :  { %v1006_v10 = vmul.f32 1.442695, %v949_v33  ;;  %2229 = vrcp.f32 %v2831_v48 }
 0x24a   :  { %2089 = vset.pattern.permute.xlu1 %v3732_v21  ;;  %2231 = vpow2.f32 %v1006_v10 }
 0x24b   :  { %1571 = vperm.xlu0 %2076, %v596_v19   ;;  %v2902_v19 = vpop.eup %2221  ;;  %2233 = vpow2.f32 %v974_v31 }
 0x24c   :  { %3734 = vst [vmem:[#allocation17_spill] sm:$0xff] %v2902_v19  ;;  %v2224_v14 = vpop.eup %2223 }
 0x24d   :  { %v2911_v2 = vpop.eup %2225  ;;  %v613_v12 = vmul.f32 %v2224_v14, %v2820_v15  ;;  %vm618_vm1 = vweird.f32 %v2224_v14 }
 0x24e   :  { %v2925_v27 = vpop.eup %2227  ;;  %vm619_vm3 = vmor %vm617_vm2, %vm618_vm1  ;;  %vm662_vm2 = vweird.f32 %v2864_v43 }
 0x24f   :  { %v614_v36 = vsub.f32 1.0, %v613_v12  ;;  %v1092_v12 = vsel %vm1091_vm15, %v2220_v0, %v1088_v50  ;;  %v948_v50 = vsub.f32 %v2688_v5, %v2859_v30  ;;  %v2230_v33 = vpop.eup %2229 }
 0x250   :  { %v1097_v35 = vsel %vm1094_vm0, %v1096_v47, %v1092_v12  ;;  %v2939_v40 = vpop.eup %2231  ;;  %vm633_vm5 = vweird.f32 %v2230_v33 }
 0x251   :  { %1036 = vadd.xlane.f32.xlu2 %v2893_v46  ;;  %v615_v28 = vmul.f32 %v2224_v14, %v614_v36  ;;  %v621_v36 = vand.u32 2147483647, %v2820_v15  ;;  %v1098_v34 = vmul.f32 %v2774_v22, %v1097_v35  ;;  %v1004_v59 = vmul.f32 1.442695, %v948_v50  ;;  %vm634_vm7 = vmor %vm632_vm6, %vm633_vm5 }
 0x252   :  { %v2914_v1 = vpop.xlane.xlu2 %1030  ;;  %v628_v15 = vmul.f32 %v2230_v33, %v2831_v48  ;;  %v942_v22 = vsub.f32 %v2718_v39, %v2877_v25  ;;  %v638_v25 = vand.u32 2147483648, %v2831_v48 }
 0x253   :  { %2093 = vset.pattern.permute.xlu0 %v3732_v21  ;;  %3735 = vst [vmem:[#allocation18_spill] sm:$0xff] %v2914_v1  ;;  %v616_v3 = vadd.f32 %v2224_v14, %v615_v28  ;;  %vm622_vm4 = vcmp.eq.f32.partialorder %v621_v36, 8.507059e+37  ;;  %v2941_v28 = vpop.eup %2233  ;;  %2235 = vpow2.f32 %v1004_v59 }
 0x254   :  { %2237 = vrcp.f32 %v2867_v52  ;;  %v629_v10 = vsub.f32 1.0, %v628_v15  ;;  %v992_v12 = vmul.f32 1.442695, %v942_v22  ;;  %v639_v59 = vor.u32 1.1754944e-38, %v638_v25 }
 0x255   :  { %v620_v0 = vsel %vm619_vm3, %v2224_v14, %v616_v3  ;;  %2239 = vrcp.f32 %v2904_v60  ;;  %v1123_v25 = vand.u32 2147483647, %v2904_v60 }
 0x256   :  { %v625_v5 = vsel %vm622_vm4, %v624_v29, %v620_v0  ;;  %v630_v35 = vmul.f32 %v2230_v33, %v629_v10  ;;  %2241 = vpow2.f32 %v992_v12 }
 0x257   :  { %v626_v14 = vmul.f32 %v2672_v58, %v625_v5  ;;  %vm1124_vm0 = vcmp.eq.f32.partialorder %v1123_v25, 8.507059e+37 }
 0x258   :  { %v631_v39 = vadd.f32 %v2230_v33, %v630_v35 }
 0x259   :  { %1066 = vadd.xlane.f32.xlu2 %v2902_v19  ;;  %v2919_v19 = vpop.xlane.xlu1 %1022  ;;  %v2953_v31 = vpop.eup %2235 }
 0x25a   :  { %v2238_v3 = vpop.eup %2237  ;;  %v635_v29 = vsel %vm634_vm7, %v2230_v33, %v631_v39  ;;  %v651_v33 = vand.u32 2147483647, %v2867_v52  ;;  %v1125_v39 = vand.u32 2147483648, %v2904_v60  ;;  %vm1104_vm4 = vweird.f32 %v2919_v19 }
 0x25b   :  { %v2240_v54 = vpop.eup %2239  ;;  %v643_v58 = vmul.f32 %v2238_v3, %v2867_v52  ;;  %vm648_vm9 = vweird.f32 %v2238_v3 }
 0x25c   :  { %v1115_v36 = vmul.f32 %v2240_v54, %v2904_v60  ;;  %vm1120_vm10 = vweird.f32 %v2240_v54  ;;  %vm649_vm12 = vmor %vm647_vm11, %vm648_vm9  ;;  %vm652_vm15 = vcmp.eq.f32.partialorder %v651_v33, 8.507059e+37 }
 0x25d   :  { %v644_v0 = vsub.f32 1.0, %v643_v58  ;;  %v653_v58 = vand.u32 2147483648, %v2867_v52  ;;  %vm1121_vm14 = vmor %vm1119_vm13, %vm1120_vm10 }
 0x25e   :  { %v1116_v5 = vsub.f32 1.0, %v1115_v36 }
 0x25f   :  { %v645_v22 = vmul.f32 %v2238_v3, %v644_v0 }
 0x260   :  { %v1117_v12 = vmul.f32 %v2240_v54, %v1116_v5 }
 0x261   :  { %1054 = vadd.xlane.f32.xlu2 %v2911_v2  ;;  %v2929_v23 = vpop.xlane.xlu1 %1028  ;;  %v646_v35 = vadd.f32 %v2238_v3, %v645_v22 }
 0x268   :  { %v2923_v1 = vpop.xlane.xlu2 %1048 }
 0x269   :  { %3736 = vst [vmem:[#allocation19_spill] sm:$0xff] %v2923_v1  ;;  %v2945_v30 = vpop.xlane.xlu1 %1046 }
 0x26c   :  { %1040 = vadd.xlane.f32.xlu1 %v2925_v27 }
 0x270   :  { %v1567_v16 = vpop.permute.xlu2 %1566 }
 0x271   :  { %v2937_v47 = vmul.f32 %v1567_v16, %v1098_v34  ;;  %v2956_v50 = vpop.xlane.xlu1 %1034  ;;  %v636_v34 = vand.u32 2147483647, %v2831_v48  ;;  %v2964_v16 = vpop.eup %2241 }
 0x272   :  { %3737 = vst [vmem:[#allocation20_spill] sm:$0xff] %v2956_v50  ;;  %v1118_v50 = vadd.f32 %v2240_v54, %v1117_v12  ;;  %v935_v12 = vsub.f32 %v2714_v38, %v2845_v13  ;;  %v944_v13 = vsub.f32 %v2754_v6, %v2873_v37 }
 0x273   :  { %3738 = vst [vmem:[#allocation21_spill] sm:$0xff] %v2964_v16  ;;  %vm637_vm8 = vcmp.eq.f32.partialorder %v636_v34, 8.507059e+37  ;;  %v654_v34 = vor.u32 1.1754944e-38, %v653_v58 }
 0x274   :  { %1070 = vadd.xlane.f32.xlu1 %v2939_v40  ;;  %v640_v15 = vsel %vm637_vm8, %v639_v59, %v635_v29  ;;  %v1122_v0 = vsel %vm1121_vm14, %v2240_v54, %v1118_v50  ;;  %v3740_v29 = vmov 3   ;;  %v1126_v59 = vor.u32 1.1754944e-38, %v1125_v39 }
 0x275   :  { %1038 = vadd.xlane.f32.xlu0 %v2941_v28  ;;  %v641_v48 = vmul.f32 %v2685_v4, %v640_v15  ;;  %v650_v4 = vsel %vm649_vm12, %v2238_v3, %v646_v35  ;;  %v978_v35 = vmul.f32 1.442695, %v935_v12  ;;  %v950_v39 = vsub.f32 %v2726_v45, %v2852_v17 }
 0x276   :  { %v655_v52 = vsel %vm652_vm15, %v654_v34, %v650_v4  ;;  %v1127_v5 = vsel %vm1124_vm0, %v1126_v59, %v1122_v0  ;;  %v996_v59 = vmul.f32 1.442695, %v944_v13  ;;  %vm1149_vm8 = vweird.f32 %v2929_v23 }
 0x277   :  { %v2982_v15 = vmul.f32 %v2697_v26, %v655_v52  ;;  %v1128_v60 = vmul.f32 %v2776_v8, %v1127_v5  ;;  %2243 = vpow2.f32 %v978_v35  ;;  %v1008_v34 = vmul.f32 1.442695, %v950_v39 }
 0x278   :  { %v2995_v26 = vpop.permute.xlu2 %1625 }
 0x279   :  { %1581 = vperm.xlu2 %2084, %v626_v14   ;;  %v2967_v10 = vpop.xlane.xlu1 %1064 }
 0x27a   :  { %3739 = vst [vmem:[#allocation22_spill] sm:$0xff] %v2967_v10 }
 0x27d   :  { %1068 = vadd.xlane.f32.xlu0 %v2953_v31 }
 0x280   :  { %v3000_v54 = vpop.permute.xlu2 %1673 }
 0x281   :  { %2085 = vset.pattern.permute.xlu2 %v3732_v21  ;;  %v2977_v36 = vpop.xlane.xlu1 %1052 }
 0x282   :  { %1633 = vperm.xlu2 %2085, %v626_v14  }
 0x285   :  { %1056 = vadd.xlane.f32.xlu0 %v2964_v16 }
 0x288   :  { %v3012_v33 = vpop.permute.xlu2 %1721 }
 0x28a   :  { %2086 = vset.pattern.permute.xlu2 %v3730_v55 }
 0x28b   :  { %1681 = vperm.xlu2 %2086, %v626_v14  }
 0x28d   :  { %1637 = vperm.xlu1 %2089, %v641_v48  }
 0x293   :  { %2087 = vset.pattern.permute.xlu2 %v3740_v29 }
 0x294   :  { %1729 = vperm.xlu2 %2087, %v626_v14   ;;  %v2992_v14 = vpop.xlane.xlu0 %1026 }
 0x295   :  { %2090 = vset.pattern.permute.xlu1 %v3730_v55 }
 0x296   :  { %1685 = vperm.xlu1 %2090, %v641_v48  }
 0x299   :  { %v1577_v22 = vpop.permute.xlu1 %1576  ;;  %1641 = vperm.xlu0 %2093, %v2982_v15  }
 0x29a   :  { %v2986_v3 = vmul.f32 %v1577_v22, %v1128_v60  ;;  %v954_v60 = vsub.f32 %v2751_v63, %v2907_v11 }
 0x29c   :  { %2088 = vset.pattern.permute.xlu2 %v3728_v42  ;;  %v2998_v8 = vpop.xlane.xlu0 %1044  ;;  %v1016_v39 = vmul.f32 1.442695, %v954_v60 }
 0x29d   :  { %1586 = vperm.xlu2 %2088, %v641_v48   ;;  %vm1269_vm14 = vweird.f32 %v2998_v8 }
 0x29e   :  { %2091 = vset.pattern.permute.xlu1 %v3740_v29 }
 0x29f   :  { %1733 = vperm.xlu1 %2091, %v641_v48   ;;  %v943_v48 = vsub.f32 %v2738_v32, %v2875_v41 }
 0x2a1   :  { %2094 = vset.pattern.permute.xlu0 %v3730_v55  ;;  %v994_v25 = vmul.f32 1.442695, %v943_v48 }
 0x2a2   :  { %1689 = vperm.xlu0 %2094, %v2982_v15   ;;  %v3017_v38 = vpop.permute.xlu1 %1629 }
 0x2a3   :  { %2245 = vpow2.f32 %v994_v25 }
 0x2a4   :  { %v3002_v50 = vpop.xlane.xlu0 %1032  ;;  %2247 = vrcp.f32 %v2864_v43 }
 0x2a7   :  { %2092 = vset.pattern.permute.xlu1 %v3728_v42  ;;  %v951_v42 = vsub.f32 %v2729_v49, %v2886_v7  ;;  %v3021_v49 = vpop.eup %2243  ;;  %v945_v7 = vsub.f32 %v2741_v53, %v2895_v56 }
 0x2a8   :  { %3741 = vst [vmem:[#allocation23_spill] sm:$0xff] %v3021_v49 }
 0x2a9   :  { %v1010_v4 = vmul.f32 1.442695, %v951_v42  ;;  %v3032_v17 = vpop.eup %2245  ;;  %v998_v0 = vmul.f32 1.442695, %v945_v7 }
 0x2aa   :  { %2099 = vset.pattern.permute.xlu0 %v3740_v29  ;;  %3742 = vst [vmem:[#allocation24_spill] sm:$0xff] %v3032_v17  ;;  %v3034_v41 = vpop.eup %2247 }
 0x2ab   :  { %2249 = vpow2.f32 %v1010_v4  ;;  %v658_v37 = vmul.f32 %v3034_v41, %v2864_v43  ;;  %v3052_v22 = vpop.permute.xlu1 %1677  ;;  %vm663_vm1 = vweird.f32 %v3034_v41 }
 0x2ac   :  { %v3010_v58 = vpop.permute.xlu0 %1621  ;;  %2251 = vrcp.f32 %v2919_v19  ;;  %3746 = vst [vmem:[#allocation28_spill] sm:$0xff] %v3052_v22  ;;  %vm3099_vm5 = vmor %vm662_vm2, %vm663_vm1  ;;  %vm1329_vm1 = vweird.f32 %v2977_v36 }
 0x2ad   :  { %2253 = vpow2.f32 %v1008_v34  ;;  %v659_v42 = vsub.f32 1.0, %v658_v37 }
 0x2ae   :  { %2255 = vrcp.f32 %v2929_v23 }
 0x2af   :  { %2257 = vpow2.f32 %v998_v0  ;;  %v660_v13 = vmul.f32 %v3034_v41, %v659_v42 }
 0x2b0   :  { %2259 = vrcp.f32 %v2998_v8 }
 0x2b1   :  { %v3037_v53 = vpop.eup %2249  ;;  %2261 = vpow2.f32 %v996_v59 }
 0x2b2   :  { %3743 = vst [vmem:[#allocation25_spill] sm:$0xff] %v3037_v53  ;;  %v3039_v56 = vpop.eup %2251  ;;  %2263 = vrcp.f32 %v2977_v36 }
 0x2b3   :  { %v3041_v52 = vpop.eup %2253  ;;  %v1100_v12 = vmul.f32 %v3039_v56, %v2919_v19  ;;  %vm1105_vm3 = vweird.f32 %v3039_v56 }
 0x2b4   :  { %v3026_v45 = vpop.permute.xlu0 %1669  ;;  %3744 = vst [vmem:[#allocation26_spill] sm:$0xff] %v3041_v52  ;;  %v3046_v6 = vpop.eup %2255  ;;  %vm3111_vm7 = vmor %vm1104_vm4, %vm1105_vm3 }
 0x2b5   :  { %v1145_v48 = vmul.f32 %v3046_v6, %v2929_v23  ;;  %v1101_v25 = vsub.f32 1.0, %v1100_v12  ;;  %v3062_v4 = vpop.eup %2257  ;;  %v3078_v37 = vpop.permute.xlu1 %1725  ;;  %vm1150_vm6 = vweird.f32 %v3046_v6 }
 0x2b6   :  { %3747 = vst [vmem:[#allocation29_spill] sm:$0xff] %v3062_v4  ;;  %v3065_v63 = vpop.eup %2259  ;;  %vm3134_vm10 = vmor %vm1149_vm8, %vm1150_vm6 }
 0x2b7   :  { %v1146_v11 = vsub.f32 1.0, %v1145_v48  ;;  %v3071_v7 = vpop.eup %2261  ;;  %v1102_v0 = vmul.f32 %v3039_v56, %v1101_v25  ;;  %v1265_v59 = vmul.f32 %v3065_v63, %v2998_v8  ;;  %3749 = vst [vmem:[#allocation31_spill] sm:$0xff] %v3078_v37  ;;  %vm1270_vm13 = vweird.f32 %v3065_v63 }
 0x2b8   :  { %3748 = vst [vmem:[#allocation30_spill] sm:$0xff] %v3071_v7  ;;  %v3083_v48 = vpop.eup %2263  ;;  %vm3169_vm15 = vmor %vm1269_vm14, %vm1270_vm13 }
 0x2b9   :  { %v1147_v60 = vmul.f32 %v3046_v6, %v1146_v11  ;;  %v1103_v25 = vadd.f32 %v3039_v56, %v1102_v0  ;;  %v1325_v37 = vmul.f32 %v3083_v48, %v2977_v36  ;;  %v1108_v0 = vand.u32 2147483647, %v2919_v19 }
 0x2ba   :  { %vm1330_vm2 = vweird.f32 %v3083_v48 }
 0x2bb   :  { %vm1109_vm11 = vcmp.eq.f32.partialorder %v1108_v0, 8.507059e+37 }
 0x2bc   :  { %v3060_v35 = vpop.permute.xlu0 %1717 }
 0x2c4   :  { %v3019_v32 = vpop.xlane.xlu2 %1036  ;;  %v3081_v12 = vpop.xlane.xlu0 %1050 }
 0x2c5   :  { %2265 = vrcp.f32 %v3019_v32  ;;  %3750 = vst [vmem:[#allocation32_spill] sm:$0xff] %v3081_v12  ;;  %v1110_v12 = vand.u32 2147483648, %v2919_v19  ;;  %v1155_v19 = vand.u32 2147483648, %v2929_v23  ;;  %vm1209_vm4 = vweird.f32 %v3019_v32 }
 0x2c6   :  { %1042 = vadd.xlane.f32.xlu2 %v3021_v49  ;;  %2267 = vpow2.f32 %v1016_v39  ;;  %v666_v39 = vand.u32 2147483647, %v2864_v43 }
 0x2c8   :  { %vm667_vm9 = vcmp.eq.f32.partialorder %v666_v39, 8.507059e+37  ;;  %v1156_v39 = vor.u32 1.1754944e-38, %v1155_v19 }
 0x2c9   :  { %1058 = vadd.xlane.f32.xlu1 %v3032_v17 }
 0x2cb   :  { %v3088_v42 = vpop.eup %2265 }
 0x2cc   :  { %v3043_v5 = vpop.xlane.xlu2 %1066  ;;  %1074 = vadd.xlane.f32.xlu0 %v3037_v53  ;;  %v3094_v11 = vpop.eup %2267  ;;  %v1205_v53 = vmul.f32 %v3088_v42, %v3019_v32  ;;  %vm1210_vm3 = vweird.f32 %v3088_v42 }
 0x2cd   :  { %3745 = vst [vmem:[#allocation27_spill] sm:$0xff] %v3043_v5  ;;  %v661_v5 = vadd.f32 %v3034_v41, %v660_v13  ;;  %v1266_v13 = vsub.f32 1.0, %v1265_v59  ;;  %v3138_v59 = vpop.permute.xlu0 %1571 }
 0x2ce   :  { %1072 = vadd.xlane.f32.xlu2 %v3041_v52  ;;  %3751 = vst [vmem:[#allocation33_spill] sm:$0xff] %v3094_v11 }
 0x2cf   :  { %v665_v22 = vsel %vm3099_vm5, %v3034_v41, %v661_v5  ;;  %v1267_v16 = vmul.f32 %v3065_v63, %v1266_v13  ;;  %v1275_v13 = vand.u32 2147483648, %v2998_v8  ;;  %vm3205_vm5 = vmor %vm1329_vm1, %vm1330_vm2 }
 0x2d1   :  { %v1268_v10 = vadd.f32 %v3065_v63, %v1267_v16 }
 0x2d4   :  { %v3068_v34 = vpop.xlane.xlu2 %1054  ;;  %1062 = vadd.xlane.f32.xlu0 %v3062_v4  ;;  %v1111_v4 = vor.u32 1.1754944e-38, %v1110_v12 }
 0x2d5   :  { %2269 = vrcp.f32 %v3068_v34  ;;  %vm1344_vm13 = vweird.f32 %v3068_v34 }
 0x2d6   :  { %1060 = vadd.xlane.f32.xlu2 %v3071_v7  ;;  %v668_v7 = vand.u32 2147483648, %v2864_v43  ;;  %v1148_v43 = vadd.f32 %v3046_v6, %v1147_v60  ;;  %2271 = vrcp.f32 %v2945_v30  ;;  %v1107_v60 = vsel %vm3111_vm7, %v3039_v56, %v1103_v25  ;;  %vm3217_vm7 = vmor %vm1209_vm4, %vm1210_vm3 }
 0x2d7   :  { %v1112_v56 = vsel %vm1109_vm11, %v1111_v4, %v1107_v60 }
 0x2d8   :  { %v669_v49 = vor.u32 1.1754944e-38, %v668_v7  ;;  %v1206_v7 = vsub.f32 1.0, %v1205_v53 }
 0x2da   :  { %v670_v12 = vsel %vm667_vm9, %v669_v49, %v665_v22 }
 0x2db   :  { %v3127_v17 = vpop.eup %2269  ;;  %v3164_v16 = vmul.f32 %v2723_v44, %v670_v12 }
 0x2dc   :  { %v3106_v52 = vpop.permute.xlu2 %1581  ;;  %1080 = vadd.xlane.f32.xlu0 %v3094_v11  ;;  %v1153_v11 = vand.u32 2147483647, %v2929_v23  ;;  %v1152_v23 = vsel %vm3134_vm10, %v3046_v6, %v1148_v43  ;;  %v1340_v25 = vmul.f32 %v3127_v17, %v3068_v34  ;;  %v3151_v6 = vpop.eup %2271  ;;  %v1207_v43 = vmul.f32 %v3088_v42, %v1206_v7 }
 0x2dd   :  { %3754 = vst [vmem:[#allocation34_spill] sm:$0xff] %v3106_v52  ;;  %v1326_v52 = vsub.f32 1.0, %v1325_v37  ;;  %v1273_v37 = vand.u32 2147483647, %v2998_v8  ;;  %v3179_v8 = vmul.f32 %v3151_v6, %v2945_v30  ;;  %v1335_v7 = vand.u32 2147483648, %v2977_v36 }
 0x2de   :  { %vm1154_vm12 = vcmp.eq.f32.partialorder %v1153_v11, 8.507059e+37  ;;  %v3160_v11 = vmul.f32 %v2768_v9, %v1112_v56  ;;  %v1341_v60 = vsub.f32 1.0, %v1340_v25  ;;  %v1276_v9 = vor.u32 1.1754944e-38, %v1275_v13 }
 0x2df   :  { %v3130_v41 = vpop.xlane.xlu1 %1040  ;;  %v1157_v0 = vsel %vm1154_vm12, %v1156_v39, %v1152_v23  ;;  %v1327_v53 = vmul.f32 %v3083_v48, %v1326_v52  ;;  %vm3173_vm0 = vcmp.eq.f32.partialorder %v1273_v37, 8.507059e+37  ;;  %v1208_v39 = vadd.f32 %v3088_v42, %v1207_v43 }
 0x2e0   :  { %2273 = vrcp.f32 %v3130_v41  ;;  %v3167_v4 = vmul.f32 %v2786_v51, %v1157_v0  ;;  %v1272_v51 = vsel %vm3169_vm15, %v3065_v63, %v1268_v10  ;;  %v1215_v10 = vand.u32 2147483648, %v3019_v32 }
 0x2e1   :  { %v3189_v56 = vadd.f32 %v3083_v48, %v1327_v53  ;;  %v1342_v63 = vmul.f32 %v3127_v17, %v1341_v60  ;;  %v1245_v37 = vand.u32 2147483648, %v3130_v41  ;;  %v1213_v0 = vand.u32 2147483647, %v3019_v32 }
 0x2e2   :  { %1591 = vperm.xlu1 %2092, %v2982_v15   ;;  %v1243_v43 = vand.u32 2147483647, %v3130_v41  ;;  %v3213_v49 = vor.u32 1.1754944e-38, %v1335_v7  ;;  %v3225_v32 = vsel %vm3173_vm0, %v1276_v9, %v1272_v51  ;;  %v1212_v7 = vsel %vm3217_vm7, %v3088_v42, %v1208_v39 }
 0x2e3   :  { %vm1239_vm8 = vweird.f32 %v3130_v41  ;;  %v1216_v1 = vor.u32 1.1754944e-38, %v1215_v10  ;;  %vm1345_vm9 = vweird.f32 %v3127_v17  ;;  %v1246_v52 = vor.u32 1.1754944e-38, %v1245_v37 }
 0x2e4   :  { %v3156_v22 = vpop.permute.xlu2 %1633  ;;  %vm1214_vm11 = vcmp.eq.f32.partialorder %v1213_v0, 8.507059e+37  ;;  %vm1244_vm12 = vcmp.eq.f32.partialorder %v1243_v43, 8.507059e+37  ;;  %vm3247_vm14 = vmor %vm1344_vm13, %vm1345_vm9  ;;  %v1348_v43 = vand.u32 2147483647, %v3068_v34 }
 0x2e5   :  { %3759 = vst [vmem:[#allocation35_spill] sm:$0xff] %v3156_v22  ;;  %v1217_v39 = vsel %vm1214_vm11, %v1216_v1, %v1212_v7 }
 0x2e6   :  { %v2274_v19 = vpop.eup %2273  ;;  %vm1349_vm2 = vcmp.eq.f32.partialorder %v1348_v43, 8.507059e+37 }
 0x2e7   :  { %v1235_v44 = vmul.f32 %v2274_v19, %v3130_v41  ;;  %v3183_v23 = vpop.xlane.xlu1 %1070  ;;  %vm1240_vm6 = vweird.f32 %v2274_v19 }
 0x2e8   :  { %2275 = vrcp.f32 %v3183_v23  ;;  %v3194_v12 = vpop.xlane.xlu0 %1038  ;;  %vm1241_vm10 = vmor %vm1239_vm8, %vm1240_vm6  ;;  %vm1464_vm1 = vweird.f32 %v3183_v23 }
 0x2e9   :  { %v1236_v25 = vsub.f32 1.0, %v1235_v44  ;;  %2277 = vrcp.f32 %v3194_v12  ;;  %vm1224_vm4 = vweird.f32 %v3194_v12 }
 0x2eb   :  { %v1237_v53 = vmul.f32 %v2274_v19, %v1236_v25  ;;  %v1332_v25 = vsel %vm3205_vm5, %v3083_v48, %v3189_v56 }
 0x2ec   :  { %v3221_v22 = vpop.permute.xlu2 %1681 }
 0x2ed   :  { %3768 = vst [vmem:[#allocation36_spill] sm:$0xff] %v3221_v22  ;;  %v1238_v44 = vadd.f32 %v2274_v19, %v1237_v53  ;;  %v1343_v22 = vadd.f32 %v3127_v17, %v1342_v63 }
 0x2ee   :  { %v2276_v5 = vpop.eup %2275  ;;  %1596 = vperm.xlu2 %2088, %v3164_v16  }
 0x2ef   :  { %v2278_v9 = vpop.eup %2277  ;;  %v1242_v51 = vsel %vm1241_vm10, %v2274_v19, %v1238_v44  ;;  %v1460_v42 = vmul.f32 %v2276_v5, %v3183_v23  ;;  %v1350_v19 = vand.u32 2147483648, %v3068_v34  ;;  %v1347_v53 = vsel %vm3247_vm14, %v3127_v17, %v1343_v22 }
 0x2f0   :  { %v1247_v41 = vsel %vm1244_vm12, %v1246_v52, %v1242_v51  ;;  %v1220_v10 = vmul.f32 %v2278_v9, %v3194_v12  ;;  %v3242_v63 = vpop.xlane.xlu0 %1068  ;;  %1737 = vperm.xlu0 %2099, %v2982_v15   ;;  %v1470_v15 = vand.u32 2147483648, %v3183_v23  ;;  %vm1465_vm15 = vweird.f32 %v2276_v5 }
 0x2f1   :  { %v1248_v0 = vmul.f32 %v2925_v27, %v1247_v41  ;;  %v1461_v1 = vsub.f32 1.0, %v1460_v42  ;;  %2279 = vrcp.f32 %v3242_v63  ;;  %v1230_v52 = vand.u32 2147483648, %v3194_v12  ;;  %vm3270_vm3 = vmor %vm1464_vm1, %vm1465_vm15 }
 0x2f2   :  { %v1221_v44 = vsub.f32 1.0, %v1220_v10  ;;  %v1468_v27 = vand.u32 2147483647, %v3183_v23  ;;  %vm1225_vm0 = vweird.f32 %v2278_v9  ;;  %v1228_v42 = vand.u32 2147483647, %v3194_v12 }
 0x2f3   :  { %v1654_v60 = vmul.f32 %v3017_v38, %v1248_v0  ;;  %v1462_v7 = vmul.f32 %v2276_v5, %v1461_v1  ;;  %v1351_v17 = vor.u32 1.1754944e-38, %v1350_v19  ;;  %v1218_v38 = vmul.f32 %v2893_v46, %v1217_v39  ;;  %vm1226_vm6 = vmor %vm1224_vm4, %vm1225_vm0 }
 0x2f4   :  { %v1222_v51 = vmul.f32 %v2278_v9, %v1221_v44  ;;  %v3263_v41 = vpop.permute.xlu2 %1729  ;;  %v1471_v1 = vor.u32 1.1754944e-38, %v1470_v15  ;;  %v1231_v23 = vor.u32 1.1754944e-38, %v1230_v52  ;;  %vm1469_vm7 = vcmp.eq.f32.partialorder %v1468_v27, 8.507059e+37 }
 0x2f5   :  { %v3266_v34 = vadd.f32 %v1654_v60, %v2986_v3  ;;  %v1463_v22 = vadd.f32 %v2276_v5, %v1462_v7  ;;  %v1352_v19 = vsel %vm1349_vm2, %v1351_v17, %v1347_v53  ;;  %vm1229_vm8 = vcmp.eq.f32.partialorder %v1228_v42, 8.507059e+37 }
 0x2f6   :  { %v1223_v37 = vadd.f32 %v2278_v9, %v1222_v51  ;;  %2095 = vset.pattern.permute.xlu2 %v3732_v21  ;;  %v3773_v12 = vsub.f32 1.0, %v3179_v8  ;;  %v3774_v53 = vand.u32 2147483647, %v2977_v36  ;;  %v1605_v8 = vmul.f32 %v3138_v59, %v3160_v11 }
 0x2f7   :  { %v2280_v0 = vpop.eup %2279  ;;  %v1467_v3 = vsel %vm3270_vm3, %v2276_v5, %v1463_v22  ;;  %1645 = vperm.xlu2 %2095, %v3164_v16   ;;  %v1652_v36 = vmul.f32 %v3010_v58, %v1218_v38  ;;  %v1453_v52 = vand.u32 2147483647, %v3242_v63  ;;  %v1455_v27 = vand.u32 2147483648, %v3242_v63 }
 0x2f8   :  { %v1227_v46 = vsel %vm1226_vm6, %v2278_v9, %v1223_v37  ;;  %v1445_v39 = vmul.f32 %v2280_v0, %v3242_v63  ;;  %v1282_v43 = vmul.f32 %v3151_v6, %v3773_v12  ;;  %vm1334_vm9 = vcmp.eq.f32.partialorder %v3774_v53, 8.507059e+37 }
 0x2f9   :  { %v1472_v44 = vsel %vm1469_vm7, %v1471_v1, %v1467_v3  ;;  %v1232_v5 = vsel %vm1229_vm8, %v1231_v23, %v1227_v46  ;;  %v1337_v15 = vsel %vm1334_vm9, %v3213_v49, %v1332_v25  ;;  %v1353_v9 = vmul.f32 %v2911_v2, %v1352_v19 }
 0x2fa   :  { %v1233_v60 = vmul.f32 %v2941_v28, %v1232_v5  ;;  %v1446_v7 = vsub.f32 1.0, %v1445_v39  ;;  %v1473_v13 = vmul.f32 %v2939_v40, %v1472_v44  ;;  %vm1450_vm5 = vweird.f32 %v2280_v0 }
 0x2fb   :  { %v3775_v2 = vsub.f32 %v2748_v57, %v2884_v20  ;;  %v1338_v25 = vmul.f32 %v2837_v61, %v1337_v15  ;;  %v1278_v58 = vmul.f32 %v2791_v24, %v3225_v32  ;;  %v1701_v11 = vmul.f32 %v3000_v54, %v1353_v9 }
 0x2fc   :  { %v1653_v48 = vmul.f32 %v2995_v26, %v1233_v60  ;;  %v1447_v56 = vmul.f32 %v2280_v0, %v1446_v7  ;;  %v1587_v49 = vpop.permute.xlu2 %1586  ;;  %vm1449_vm10 = vweird.f32 %v3242_v63  ;;  %v1660_v26 = vadd.f32 %v1652_v36, %v2937_v47  ;;  %v3776_v7 = vld [vmem:[#allocation15_spill] sm:$0xff] }
 0x2fd   :  { %v1012_v28 = vmul.f32 1.442695, %v3775_v2  ;;  %v1608_v59 = vmul.f32 %v1587_v49, %v3167_v4  ;;  %vm1451_vm11 = vmor %vm1449_vm10, %vm1450_vm5  ;;  %v1456_v42 = vor.u32 1.1754944e-38, %v1455_v27  ;;  %v1283_v57 = vadd.f32 %v3151_v6, %v1282_v43  ;;  %v3779_v2 = vld [vmem:[#allocation5_spill] sm:$0xff] }
 0x2fe   :  { %v1661_v51 = vadd.f32 %v1653_v48, %v1605_v8  ;;  %v1448_v40 = vadd.f32 %v2280_v0, %v1447_v56  ;;  %vm1285_vm12 = vweird.f32 %v3151_v6  ;;  %v1749_v61 = vmul.f32 %v3012_v33, %v1473_v13  ;;  %v3322_v33 = vpop.xlane.xlu0 %1056  ;;  %v3777_v8 = vld [vmem:[#allocation6_spill] sm:$0xff] }
 0x2ff   :  { %v1638_v17 = vpop.permute.xlu1 %1637  ;;  %2096 = vset.pattern.permute.xlu2 %v3730_v55  ;;  %vm1454_vm13 = vcmp.eq.f32.partialorder %v1453_v52, 8.507059e+37  ;;  %vm1284_vm14 = vweird.f32 %v2945_v30  ;;  %v1290_v4 = vand.u32 2147483648, %v2945_v30  ;;  %v1700_v32 = vmul.f32 %v3026_v45, %v1338_v25  ;;  %v3778_v56 = vld [vmem:[#allocation18_spill] sm:$0xff] }
 0x300   :  { %v1709_v24 = vadd.f32 %v1701_v11, %v1661_v51  ;;  %v1452_v20 = vsel %vm1451_vm11, %v2280_v0, %v1448_v40  ;;  %1693 = vperm.xlu2 %2096, %v3164_v16   ;;  %v1656_v47 = vmul.f32 %v1638_v17, %v1278_v58  ;;  %v1288_v38 = vand.u32 2147483647, %v2945_v30  ;;  %vm1286_vm15 = vmor %vm1284_vm14, %vm1285_vm12 }
 0x301   :  { %v1457_v54 = vsel %vm1454_vm13, %v1456_v42, %v1452_v20  ;;  %2281 = vrcp.f32 %v2861_v62  ;;  %v1708_v0 = vadd.f32 %v1700_v32, %v1660_v26  ;;  %v1287_v45 = vsel %vm1286_vm15, %v3151_v6, %v1283_v57  ;;  %v3780_v42 = vld [vmem:[#allocation19_spill] sm:$0xff]  ;;  %v3781_v32 = vld [vmem:[#allocation22_spill] sm:$0xff] }
 0x302   :  { %v1757_v63 = vadd.f32 %v1749_v61, %v1709_v24  ;;  %v1458_v22 = vmul.f32 %v2953_v31, %v1457_v54  ;;  %v3324_v10 = vadd.f32 %v1656_v47, %v1608_v59  ;;  %2283 = vpow2.f32 %v1012_v28 }
 0x303   :  { %v1291_v3 = vor.u32 1.1754944e-38, %v1290_v4  ;;  %vm1289_vm0 = vcmp.eq.f32.partialorder %v1288_v38, 8.507059e+37  ;;  %v683_v60 = vand.u32 2147483648, %v2861_v62  ;;  %v953_v36 = vsub.f32 %v3777_v8, %v3776_v7 }
 0x304   :  { %v1765_v37 = vadd.f32 1e-08, %v1757_v63  ;;  %v1748_v19 = vmul.f32 %v3060_v35, %v1458_v22  ;;  %vm677_vm2 = vweird.f32 %v2861_v62  ;;  %v681_v52 = vand.u32 2147483647, %v2861_v62 }
 0x305   :  { %v1292_v30 = vsel %vm1289_vm0, %v1291_v3, %v1287_v45  ;;  %v684_v13 = vor.u32 1.1754944e-38, %v683_v60  ;;  %v1014_v48 = vmul.f32 1.442695, %v953_v36  ;;  %vm1134_vm8 = vweird.f32 %v2992_v14 }
 0x306   :  { %2285 = vlog2.f32 %v1765_v37  ;;  %v1756_v31 = vadd.f32 %v1748_v19, %v1708_v0  ;;  %v1293_v46 = vmul.f32 %v2805_v18, %v1292_v30  ;;  %vm682_vm4 = vcmp.eq.f32.partialorder %v681_v52, 8.507059e+37 }
 0x307   :  { %v2282_v23 = vpop.eup %2281  ;;  %v1138_v19 = vand.u32 2147483647, %v2992_v14  ;;  %v1140_v45 = vand.u32 2147483648, %v2992_v14  ;;  %v1170_v3 = vand.u32 2147483648, %v3778_v56  ;;  %vm1164_vm9 = vweird.f32 %v3778_v56 }
 0x308   :  { %v1764_v1 = vadd.f32 1e-08, %v1756_v31  ;;  %2100 = vset.pattern.permute.xlu2 %v3740_v29  ;;  %v3332_v39 = vpop.eup %2283  ;;  %v673_v6 = vmul.f32 %v2282_v23, %v2861_v62  ;;  %vm678_vm1 = vweird.f32 %v2282_v23  ;;  %v3367_v40 = vpop.permute.xlu1 %1685  ;;  %v1168_v30 = vand.u32 2147483647, %v3778_v56 }
 0x309   :  { %vm679_vm3 = vmor %vm677_vm2, %vm678_vm1  ;;  %vm1139_vm12 = vcmp.eq.f32.partialorder %v1138_v19, 8.507059e+37  ;;  %v1171_v60 = vor.u32 1.1754944e-38, %v1170_v3  ;;  %vm1179_vm13 = vweird.f32 %v3002_v50  ;;  %v1183_v7 = vand.u32 2147483647, %v3002_v50 }
 0x30a   :  { %2287 = vlog2.f32 %v1764_v1  ;;  %v674_v5 = vsub.f32 1.0, %v673_v6  ;;  %v3784_v1 = vld [vmem:[#allocation16_spill] sm:$0xff]  ;;  %vm1169_vm14 = vcmp.eq.f32.partialorder %v1168_v30, 8.507059e+37  ;;  %vm1359_vm1 = vweird.f32 %v3322_v33  ;;  %v3794_v30 = vld [vmem:[#allocation10_spill] sm:$0xff] }
 0x30b   :  { %v1642_v12 = vpop.permute.xlu0 %1641  ;;  %2289 = vrcp.f32 %v2992_v14  ;;  %v3797_v6 = vld [vmem:[#allocation34_spill] sm:$0xff] }
 0x30c   :  { %v2286_v43 = vpop.eup %2285  ;;  %1076 = vadd.xlane.f32.xlu1 %v3332_v39  ;;  %v3335_v35 = vmul.f32 %v1642_v12, %v1293_v46  ;;  %v675_v18 = vmul.f32 %v2282_v23, %v674_v5  ;;  %2291 = vrcp.f32 %v3778_v56 }
 0x30d   :  { %v1775_v53 = vmul.f32 0.6931472, %v2286_v43  ;;  %2293 = vpow2.f32 %v1014_v48 }
 0x30e   :  { %v676_v9 = vadd.f32 %v2282_v23, %v675_v18  ;;  %2295 = vrcp.f32 %v3002_v50 }
 0x30f   :  { %1789 = vst [vmem:[%s3685_s6 + $0x8] sm:$0xff] %v1775_v53  ;;  %2297 = vrcp.f32 %v3322_v33 }
 0x310   :  { %v2288_v44 = vpop.eup %2287  ;;  %v680_v27 = vsel %vm679_vm3, %v2282_v23, %v676_v9  ;;  %2299 = vrcp.f32 %v3780_v42  ;;  %v3785_v23 = vld [vmem:[#allocation7_spill] sm:$0xff]  ;;  %v1185_v9 = vand.u32 2147483648, %v3002_v50  ;;  %vm1184_vm3 = vcmp.eq.f32.partialorder %v1183_v7, 8.507059e+37 }
 0x311   :  { %v1773_v15 = vmul.f32 0.6931472, %v2288_v44  ;;  %v685_v49 = vsel %vm682_vm4, %v684_v13, %v680_v27  ;;  %v2290_v25 = vpop.eup %2289  ;;  %2301 = vrcp.f32 %v3781_v32  ;;  %v3385_v37 = vpop.permute.xlu1 %1733  ;;  %v955_v46 = vsub.f32 %v3785_v23, %v3784_v1 }
 0x312   :  { %v3353_v28 = vmul.f32 %v3779_v2, %v685_v49  ;;  %v3355_v59 = vpop.eup %2291  ;;  %v1130_v62 = vmul.f32 %v2290_v25, %v2992_v14  ;;  %vm1135_vm6 = vweird.f32 %v2290_v25  ;;  %v1363_v2 = vand.u32 2147483647, %v3322_v33 }
 0x313   :  { %1788 = vst [vmem:[%s3685_s6] sm:$0xff] %v1773_v15  ;;  %v3360_v58 = vpop.eup %2293  ;;  %v1160_v11 = vmul.f32 %v3355_v59, %v3778_v56  ;;  %vm1165_vm7 = vweird.f32 %v3355_v59  ;;  %vm3394_vm5 = vmor %vm1134_vm8, %vm1135_vm6  ;;  %v1141_v15 = vor.u32 1.1754944e-38, %v1140_v45  ;;  %vm1299_vm6 = vweird.f32 %v3780_v42 }
 0x314   :  { %v3364_v51 = vpop.eup %2295  ;;  %v1131_v26 = vsub.f32 1.0, %v1130_v62  ;;  %v3405_v43 = vpop.permute.xlu0 %1689  ;;  %vm3408_vm10 = vmor %vm1164_vm9, %vm1165_vm7  ;;  %v3790_v62 = vld [vmem:[#allocation8_spill] sm:$0xff]  ;;  %vm1364_vm7 = vcmp.eq.f32.partialorder %v1363_v2, 8.507059e+37 }
 0x315   :  { %v3370_v17 = vpop.eup %2297  ;;  %v1161_v57 = vsub.f32 1.0, %v1160_v11  ;;  %v1175_v61 = vmul.f32 %v3364_v51, %v3002_v50  ;;  %vm1180_vm11 = vweird.f32 %v3364_v51  ;;  %v1365_v50 = vand.u32 2147483648, %v3322_v33 }
 0x316   :  { %v1132_v24 = vmul.f32 %v2290_v25, %v1131_v26  ;;  %v1355_v20 = vmul.f32 %v3370_v17, %v3322_v33  ;;  %v3379_v4 = vpop.eup %2299  ;;  %vm1360_vm15 = vweird.f32 %v3370_v17  ;;  %vm3429_vm0 = vmor %vm1179_vm13, %vm1180_vm11 }
 0x317   :  { %v1162_v54 = vmul.f32 %v3355_v59, %v1161_v57  ;;  %v1176_v47 = vsub.f32 1.0, %v1175_v61  ;;  %v3417_v5 = vpop.eup %2301  ;;  %vm3448_vm2 = vmor %vm1359_vm1, %vm1360_vm15  ;;  %v3793_v57 = vld [vmem:[#allocation9_spill] sm:$0xff]  ;;  %vm1300_vm4 = vweird.f32 %v3379_v4 }
 0x318   :  { %v1133_v63 = vadd.f32 %v2290_v25, %v1132_v24  ;;  %v1356_v22 = vsub.f32 1.0, %v1355_v20  ;;  %v1415_v48 = vmul.f32 %v3417_v5, %v3781_v32  ;;  %v1305_v20 = vand.u32 2147483648, %v3780_v42  ;;  %vm3482_vm8 = vmor %vm1299_vm6, %vm1300_vm4 }
 0x319   :  { %v1177_v38 = vmul.f32 %v3364_v51, %v1176_v47  ;;  %v1163_v0 = vadd.f32 %v3355_v59, %v1162_v54 }
 0x31a   :  { %v1137_v12 = vsel %vm3394_vm5, %v2290_v25, %v1133_v63  ;;  %v1357_v14 = vmul.f32 %v3370_v17, %v1356_v22  ;;  %v1186_v25 = vor.u32 1.1754944e-38, %v1185_v9  ;;  %v1416_v47 = vsub.f32 1.0, %v1415_v48 }
 0x31b   :  { %v1167_v44 = vsel %vm3408_vm10, %v3355_v59, %v1163_v0  ;;  %v1142_v8 = vsel %vm1139_vm12, %v1141_v15, %v1137_v12  ;;  %v3445_v59 = vmul.f32 1.442695, %v955_v46  ;;  %v1366_v63 = vor.u32 1.1754944e-38, %v1365_v50 }
 0x31c   :  { %v1358_v36 = vadd.f32 %v3370_v17, %v1357_v14  ;;  %v1172_v27 = vsel %vm1169_vm14, %v1171_v60, %v1167_v44  ;;  %v1143_v11 = vmul.f32 %v3790_v62, %v1142_v8  ;;  %v3489_v23 = vmul.f32 %v3417_v5, %v1416_v47 }
 0x31d   :  { %v3453_v61 = vmul.f32 %v3793_v57, %v1172_v27 }
 0x325   :  { %1601 = vperm.xlu1 %2092, %v3353_v28  }
 0x329   :  { %1078 = vadd.xlane.f32.xlu2 %v3360_v58 }
 0x32d   :  { %2097 = vset.pattern.permute.xlu1 %v3732_v21  ;;  %v1295_v21 = vmul.f32 %v3379_v4, %v3780_v42 }
 0x32e   :  { %1649 = vperm.xlu1 %2097, %v3353_v28  }
 0x32f   :  { %v1296_v53 = vsub.f32 1.0, %v1295_v21  ;;  %v1303_v21 = vand.u32 2147483647, %v3780_v42  ;;  %v3486_v42 = vor.u32 1.1754944e-38, %v1305_v20 }
 0x331   :  { %v1297_v13 = vmul.f32 %v3379_v4, %v1296_v53  ;;  %v1607_v53 = vmul.f32 %v3797_v6, %v1143_v11 }
 0x333   :  { %v3465_v22 = vadd.f32 %v3379_v4, %v1297_v13 }
 0x335   :  { %v1302_v14 = vsel %vm3482_vm8, %v3379_v4, %v3465_v22  ;;  %vm1420_vm8 = vweird.f32 %v3417_v5 }
 0x336   :  { %2098 = vset.pattern.permute.xlu1 %v3730_v55  ;;  %v1178_v55 = vadd.f32 %v3364_v51, %v1177_v38 }
 0x337   :  { %1697 = vperm.xlu1 %2098, %v3353_v28  }
 0x338   :  { %v1182_v49 = vsel %vm3429_vm0, %v3364_v51, %v1178_v55  ;;  %v1362_v51 = vsel %vm3448_vm2, %v3370_v17, %v1358_v36  ;;  %v3798_v55 = vld [vmem:[#allocation21_spill] sm:$0xff]  ;;  %vm3524_vm2 = vcmp.eq.f32.partialorder %v1303_v21, 8.507059e+37 }
 0x339   :  { %v3419_v18 = vpop.xlane.xlu2 %1042  ;;  %v1187_v24 = vsel %vm1184_vm3, %v1186_v25, %v1182_v49 }
 0x33a   :  { %2303 = vrcp.f32 %v3419_v18  ;;  %v1258_v0 = vand.u32 2147483647, %v3419_v18  ;;  %v1260_v19 = vand.u32 2147483648, %v3419_v18  ;;  %v3478_v1 = vmul.f32 %v3794_v30, %v1187_v24  ;;  %v3803_v24 = vld [vmem:[#allocation23_spill] sm:$0xff] }
 0x33b   :  { %vm1254_vm5 = vweird.f32 %v3419_v18 }
 0x33c   :  { %v3437_v56 = vpop.xlane.xlu1 %1058  ;;  %vm3500_vm10 = vcmp.eq.f32.partialorder %v1258_v0, 8.507059e+37  ;;  %v1261_v7 = vor.u32 1.1754944e-38, %v1260_v19  ;;  %v3806_v19 = vld [vmem:[#allocation35_spill] sm:$0xff] }
 0x33d   :  { %2305 = vrcp.f32 %v3437_v56  ;;  %v1378_v31 = vand.u32 2147483647, %v3437_v56  ;;  %v1380_v12 = vand.u32 2147483648, %v3437_v56  ;;  %vm1374_vm11 = vweird.f32 %v3437_v56 }
 0x33f   :  { %v3458_v33 = vpop.xlane.xlu0 %1074  ;;  %2101 = vset.pattern.permute.xlu1 %v3740_v29  ;;  %v1367_v29 = vsel %vm1364_vm7, %v1366_v63, %v1362_v51  ;;  %vm3505_vm12 = vcmp.eq.f32.partialorder %v1378_v31, 8.507059e+37  ;;  %v1381_v50 = vor.u32 1.1754944e-38, %v1380_v12  ;;  %v3807_v12 = vld [vmem:[#allocation24_spill] sm:$0xff] }
 0x340   :  { %v2304_v54 = vpop.eup %2303  ;;  %2307 = vrcp.f32 %v3458_v33  ;;  %v1368_v44 = vmul.f32 %v3798_v55, %v1367_v29  ;;  %vm1494_vm15 = vweird.f32 %v3458_v33  ;;  %v1498_v57 = vand.u32 2147483647, %v3458_v33 }
 0x341   :  { %v1250_v17 = vmul.f32 %v2304_v54, %v3419_v18  ;;  %1741 = vperm.xlu2 %2100, %v3164_v16   ;;  %v3470_v38 = vpop.xlane.xlu2 %1072  ;;  %vm1255_vm9 = vweird.f32 %v2304_v54  ;;  %v1500_v51 = vand.u32 2147483648, %v3458_v33  ;;  %v1418_v16 = vadd.f32 %v3417_v5, %v3489_v23 }
 0x342   :  { %2309 = vrcp.f32 %v3470_v38  ;;  %vm1256_vm13 = vmor %vm1254_vm5, %vm1255_vm9  ;;  %v1483_v29 = vand.u32 2147483647, %v3470_v38  ;;  %v1485_v0 = vand.u32 2147483648, %v3470_v38  ;;  %vm1499_vm6 = vcmp.eq.f32.partialorder %v1498_v57, 8.507059e+37 }
 0x343   :  { %v2306_v45 = vpop.eup %2305  ;;  %v1251_v3 = vsub.f32 1.0, %v1250_v17  ;;  %v1501_v21 = vor.u32 1.1754944e-38, %v1500_v51  ;;  %vm1479_vm7 = vweird.f32 %v3470_v38 }
 0x344   :  { %v1370_v46 = vmul.f32 %v2306_v45, %v3437_v56  ;;  %vm1375_vm14 = vweird.f32 %v2306_v45  ;;  %vm1484_vm5 = vcmp.eq.f32.partialorder %v1483_v29, 8.507059e+37 }
 0x345   :  { %v1252_v15 = vmul.f32 %v2304_v54, %v1251_v3  ;;  %vm1376_vm0 = vmor %vm1374_vm11, %vm1375_vm14  ;;  %vm1419_vm14 = vweird.f32 %v3781_v32 }
 0x346   :  { %v2308_v9 = vpop.eup %2307  ;;  %v1371_v8 = vsub.f32 1.0, %v1370_v46 }
 0x347   :  { %v1253_v36 = vadd.f32 %v2304_v54, %v1252_v15  ;;  %v1490_v27 = vmul.f32 %v2308_v9, %v3458_v33  ;;  %v3510_v13 = vpop.xlane.xlu0 %1062  ;;  %vm1495_vm1 = vweird.f32 %v2308_v9 }
 0x348   :  { %v2310_v48 = vpop.eup %2309  ;;  %v1372_v18 = vmul.f32 %v2306_v45, %v1371_v8  ;;  %2311 = vrcp.f32 %v3510_v13  ;;  %vm1496_vm4 = vmor %vm1494_vm15, %vm1495_vm1  ;;  %vm1404_vm11 = vweird.f32 %v3510_v13 }
 0x349   :  { %v1257_v49 = vsel %vm1256_vm13, %v2304_v54, %v1253_v36  ;;  %v1491_v2 = vsub.f32 1.0, %v1490_v27  ;;  %v1475_v25 = vmul.f32 %v2310_v48, %v3470_v38  ;;  %v3515_v62 = vpop.xlane.xlu2 %1060  ;;  %vm1480_vm3 = vweird.f32 %v2310_v48  ;;  %v3809_v36 = vld [vmem:[#allocation36_spill] sm:$0xff]  ;;  %vm1421_vm15 = vmor %vm1419_vm14, %vm1420_vm8 }
 0x34a   :  { %v1262_v11 = vsel %vm3500_vm10, %v1261_v7, %v1257_v49  ;;  %v1373_v26 = vadd.f32 %v2306_v45, %v1372_v18  ;;  %v3808_v7 = vld [vmem:[#allocation28_spill] sm:$0xff]  ;;  %vm1481_vm9 = vmor %vm1479_vm7, %vm1480_vm3  ;;  %v1486_v18 = vor.u32 1.1754944e-38, %v1485_v0  ;;  %v3813_v0 = vld [vmem:[#allocation11_spill] sm:$0xff] }
 0x34b   :  { %v1263_v20 = vmul.f32 %v3803_v24, %v1262_v11  ;;  %v1492_v54 = vmul.f32 %v2308_v9, %v1491_v2  ;;  %v1476_v47 = vsub.f32 1.0, %v1475_v25  ;;  %v1702_v8 = vmul.f32 %v3808_v7, %v1368_v44  ;;  %v3815_v7 = vld [vmem:[#allocation13_spill] sm:$0xff] }
 0x34c   :  { %v1377_v17 = vsel %vm1376_vm0, %v2306_v45, %v1373_v26  ;;  %v3811_v26 = vld [vmem:[#allocation26_spill] sm:$0xff] }
 0x34d   :  { %v1655_v3 = vmul.f32 %v3806_v19, %v1263_v20  ;;  %v1382_v31 = vsel %vm3505_vm12, %v1381_v50, %v1377_v17  ;;  %v1493_v56 = vadd.f32 %v2308_v9, %v1492_v54  ;;  %v1477_v30 = vmul.f32 %v2310_v48, %v1476_v47  ;;  %v3810_v50 = vld [vmem:[#allocation25_spill] sm:$0xff]  ;;  %v3812_v47 = vld [vmem:[#allocation31_spill] sm:$0xff] }
 0x34e   :  { %v2312_v46 = vpop.eup %2311  ;;  %v1383_v6 = vmul.f32 %v3807_v12, %v1382_v31  ;;  %v1710_v24 = vadd.f32 %v1702_v8, %v3266_v34  ;;  %v1307_v20 = vsel %vm3524_vm2, %v3486_v42, %v1302_v14  ;;  %v1425_v54 = vand.u32 2147483648, %v3781_v32  ;;  %v3814_v31 = vld [vmem:[#allocation29_spill] sm:$0xff] }
 0x34f   :  { %v1663_v45 = vadd.f32 %v1655_v3, %v1607_v53  ;;  %v1497_v55 = vsel %vm1496_vm4, %v2308_v9, %v1493_v56  ;;  %v1478_v15 = vadd.f32 %v2310_v48, %v1477_v30  ;;  %v1400_v60 = vmul.f32 %v2312_v46, %v3510_v13 }
 0x350   :  { %v1703_v52 = vmul.f32 %v3809_v36, %v1383_v6  ;;  %v1502_v27 = vsel %vm1499_vm6, %v1501_v21, %v1497_v55  ;;  %vm1405_vm10 = vweird.f32 %v2312_v46  ;;  %v1408_v53 = vand.u32 2147483647, %v3510_v13 }
 0x351   :  { %v1503_v33 = vmul.f32 %v3810_v50, %v1502_v27  ;;  %v1482_v49 = vsel %vm1481_vm9, %v2310_v48, %v1478_v15  ;;  %v1401_v2 = vsub.f32 1.0, %v1400_v60  ;;  %v1597_v25 = vpop.permute.xlu2 %1596  ;;  %v1410_v9 = vand.u32 2147483648, %v3510_v13  ;;  %vm1406_vm12 = vmor %vm1404_vm11, %vm1405_vm10 }
 0x352   :  { %v1487_v38 = vsel %vm1484_vm5, %v1486_v18, %v1482_v49  ;;  %v1711_v11 = vadd.f32 %v1703_v52, %v1663_v45  ;;  %vm1409_vm13 = vcmp.eq.f32.partialorder %v1408_v53, 8.507059e+37  ;;  %v1308_v19 = vmul.f32 %v3813_v0, %v1307_v20  ;;  %v3817_v49 = vld [vmem:[#allocation32_spill] sm:$0xff] }
 0x353   :  { %v1751_v44 = vmul.f32 %v3263_v41, %v1503_v33  ;;  %v1488_v57 = vmul.f32 %v3811_v26, %v1487_v38  ;;  %v1402_v51 = vmul.f32 %v2312_v46, %v1401_v2  ;;  %v1411_v13 = vor.u32 1.1754944e-38, %v1410_v9  ;;  %v3816_v33 = vld [vmem:[#allocation20_spill] sm:$0xff]  ;;  %v3591_v38 = vpop.xlane.xlu0 %1080 }
 0x354   :  { %v1592_v48 = vpop.permute.xlu1 %1591  ;;  %v1610_v23 = vmul.f32 %v1597_v25, %v3478_v1  ;;  %v1426_v6 = vor.u32 1.1754944e-38, %v1425_v54  ;;  %v1395_v53 = vand.u32 2147483648, %v3515_v62  ;;  %vm1389_vm2 = vweird.f32 %v3515_v62 }
 0x355   :  { %v1759_v41 = vadd.f32 %v1751_v44, %v1711_v11  ;;  %v1750_v17 = vmul.f32 %v3812_v47, %v1488_v57  ;;  %v1403_v29 = vadd.f32 %v2312_v46, %v1402_v51  ;;  %v1609_v34 = vmul.f32 %v1592_v48, %v3453_v61 }
 0x356   :  { %v1423_v61 = vand.u32 2147483647, %v3781_v32  ;;  %v1393_v9 = vand.u32 2147483647, %v3515_v62  ;;  %v1396_v57 = vor.u32 1.1754944e-38, %v1395_v53 }
 0x357   :  { %v1767_v4 = vadd.f32 1e-08, %v1759_v41  ;;  %v1758_v22 = vadd.f32 %v1750_v17, %v1710_v24  ;;  %v1407_v42 = vsel %vm1406_vm12, %v2312_v46, %v1403_v29  ;;  %v1665_v14 = vadd.f32 %v3335_v35, %v1609_v34  ;;  %v3819_v17 = vld [vmem:[#allocation30_spill] sm:$0xff] }
 0x358   :  { %v1412_v63 = vsel %vm1409_vm13, %v1411_v13, %v1407_v42  ;;  %v1422_v35 = vsel %vm1421_vm15, %v3417_v5, %v1418_v16  ;;  %vm1424_vm0 = vcmp.eq.f32.partialorder %v1423_v61, 8.507059e+37  ;;  %vm1394_vm4 = vcmp.eq.f32.partialorder %v1393_v9, 8.507059e+37 }
 0x359   :  { %2313 = vlog2.f32 %v1767_v4  ;;  %v1766_v3 = vadd.f32 1e-08, %v1758_v22  ;;  %v1413_v56 = vmul.f32 %v3814_v31, %v1412_v63  ;;  %v1646_v30 = vpop.permute.xlu2 %1645  ;;  %v1427_v45 = vsel %vm1424_vm0, %v1426_v6, %v1422_v35 }
 0x35a   :  { %2315 = vpow2.f32 %v3445_v59  ;;  %v1658_v46 = vmul.f32 %v1646_v30, %v1308_v19  ;;  %v1428_v59 = vmul.f32 %v3815_v7, %v1427_v45  ;;  %vm1194_vm12 = vweird.f32 %v3816_v33 }
 0x35b   :  { %2317 = vlog2.f32 %v1766_v3  ;;  %v1705_v12 = vmul.f32 %v3405_v43, %v1413_v56  ;;  %v1200_v45 = vand.u32 2147483648, %v3816_v33  ;;  %vm1314_vm13 = vweird.f32 %v3817_v49 }
 0x35c   :  { %v1666_v21 = vadd.f32 %v1658_v46, %v1610_v23  ;;  %2319 = vrcp.f32 %v3515_v62  ;;  %vm1539_vm0 = vweird.f32 %v3591_v38 }
 0x35d   :  { %v3572_v32 = vadd.f32 %v1705_v12, %v1665_v14  ;;  %2321 = vrcp.f32 %v3816_v33 }
 0x35e   :  { %2323 = vrcp.f32 %v3817_v49 }
 0x35f   :  { %v2314_v55 = vpop.eup %2313 }
 0x360   :  { %v3574_v15 = vpop.eup %2315  ;;  %v1779_v60 = vmul.f32 0.6931472, %v2314_v55 }
 0x361   :  { %v2318_v8 = vpop.eup %2317  ;;  %1082 = vadd.xlane.f32.xlu1 %v3574_v15  ;;  %v1694_v1 = vpop.permute.xlu2 %1693 }
 0x362   :  { %1791 = vst [vmem:[%s3685_s6 + $0x18] sm:$0xff] %v1779_v60  ;;  %v1777_v43 = vmul.f32 0.6931472, %v2318_v8  ;;  %v1706_v5 = vmul.f32 %v1694_v1, %v1428_v59  ;;  %v2320_v52 = vpop.eup %2319  ;;  %v1198_v60 = vand.u32 2147483647, %v3816_v33 }
 0x363   :  { %v1385_v27 = vmul.f32 %v2320_v52, %v3515_v62  ;;  %vm1390_vm1 = vweird.f32 %v2320_v52  ;;  %v3596_v11 = vpop.eup %2321  ;;  %v3818_v62 = vld [vmem:[#allocation27_spill] sm:$0xff]  ;;  %v1318_v59 = vand.u32 2147483647, %v3817_v49 }
 0x364   :  { %1790 = vst [vmem:[%s3685_s6 + $0x10] sm:$0xff] %v1777_v43  ;;  %v3584_v36 = vadd.f32 %v1706_v5, %v1666_v21  ;;  %vm1391_vm3 = vmor %vm1389_vm2, %vm1390_vm1  ;;  %v1190_v24 = vmul.f32 %v3596_v11, %v3816_v33  ;;  %vm1195_vm10 = vweird.f32 %v3596_v11  ;;  %vm1199_vm1 = vcmp.eq.f32.partialorder %v1198_v60, 8.507059e+37 }
 0x365   :  { %v1386_v18 = vsub.f32 1.0, %v1385_v27  ;;  %vm3630_vm8 = vmor %vm1194_vm12, %vm1195_vm10  ;;  %v1201_v27 = vor.u32 1.1754944e-38, %v1200_v45  ;;  %vm1319_vm2 = vcmp.eq.f32.partialorder %v1318_v59, 8.507059e+37  ;;  %v1543_v33 = vand.u32 2147483647, %v3591_v38 }
 0x366   :  { %v1191_v16 = vsub.f32 1.0, %v1190_v24 }
 0x367   :  { %v1387_v50 = vmul.f32 %v2320_v52, %v1386_v18 }
 0x368   :  { %v1192_v61 = vmul.f32 %v3596_v11, %v1191_v16 }
 0x369   :  { %v1388_v25 = vadd.f32 %v2320_v52, %v1387_v50  ;;  %v1545_v50 = vand.u32 2147483648, %v3591_v38 }
 0x36a   :  { %v1193_v12 = vadd.f32 %v3596_v11, %v1192_v61 }
 0x36b   :  { %v1392_v44 = vsel %vm1391_vm3, %v2320_v52, %v1388_v25  ;;  %v1546_v9 = vor.u32 1.1754944e-38, %v1545_v50 }
 0x36c   :  { %v1397_v48 = vsel %vm1394_vm4, %v1396_v57, %v1392_v44  ;;  %v1197_v8 = vsel %vm3630_vm8, %v3596_v11, %v1193_v12  ;;  %v3824_v44 = vld [vmem:[#allocation12_spill] sm:$0xff]  ;;  %v3825_v57 = vld [vmem:[#allocation14_spill] sm:$0xff] }
 0x36d   :  { %v1398_v29 = vmul.f32 %v3819_v17, %v1397_v48 }
 0x36f   :  { %v1704_v0 = vmul.f32 %v3367_v40, %v1398_v29 }
 0x371   :  { %v1712_v46 = vadd.f32 %v1704_v0, %v3324_v10  ;;  %v1320_v10 = vand.u32 2147483648, %v3817_v49 }
 0x373   :  { %v1321_v18 = vor.u32 1.1754944e-38, %v1320_v10 }
 0x37a   :  { %1745 = vperm.xlu1 %2101, %v3353_v28   ;;  %v3599_v28 = vpop.eup %2323 }
 0x37b   :  { %v1310_v20 = vmul.f32 %v3599_v28, %v3817_v49  ;;  %vm1315_vm11 = vweird.f32 %v3599_v28  ;;  %v1202_v49 = vsel %vm1199_vm1, %v1201_v27, %v1197_v8 }
 0x37c   :  { %vm3639_vm14 = vmor %vm1314_vm13, %vm1315_vm11 }
 0x37d   :  { %v1311_v4 = vsub.f32 1.0, %v1310_v20 }
 0x37f   :  { %v1077_v2 = vpop.xlane.xlu1 %1076  ;;  %v1312_v31 = vmul.f32 %v3599_v28, %v1311_v4 }
 0x380   :  { %2325 = vrcp.f32 %v1077_v2  ;;  %v1515_v47 = vand.u32 2147483648, %v1077_v2  ;;  %v1513_v13 = vand.u32 2147483647, %v1077_v2  ;;  %vm1509_vm7 = vweird.f32 %v1077_v2 }
 0x381   :  { %2327 = vrcp.f32 %v3591_v38  ;;  %v1313_v21 = vadd.f32 %v3599_v28, %v1312_v31 }
 0x382   :  { %2329 = vrcp.f32 %v3818_v62  ;;  %v1516_v14 = vor.u32 1.1754944e-38, %v1515_v47  ;;  %vm1514_vm5 = vcmp.eq.f32.partialorder %v1513_v13, 8.507059e+37  ;;  %v3826_v13 = vld [vmem:[#allocation33_spill] sm:$0xff] }
 0x383   :  { %v1317_v43 = vsel %vm3639_vm14, %v3599_v28, %v1313_v21 }
 0x384   :  { %v1322_v25 = vsel %vm1319_vm2, %v1321_v18, %v1317_v43 }
 0x386   :  { %v2326_v26 = vpop.eup %2325 }
 0x387   :  { %v1505_v51 = vmul.f32 %v2326_v26, %v1077_v2  ;;  %v3606_v41 = vpop.eup %2327  ;;  %vm1510_vm6 = vweird.f32 %v2326_v26 }
 0x388   :  { %v1535_v22 = vmul.f32 %v3606_v41, %v3591_v38  ;;  %vm1511_vm9 = vmor %vm1509_vm7, %vm1510_vm6  ;;  %v3611_v63 = vpop.eup %2329  ;;  %vm1540_vm15 = vweird.f32 %v3606_v41  ;;  %vm1544_vm6 = vcmp.eq.f32.partialorder %v1543_v33, 8.507059e+37  ;;  %v1440_v38 = vand.u32 2147483648, %v3818_v62 }
 0x389   :  { %v1506_v54 = vsub.f32 1.0, %v1505_v51  ;;  %v1430_v23 = vmul.f32 %v3611_v63, %v3818_v62  ;;  %vm1541_vm3 = vmor %vm1539_vm0, %vm1540_vm15  ;;  %vm1435_vm4 = vweird.f32 %v3611_v63  ;;  %v1323_v51 = vmul.f32 %v3825_v57, %v1322_v25 }
 0x38a   :  { %v1536_v56 = vsub.f32 1.0, %v1535_v22  ;;  %vm1434_vm7 = vweird.f32 %v3818_v62  ;;  %v1441_v4 = vor.u32 1.1754944e-38, %v1440_v38 }
 0x38b   :  { %v1507_v34 = vmul.f32 %v2326_v26, %v1506_v54  ;;  %v1438_v54 = vand.u32 2147483647, %v3818_v62 }
 0x38c   :  { %v1537_v40 = vmul.f32 %v3606_v41, %v1536_v56  ;;  %v3827_v56 = vld [vmem:[#allocation17_spill] sm:$0xff] }
 0x38d   :  { %v1508_v42 = vadd.f32 %v2326_v26, %v1507_v34 }
 0x38e   :  { %v1538_v5 = vadd.f32 %v3606_v41, %v1537_v40 }
 0x38f   :  { %v1512_v19 = vsel %vm1511_vm9, %v2326_v26, %v1508_v42  ;;  %v1203_v26 = vmul.f32 %v3824_v44, %v1202_v49  ;;  %vm1436_vm9 = vmor %vm1434_vm7, %vm1435_vm4 }
 0x390   :  { %v1517_v3 = vsel %vm1514_vm5, %v1516_v14, %v1512_v19  ;;  %v1542_v53 = vsel %vm1541_vm3, %v3606_v41, %v1538_v5  ;;  %vm1439_vm5 = vcmp.eq.f32.partialorder %v1438_v54, 8.507059e+37 }
 0x391   :  { %v1518_v30 = vmul.f32 %v3332_v39, %v1517_v3  ;;  %v1431_v39 = vsub.f32 1.0, %v1430_v23  ;;  %v1547_v20 = vsel %vm1544_vm6, %v1546_v9, %v1542_v53 }
 0x392   :  { %v1548_v16 = vmul.f32 %v3826_v13, %v1547_v20 }
 0x393   :  { %v1752_v35 = vmul.f32 %v3385_v37, %v1518_v30  ;;  %v1432_v52 = vmul.f32 %v3611_v63, %v1431_v39 }
 0x395   :  { %v1760_v6 = vadd.f32 %v1752_v35, %v1712_v46  ;;  %v1433_v11 = vadd.f32 %v3611_v63, %v1432_v52 }
 0x397   :  { %v1768_v37 = vadd.f32 1e-08, %v1760_v6  ;;  %v1602_v7 = vpop.permute.xlu1 %1601  ;;  %v1437_v17 = vsel %vm1436_vm9, %v3611_v63, %v1433_v11 }
 0x398   :  { %v1611_v41 = vmul.f32 %v1602_v7, %v1203_v26  ;;  %v1442_v0 = vsel %vm1439_vm5, %v1441_v4, %v1437_v17 }
 0x399   :  { %2331 = vlog2.f32 %v1768_v37  ;;  %v1443_v30 = vmul.f32 %v3827_v56, %v1442_v0 }
 0x39c   :  { %v1079_v2 = vpop.xlane.xlu2 %1078 }
 0x39d   :  { %2333 = vrcp.f32 %v1079_v2  ;;  %v1530_v19 = vand.u32 2147483648, %v1079_v2  ;;  %v1528_v31 = vand.u32 2147483647, %v1079_v2  ;;  %vm1524_vm11 = vweird.f32 %v1079_v2 }
 0x39f   :  { %v2332_v28 = vpop.eup %2331  ;;  %v1531_v12 = vor.u32 1.1754944e-38, %v1530_v19  ;;  %vm1529_vm13 = vcmp.eq.f32.partialorder %v1528_v31, 8.507059e+37 }
 0x3a0   :  { %v1781_v24 = vmul.f32 0.6931472, %v2332_v28  ;;  %v1650_v48 = vpop.permute.xlu1 %1649 }
 0x3a1   :  { %v1659_v47 = vmul.f32 %v1650_v48, %v1323_v51 }
 0x3a2   :  { %1792 = vst [vmem:[%s3685_s6 + $0x20] sm:$0xff] %v1781_v24 }
 0x3a3   :  { %v2334_v29 = vpop.eup %2333  ;;  %v1667_v34 = vadd.f32 %v1659_v47, %v1611_v41 }
 0x3a4   :  { %v1520_v22 = vmul.f32 %v2334_v29, %v1079_v2  ;;  %v1742_v42 = vpop.permute.xlu2 %1741  ;;  %vm1525_vm10 = vweird.f32 %v2334_v29 }
 0x3a5   :  { %v1754_v14 = vmul.f32 %v1742_v42, %v1548_v16  ;;  %vm1526_vm12 = vmor %vm1524_vm11, %vm1525_vm10 }
 0x3a6   :  { %v1521_v62 = vsub.f32 1.0, %v1520_v22 }
 0x3a7   :  { %v1762_v61 = vadd.f32 %v1754_v14, %v3584_v36  ;;  %v1738_v36 = vpop.permute.xlu0 %1737 }
 0x3a8   :  { %v1522_v3 = vmul.f32 %v2334_v29, %v1521_v62 }
 0x3a9   :  { %v1770_v63 = vadd.f32 1e-08, %v1762_v61  ;;  %v1698_v23 = vpop.permute.xlu1 %1697 }
 0x3aa   :  { %v1523_v46 = vadd.f32 %v2334_v29, %v1522_v3  ;;  %v1707_v35 = vmul.f32 %v1698_v23, %v1443_v30 }
 0x3ab   :  { %2335 = vlog2.f32 %v1770_v63 }
 0x3ac   :  { %v1527_v40 = vsel %vm1526_vm12, %v2334_v29, %v1523_v46  ;;  %v1715_v6 = vadd.f32 %v1707_v35, %v1667_v34 }
 0x3ad   :  { %v1532_v21 = vsel %vm1529_vm13, %v1531_v12, %v1527_v40 }
 0x3ae   :  { %v1533_v39 = vmul.f32 %v3360_v58, %v1532_v21 }
 0x3b0   :  { %v1753_v45 = vmul.f32 %v1738_v36, %v1533_v39 }
 0x3b1   :  { %v2336_v10 = vpop.eup %2335 }
 0x3b2   :  { %v1761_v37 = vadd.f32 %v1753_v45, %v3572_v32  ;;  %v1785_v55 = vmul.f32 0.6931472, %v2336_v10 }
 0x3b4   :  { %v1769_v60 = vadd.f32 1e-08, %v1761_v37  ;;  %1794 = vst [vmem:[%s3685_s6 + $0x30] sm:$0xff] %v1785_v55 }
 0x3b6   :  { %2337 = vlog2.f32 %v1769_v60 }
 0x3bc   :  { %v2338_v7 = vpop.eup %2337 }
 0x3bd   :  { %v1783_v59 = vmul.f32 0.6931472, %v2338_v7 }
 0x3bf   :  { %1793 = vst [vmem:[%s3685_s6 + $0x28] sm:$0xff] %v1783_v59 }
 0x3d4   :  { %v1083_v8 = vpop.xlane.xlu1 %1082 }
 0x3d5   :  { %2339 = vrcp.f32 %v1083_v8  ;;  %v1560_v52 = vand.u32 2147483648, %v1083_v8  ;;  %vm1554_vm14 = vweird.f32 %v1083_v8  ;;  %v1558_v27 = vand.u32 2147483647, %v1083_v8 }
 0x3d7   :  { %v1561_v50 = vor.u32 1.1754944e-38, %v1560_v52  ;;  %vm1559_vm0 = vcmp.eq.f32.partialorder %v1558_v27, 8.507059e+37 }
 0x3db   :  { %v2340_v58 = vpop.eup %2339 }
 0x3dc   :  { %v1550_v1 = vmul.f32 %v2340_v58, %v1083_v8  ;;  %vm1555_vm8 = vweird.f32 %v2340_v58 }
 0x3dd   :  { %vm1556_vm15 = vmor %vm1554_vm14, %vm1555_vm8 }
 0x3de   :  { %v1551_v43 = vsub.f32 1.0, %v1550_v1 }
 0x3e0   :  { %v1552_v5 = vmul.f32 %v2340_v58, %v1551_v43 }
 0x3e2   :  { %v1553_v32 = vadd.f32 %v2340_v58, %v1552_v5 }
 0x3e4   :  { %v1557_v18 = vsel %vm1556_vm15, %v2340_v58, %v1553_v32 }
 0x3e5   :  { %v1562_v33 = vsel %vm1559_vm0, %v1561_v50, %v1557_v18 }
 0x3e6   :  { %v1563_v49 = vmul.f32 %v3574_v15, %v1562_v33 }
 0x3ec   :  { %v1746_v2 = vpop.permute.xlu1 %1745 }
 0x3ed   :  { %v1755_v25 = vmul.f32 %v1746_v2, %v1563_v49 }
 0x3ef   :  { %v1763_v53 = vadd.f32 %v1755_v25, %v1715_v6 }
 0x3f1   :  { %v1771_v9 = vadd.f32 1e-08, %v1763_v53 }
 0x3f3   :  { %2341 = vlog2.f32 %v1771_v9 }
 0x3f9   :  { %v2342_v11 = vpop.eup %2341 }
 0x3fa   :  { %v1787_v28 = vmul.f32 0.6931472, %v2342_v11 }
 0x3fc   :  { %1795 = vst [vmem:[%s3685_s6 + $0x38] sm:$0xff] %v1787_v28 }
 0x3fd   :  { %1800 = vsyncpa [#allocation3], 1 }

</bundles_post_ra>
